<compile_context>
chip_gen: v7x
topology: tpu7x:2x2x1
jax: 0.10.0
libtpu: 0.0.40
codegen_flags: <defaults>
</compile_context>

<pallas_src>
import math

import jax
import jax.numpy as jnp
from jax.experimental import pallas as pl
from jax.experimental.pallas import tpu as pltpu


# ---------------------------------------------------------------------------
# Prologue: 1x1 Conv (BN folded) + SiLU fused with  p + Linear(p)
# Reads the NCHW slab directly and emits token-major (B, S, C2).
# ---------------------------------------------------------------------------

def _conv_proj_kernel(x_ref, wc_ref, bc_ref, wl_ref, bl_ref, o_ref):
    # x:(1,C1,ts)  wc:(C1,C2) bc:(1,C2)  wl:(C2,C2) bl:(1,C2)  o:(1,ts,C2)
    xt = x_ref[0].T                                           # (ts, C1) f32, XLU transpose
    y = jnp.dot(xt.astype(wc_ref.dtype), wc_ref[...],
                preferred_element_type=jnp.float32) + bc_ref[...]
    z = y * jax.nn.sigmoid(y)                                 # Conv + folded BN + SiLU (f32)
    p = z + jnp.dot(z.astype(wl_ref.dtype), wl_ref[...],
                    preferred_element_type=jnp.float32) + bl_ref[...]
    o_ref[0] = p.astype(o_ref.dtype)


def _proj_kernel(x_ref, wl_ref, bl_ref, o_ref):
    # c1 == c2 path (no Conv):  p + linear(p)
    z = x_ref[0].T                                            # (ts, C) f32
    p = z + jnp.dot(z.astype(wl_ref.dtype), wl_ref[...],
                    preferred_element_type=jnp.float32) + bl_ref[...]
    o_ref[0] = p.astype(o_ref.dtype)


def _spatial_tile(S):
    for ts in (1024, 512, 256, 128):
        if S % ts == 0:
            return ts
    return S                                                  # full-extent block (always legal)


def _prologue(x_ncs, kernel, weights, c2):
    B, Cin, S = x_ncs.shape
    ts = _spatial_tile(S)
    in_specs = [pl.BlockSpec((1, Cin, ts), lambda b, s: (b, 0, s))]
    for w in weights:
        in_specs.append(pl.BlockSpec(w.shape, lambda b, s: (0, 0)))
    return pl.pallas_call(
        kernel,
        out_shape=jax.ShapeDtypeStruct((B, S, c2), x_ncs.dtype),
        grid_spec=pltpu.PrefetchScalarGridSpec(
            num_scalar_prefetch=0,
            grid=(B, S // ts),
            in_specs=in_specs,
            out_specs=pl.BlockSpec((1, ts, c2), lambda b, s: (b, s, 0)),
        ),
        compiler_params=pltpu.CompilerParams(
            dimension_semantics=("parallel", "parallel")),
    )(x_ncs, *weights)


# ---------------------------------------------------------------------------
# Fused TransformerLayer kernel (one batch element per grid step)
# ---------------------------------------------------------------------------

def _make_layer_kernel(num_heads, eps, transpose_out):
    def kernel(x_ref, ln1g_ref, ln1b_ref, wqkv_ref, bqkv_ref, wo_ref, bo_ref,
               ln2g_ref, ln2b_ref, w1_ref, w2_ref, o_ref):
        x = x_ref[0]                                          # (S, C) f32
        S, C = x.shape
        hd = C // num_heads
        cdt = wqkv_ref.dtype                                  # matmul operand dtype

        # ---- LayerNorm 1 (f32) ----
        mu = jnp.mean(x, axis=-1, keepdims=True)
        xc = x - mu
        var = jnp.mean(xc * xc, axis=-1, keepdims=True)
        x1 = xc * jax.lax.rsqrt(var + eps) * ln1g_ref[...] + ln1b_ref[...]

        # ---- Fused QKV projection: ONE (S,C)x(C,3C) MXU matmul ----
        qkv = jnp.dot(x1.astype(cdt), wqkv_ref[...],
                      preferred_element_type=jnp.float32) + bqkv_ref[...]
        q, k, v = qkv[:, :C], qkv[:, C:2 * C], qkv[:, 2 * C:]

        # ---- head-major stacks (nh, S, hd); batched attention einsums ----
        qh = jnp.stack([q[:, h * hd:(h + 1) * hd] for h in range(num_heads)], 0)
        kh = jnp.stack([k[:, h * hd:(h + 1) * hd] for h in range(num_heads)], 0)
        vh = jnp.stack([v[:, h * hd:(h + 1) * hd] for h in range(num_heads)], 0)
        s = jnp.einsum('hqd,hkd->hqk', qh.astype(cdt), kh.astype(cdt),
                       preferred_element_type=jnp.float32)    # (nh, S, S) f32
        s = s - jnp.max(s, axis=-1, keepdims=True)
        e = jnp.exp(s)
        p = e * pl.reciprocal(jnp.sum(e, axis=-1, keepdims=True), approx=True)
        ctx = jnp.einsum('hqk,hkd->hqd', p.astype(cdt), vh.astype(cdt),
                         preferred_element_type=jnp.float32)  # (nh, S, hd) f32

        # ---- concat heads + single (S,C)x(C,C) out-projection ----
        cat = jnp.concatenate([ctx[h] for h in range(num_heads)], axis=-1)
        attn = jnp.dot(cat.astype(cdt), wo_ref[...],
                       preferred_element_type=jnp.float32) + bo_ref[...]
        x = x + attn                                          # residual 1 (f32)

        # ---- LayerNorm 2 + MLP (fc1 -> ReLU -> fc2) ----
        mu2 = jnp.mean(x, axis=-1, keepdims=True)
        xc2 = x - mu2
        var2 = jnp.mean(xc2 * xc2, axis=-1, keepdims=True)
        x2 = xc2 * jax.lax.rsqrt(var2 + eps) * ln2g_ref[...] + ln2b_ref[...]
        h1 = jnp.maximum(jnp.dot(x2.astype(cdt), w1_ref[...],
                                 preferred_element_type=jnp.float32), 0.0)
        y = x + jnp.dot(h1.astype(cdt), w2_ref[...],
                        preferred_element_type=jnp.float32)   # residual 2 (f32)

        if transpose_out:
            o_ref[0] = y.T.astype(o_ref.dtype)                # channel-major (C, S) slab
        else:
            o_ref[0] = y.astype(o_ref.dtype)
    return kernel


def _transformer_layer(x_bsc, lp, num_heads, *, compute_dtype, transpose_out,
                       eps=1e-5):
    B, S, C = x_bsc.shape
    hd = C // num_heads
    scale = 1.0 / math.sqrt(hd)
    f32 = jnp.float32
    Wi, bi = lp['in_w'], lp['in_b']
    # Fold self.q/self.k/self.v (bias-free) into the MHA in_proj, fold 1/sqrt(hd)
    # into the q weights/bias, and concatenate into ONE lane-dense (C, 3C) matrix.
    Aq = (Wi[:C] @ lp['wq']).T * scale
    Ak = (Wi[C:2 * C] @ lp['wk']).T
    Av = (Wi[2 * C:] @ lp['wv']).T
    wqkv = jnp.concatenate([Aq, Ak, Av], axis=1).astype(compute_dtype)       # (C, 3C)
    bqkv = jnp.concatenate([bi[:C] * scale, bi[C:2 * C], bi[2 * C:]]
                           ).reshape(1, 3 * C).astype(f32)
    wo = lp['out_w'].T.astype(compute_dtype)                                 # (C, C)
    bo = lp['out_b'].reshape(1, C).astype(f32)
    ln1g = lp['ln1_g'].reshape(1, C).astype(f32)
    ln1b = lp['ln1_b'].reshape(1, C).astype(f32)
    ln2g = lp['ln2_g'].reshape(1, C).astype(f32)
    ln2b = lp['ln2_b'].reshape(1, C).astype(f32)
    w1 = lp['fc1_w'].T.astype(compute_dtype)                                 # (C, 4C)
    w2 = lp['fc2_w'].T.astype(compute_dtype)                                 # (4C, C)
    weights = (ln1g, ln1b, wqkv, bqkv, wo, bo, ln2g, ln2b, w1, w2)

    # Advisory cost estimate + explicit scoped-VMEM budget.
    wsize = jnp.dtype(compute_dtype).itemsize
    cost = pl.CostEstimate(
        flops=B * (24 * S * C * C + 4 * S * S * C),
        transcendentals=B * (num_heads * S * S + 3 * S),
        bytes_accessed=2 * B * S * C * 4 + 12 * C * C * wsize + 10 * C * 4)
    need = (2 * 12 * C * C * wsize                 # double-buffered weight blocks
            + 4 * 2 * S * C * 4                    # in/out activation blocks
            + 3 * S * C * (4 + wsize)              # qkv result + casts / head stacks
            + 5 * num_heads * S * S * 4            # scores / exp / probs temporaries
            + S * 4 * C * (4 + wsize)              # MLP hidden
            + 6 * S * C * 4)                       # misc f32 temporaries
    vmem_limit = int(min(100 * 2 ** 20, max(32 * 2 ** 20, 1.5 * need)))

    if transpose_out:
        out_shape = jax.ShapeDtypeStruct((B, C, S), x_bsc.dtype)
        out_spec = pl.BlockSpec((1, C, S), lambda b: (b, 0, 0))
    else:
        out_shape = jax.ShapeDtypeStruct((B, S, C), x_bsc.dtype)
        out_spec = pl.BlockSpec((1, S, C), lambda b: (b, 0, 0))

    in_specs = [pl.BlockSpec((1, S, C), lambda b: (b, 0, 0))]
    for w in weights:
        # Constant-index weight blocks stay resident across the grid.
        # TODO(synk): on v7x (64 MiB VMEM) add pipeline_mode=pl.Buffered(1) here to
        #             drop the unused second weight buffer if VMEM gets tight.
        in_specs.append(pl.BlockSpec(w.shape, lambda b: (0, 0)))

    return pl.pallas_call(
        _make_layer_kernel(num_heads, eps, transpose_out),
        out_shape=out_shape,
        grid_spec=pltpu.PrefetchScalarGridSpec(
            num_scalar_prefetch=0,
            grid=(B,),
            in_specs=in_specs,
            out_specs=out_spec,
        ),
        compiler_params=pltpu.CompilerParams(
            dimension_semantics=("parallel",),
            vmem_limit_bytes=vmem_limit),
        cost_estimate=cost,
    )(x_bsc, *weights)


# ---------------------------------------------------------------------------
# Full TransformerBlock forward (Pallas path)
# ---------------------------------------------------------------------------

def transformer_block_forward(x_nchw, params, num_heads, *,
                              compute_dtype=jnp.bfloat16):
    """x_nchw: (B, c1, W, H) float32. Returns (B, c2, W, H).

    compute_dtype: dtype of MXU matmul operands (f32 accumulation; LayerNorm,
    softmax statistics and residuals always stay f32).  Use jnp.float32 for
    exact-precision matmuls.
    """
    eps_bn = 1e-5
    B, C1, Wd, Hd = x_nchw.shape
    S = Wd * Hd
    lin_w = params['lin_w']
    C2 = lin_w.shape[0]
    wl = lin_w.T.astype(compute_dtype)
    bl = params['lin_b'].reshape(1, C2).astype(jnp.float32)
    # NCHW -> (B, C1, S) is a free reshape; spatial order matches torch flatten(2).
    # The channel->token transpose happens inside the prologue kernel (no extra
    # HBM pass for a host-side transpose).
    x_ncs = x_nchw.reshape(B, C1, S)
    if 'conv_w' in params:                       # c1 != c2: Conv+BN+SiLU+proj, fused
        scale = params['bn_g'] * jax.lax.rsqrt(params['bn_v'] + eps_bn)
        wc = (params['conv_w'][:, :, 0, 0] * scale[:, None]).T.astype(compute_dtype)
        bc = (params['bn_b'] - params['bn_m'] * scale).reshape(1, C2).astype(jnp.float32)
        x = _prologue(x_ncs, _conv_proj_kernel, (wc, bc, wl, bl), C2)
    else:                                        # c1 == c2: just p + linear(p)
        x = _prologue(x_ncs, _proj_kernel, (wl, bl), C2)
    layers = params['layers']
    if not layers:
        return jnp.transpose(x, (0, 2, 1)).reshape(B, C2, Wd, Hd)
    for li, lp in enumerate(layers):
        # The LAST layer writes its output already channel-major (B, C2, S) so the
        # epilogue below is a free reshape instead of a host-side transpose.
        x = _transformer_layer(x, lp, num_heads, compute_dtype=compute_dtype,
                               transpose_out=(li == len(layers) - 1))
    return x.reshape(B, C2, Wd, Hd)


# ---------------------------------------------------------------------------
# Pure-JAX reference (unfused, follows the PyTorch math directly)
# ---------------------------------------------------------------------------

def _layernorm(x, g, b, eps=1e-5):
    mu = jnp.mean(x, axis=-1, keepdims=True)
    var = jnp.mean((x - mu) ** 2, axis=-1, keepdims=True)
    return (x - mu) / jnp.sqrt(var + eps) * g + b


def transformer_block_reference(x_nchw, params, num_heads):
    y = x_nchw
    if 'conv_w' in params:
        cw = params['conv_w'][:, :, 0, 0]
        y = jnp.einsum('bchw,oc->bohw', x_nchw, cw)
        scale = params['bn_g'] / jnp.sqrt(params['bn_v'] + 1e-5)
        bias = params['bn_b'] - params['bn_m'] * scale
        y = y * scale[None, :, None, None] + bias[None, :, None, None]
        y = y * jax.nn.sigmoid(y)
    B, C, Wd, Hd = y.shape
    S = Wd * Hd
    hd = C // num_heads
    p = jnp.transpose(y.reshape(B, C, S), (2, 0, 1))            # (S, B, C)
    x = p + p @ params['lin_w'].T + params['lin_b']
    for lp in params['layers']:
        x_ = _layernorm(x, lp['ln1_g'], lp['ln1_b'])
        q = (x_ @ lp['wq'].T) @ lp['in_w'][:C].T + lp['in_b'][:C]
        k = (x_ @ lp['wk'].T) @ lp['in_w'][C:2 * C].T + lp['in_b'][C:2 * C]
        v = (x_ @ lp['wv'].T) @ lp['in_w'][2 * C:].T + lp['in_b'][2 * C:]
        qh = q.reshape(S, B, num_heads, hd)
        kh = k.reshape(S, B, num_heads, hd)
        vh = v.reshape(S, B, num_heads, hd)
        s = jnp.einsum('sbhd,tbhd->bhst', qh, kh) / math.sqrt(hd)
        a = jax.nn.softmax(s, axis=-1)
        o = jnp.einsum('bhst,tbhd->sbhd', a, vh).reshape(S, B, C)
        o = o @ lp['out_w'].T + lp['out_b']
        x = o + x
        x_ = _layernorm(x, lp['ln2_g'], lp['ln2_b'])
        x = x + jnp.maximum(x_ @ lp['fc1_w'].T, 0.0) @ lp['fc2_w'].T
    return jnp.transpose(x, (1, 2, 0)).reshape(B, C, Wd, Hd)


if __name__ == "__main__":
    key = jax.random.PRNGKey(0)
    keys = iter(jax.random.split(key, 128))

    def nrm(shape, s=0.1):
        return s * jax.random.normal(next(keys), shape, dtype=jnp.float32)

    def make_layer_params(C):
        return {
            'ln1_g': 1.0 + nrm((C,), 0.1), 'ln1_b': nrm((C,), 0.1),
            'wq': nrm((C, C), 0.15), 'wk': nrm((C, C), 0.15), 'wv': nrm((C, C), 0.15),
            'in_w': nrm((3 * C, C), 0.15), 'in_b': nrm((3 * C,), 0.1),
            'out_w': nrm((C, C), 0.15), 'out_b': nrm((C,), 0.1),
            'ln2_g': 1.0 + nrm((C,), 0.1), 'ln2_b': nrm((C,), 0.1),
            'fc1_w': nrm((4 * C, C), 0.15), 'fc2_w': nrm((C, 4 * C), 0.15),
        }

    fwd = jax.jit(transformer_block_forward,
                  static_argnames=("num_heads", "compute_dtype"))

    # --- case 1: c1 != c2 (Conv prologue), 2 layers ---
    B, C1, C2, Wd, Hd = 2, 16, 32, 8, 8
    num_heads, num_layers = 4, 2
    x = jax.random.normal(next(keys), (B, C1, Wd, Hd), dtype=jnp.float32)
    params = {
        'conv_w': nrm((C2, C1, 1, 1), 0.2),
        'bn_g': 1.0 + nrm((C2,), 0.1), 'bn_b': nrm((C2,), 0.1),
        'bn_m': nrm((C2,), 0.1), 'bn_v': jnp.abs(1.0 + nrm((C2,), 0.1)),
        'lin_w': nrm((C2, C2), 0.1), 'lin_b': nrm((C2,), 0.1),
        'layers': [make_layer_params(C2) for _ in range(num_layers)],
    }
    ref = transformer_block_reference(x, params, num_heads)

    out_f32 = jax.block_until_ready(
        fwd(x, params, num_heads=num_heads, compute_dtype=jnp.float32))
    assert out_f32.shape == (B, C2, Wd, Hd)
    err = float(jnp.max(jnp.abs(out_f32 - ref)))
    assert err < 3e-2, f"f32 path max err {err}"

    out_bf16 = jax.block_until_ready(
        fwd(x, params, num_heads=num_heads, compute_dtype=jnp.bfloat16))
    err_bf = float(jnp.max(jnp.abs(out_bf16 - ref)))
    assert err_bf < 2e-1, f"bf16 path max err {err_bf}"   # bf16 operands, f32 accumulate

    # --- case 2: c1 == c2 (no Conv path), 1 layer ---
    B2, C, W2, H2 = 1, 32, 4, 4
    x2 = jax.random.normal(next(keys), (B2, C, W2, H2), dtype=jnp.float32)
    params2 = {
        'lin_w': nrm((C, C), 0.1), 'lin_b': nrm((C,), 0.1),
        'layers': [make_layer_params(C)],
    }
    ref2 = transformer_block_reference(x2, params2, num_heads)
    out2 = jax.block_until_ready(
        fwd(x2, params2, num_heads=num_heads, compute_dtype=jnp.float32))
    err2 = float(jnp.max(jnp.abs(out2 - ref2)))
    assert err2 < 3e-2, f"no-conv path max err {err2}"

    print("KERNEL_OK")
</pallas_src>

<mosaic_0001>
module attributes {stable_mosaic.version = 11 : i64} {
  func.func @_conv_proj_kernel(%arg0: i32, %arg1: i32, %arg2: memref<1x16x64xf32, #tpu.memory_space<vmem>>, %arg3: memref<16x32xf32, #tpu.memory_space<vmem>>, %arg4: memref<1x32xf32, #tpu.memory_space<vmem>>, %arg5: memref<32x32xf32, #tpu.memory_space<vmem>>, %arg6: memref<1x32xf32, #tpu.memory_space<vmem>>, %arg7: memref<1x64x32xf32, #tpu.memory_space<vmem>>) attributes {dimension_semantics = [#tpu.dimension_semantics<parallel>, #tpu.dimension_semantics<parallel>], iteration_bounds = array<i64: 2, 1>, scalar_prefetch = 0 : i64, scratch_operands = 0 : i64, tpu.core_type = #tpu.core_type<tc>, window_params = [{transform_indices = @transform_0, window_bounds = array<i64: 1, 16, 64>}, {pipeline_mode = #tpu.pipeline_mode<synchronous>, transform_indices = @transform_1, window_bounds = array<i64: 16, 32>}, {pipeline_mode = #tpu.pipeline_mode<synchronous>, transform_indices = @transform_2, window_bounds = array<i64: 1, 32>}, {pipeline_mode = #tpu.pipeline_mode<synchronous>, transform_indices = @transform_3, window_bounds = array<i64: 32, 32>}, {pipeline_mode = #tpu.pipeline_mode<synchronous>, transform_indices = @transform_4, window_bounds = array<i64: 1, 32>}, {transform_indices = @transform_5, window_bounds = array<i64: 1, 64, 32>}]} {
    %c0 = arith.constant 0 : index
    %c0_0 = arith.constant 0 : index
    %c0_1 = arith.constant 0 : index
    %0 = vector.load %arg2[%c0, %c0_0, %c0_1] : memref<1x16x64xf32, #tpu.memory_space<vmem>>, vector<1x16x64xf32>
    %1 = vector.shape_cast %0 : vector<1x16x64xf32> to vector<16x64xf32>
    %2 = tpu.transpose %1, [1, 0] : vector<16x64xf32> -> vector<64x16xf32>
    %c0_2 = arith.constant 0 : index
    %c0_3 = arith.constant 0 : index
    %3 = vector.load %arg3[%c0_2, %c0_3] : memref<16x32xf32, #tpu.memory_space<vmem>>, vector<16x32xf32>
    %cst = arith.constant dense<0.000000e+00> : vector<64x32xf32>
    %4 = tpu.matmul %2, %3, %cst {dimension_numbers = #tpu.dot_dimension_numbers<[1], [0], [0], [1], [0, 0, 1, 1], [], []>} : vector<64x16xf32>, vector<16x32xf32>, vector<64x32xf32> -> vector<64x32xf32>
    %c0_4 = arith.constant 0 : index
    %c0_5 = arith.constant 0 : index
    %5 = vector.load %arg4[%c0_4, %c0_5] : memref<1x32xf32, #tpu.memory_space<vmem>>, vector<1x32xf32>
    %6 = vector.broadcast %5 : vector<1x32xf32> to vector<64x32xf32>
    %7 = arith.addf %4, %6 : vector<64x32xf32>
    %8 = arith.negf %7 : vector<64x32xf32>
    %9 = math.exp %8 : vector<64x32xf32>
    %cst_6 = arith.constant 1.000000e+00 : f32
    %10 = vector.broadcast %cst_6 : f32 to vector<64x32xf32>
    %11 = arith.addf %10, %9 : vector<64x32xf32>
    %12 = arith.divf %10, %11 : vector<64x32xf32>
    %13 = arith.mulf %7, %12 : vector<64x32xf32>
    %c0_7 = arith.constant 0 : index
    %c0_8 = arith.constant 0 : index
    %14 = vector.load %arg5[%c0_7, %c0_8] : memref<32x32xf32, #tpu.memory_space<vmem>>, vector<32x32xf32>
    %cst_9 = arith.constant dense<0.000000e+00> : vector<64x32xf32>
    %15 = tpu.matmul %13, %14, %cst_9 {dimension_numbers = #tpu.dot_dimension_numbers<[1], [0], [0], [1], [0, 0, 1, 1], [], []>} : vector<64x32xf32>, vector<32x32xf32>, vector<64x32xf32> -> vector<64x32xf32>
    %16 = arith.addf %13, %15 : vector<64x32xf32>
    %c0_10 = arith.constant 0 : index
    %c0_11 = arith.constant 0 : index
    %17 = vector.load %arg6[%c0_10, %c0_11] : memref<1x32xf32, #tpu.memory_space<vmem>>, vector<1x32xf32>
    %18 = vector.broadcast %17 : vector<1x32xf32> to vector<64x32xf32>
    %19 = arith.addf %16, %18 : vector<64x32xf32>
    %c0_12 = arith.constant 0 : index
    %c0_13 = arith.constant 0 : index
    %c0_14 = arith.constant 0 : index
    %20 = vector.load %arg7[%c0_12, %c0_13, %c0_14] : memref<1x64x32xf32, #tpu.memory_space<vmem>>, vector<1x64x32xf32>
    %21 = vector.shape_cast %20 : vector<1x64x32xf32> to vector<64x32xf32>
    %22 = vector.shape_cast %19 : vector<64x32xf32> to vector<1x64x32xf32>
    tpu.vector_store %arg7[%c0_12, %c0_13, %c0_14], %22 {strides = array<i32>} : memref<1x64x32xf32, #tpu.memory_space<vmem>>, vector<1x64x32xf32>,
    return
  }
  func.func @transform_0(%arg0: i32, %arg1: i32) -> (i32, i32, i32) {
    %c0_i32 = arith.constant 0 : i32
    %c0_i32_0 = arith.constant 0 : i32
    return %arg0, %c0_i32, %arg1 : i32, i32, i32
  }
  func.func @transform_1(%arg0: i32, %arg1: i32) -> (i32, i32) {
    %c0_i32 = arith.constant 0 : i32
    %c0_i32_0 = arith.constant 0 : i32
    %c0_i32_1 = arith.constant 0 : i32
    return %c0_i32, %c0_i32_0 : i32, i32
  }
  func.func @transform_2(%arg0: i32, %arg1: i32) -> (i32, i32) {
    %c0_i32 = arith.constant 0 : i32
    %c0_i32_0 = arith.constant 0 : i32
    %c0_i32_1 = arith.constant 0 : i32
    return %c0_i32, %c0_i32_0 : i32, i32
  }
  func.func @transform_3(%arg0: i32, %arg1: i32) -> (i32, i32) {
    %c0_i32 = arith.constant 0 : i32
    %c0_i32_0 = arith.constant 0 : i32
    %c0_i32_1 = arith.constant 0 : i32
    return %c0_i32, %c0_i32_0 : i32, i32
  }
  func.func @transform_4(%arg0: i32, %arg1: i32) -> (i32, i32) {
    %c0_i32 = arith.constant 0 : i32
    %c0_i32_0 = arith.constant 0 : i32
    %c0_i32_1 = arith.constant 0 : i32
    return %c0_i32, %c0_i32_0 : i32, i32
  }
  func.func @transform_5(%arg0: i32, %arg1: i32) -> (i32, i32, i32) {
    %c0_i32 = arith.constant 0 : i32
    %c0_i32_0 = arith.constant 0 : i32
    return %arg0, %arg1, %c0_i32 : i32, i32, i32
  }
}

module attributes {stable_mosaic.version = 11 : i64} {
  func.func @kernel(%arg0: i32, %arg1: memref<1x64x32xf32, #tpu.memory_space<vmem>>, %arg2: memref<1x32xf32, #tpu.memory_space<vmem>>, %arg3: memref<1x32xf32, #tpu.memory_space<vmem>>, %arg4: memref<32x96xf32, #tpu.memory_space<vmem>>, %arg5: memref<1x96xf32, #tpu.memory_space<vmem>>, %arg6: memref<32x32xf32, #tpu.memory_space<vmem>>, %arg7: memref<1x32xf32, #tpu.memory_space<vmem>>, %arg8: memref<1x32xf32, #tpu.memory_space<vmem>>, %arg9: memref<1x32xf32, #tpu.memory_space<vmem>>, %arg10: memref<32x128xf32, #tpu.memory_space<vmem>>, %arg11: memref<128x32xf32, #tpu.memory_space<vmem>>, %arg12: memref<1x64x32xf32, #tpu.memory_space<vmem>>) attributes {dimension_semantics = [#tpu.dimension_semantics<parallel>], iteration_bounds = array<i64: 2>, scalar_prefetch = 0 : i64, scratch_operands = 0 : i64, tpu.core_type = #tpu.core_type<tc>, window_params = [{transform_indices = @transform_0, window_bounds = array<i64: 1, 64, 32>}, {pipeline_mode = #tpu.pipeline_mode<synchronous>, transform_indices = @transform_1, window_bounds = array<i64: 1, 32>}, {pipeline_mode = #tpu.pipeline_mode<synchronous>, transform_indices = @transform_2, window_bounds = array<i64: 1, 32>}, {pipeline_mode = #tpu.pipeline_mode<synchronous>, transform_indices = @transform_3, window_bounds = array<i64: 32, 96>}, {pipeline_mode = #tpu.pipeline_mode<synchronous>, transform_indices = @transform_4, window_bounds = array<i64: 1, 96>}, {pipeline_mode = #tpu.pipeline_mode<synchronous>, transform_indices = @transform_5, window_bounds = array<i64: 32, 32>}, {pipeline_mode = #tpu.pipeline_mode<synchronous>, transform_indices = @transform_6, window_bounds = array<i64: 1, 32>}, {pipeline_mode = #tpu.pipeline_mode<synchronous>, transform_indices = @transform_7, window_bounds = array<i64: 1, 32>}, {pipeline_mode = #tpu.pipeline_mode<synchronous>, transform_indices = @transform_8, window_bounds = array<i64: 1, 32>}, {pipeline_mode = #tpu.pipeline_mode<synchronous>, transform_indices = @transform_9, window_bounds = array<i64: 32, 128>}, {pipeline_mode = #tpu.pipeline_mode<synchronous>, transform_indices = @transform_10, window_bounds = array<i64: 128, 32>}, {transform_indices = @transform_11, window_bounds = array<i64: 1, 64, 32>}]} {
    %c0 = arith.constant 0 : index
    %c0_0 = arith.constant 0 : index
    %c0_1 = arith.constant 0 : index
    %0 = vector.load %arg1[%c0, %c0_0, %c0_1] : memref<1x64x32xf32, #tpu.memory_space<vmem>>, vector<1x64x32xf32>
    %1 = vector.shape_cast %0 : vector<1x64x32xf32> to vector<64x32xf32>
    %cst = arith.constant dense<0.000000e+00> : vector<64xf32>
    %2 = vector.multi_reduction <add>, %1, %cst [1] : vector<64x32xf32> to vector<64xf32>
    %3 = vector.shape_cast %2 : vector<64xf32> to vector<64x1xf32>
    %cst_2 = arith.constant 3.200000e+01 : f32
    %4 = vector.broadcast %cst_2 : f32 to vector<64x1xf32>
    %5 = arith.divf %3, %4 : vector<64x1xf32>
    %6 = vector.broadcast %5 : vector<64x1xf32> to vector<64x32xf32>
    %7 = arith.subf %1, %6 : vector<64x32xf32>
    %8 = arith.mulf %7, %7 : vector<64x32xf32>
    %cst_3 = arith.constant dense<0.000000e+00> : vector<64xf32>
    %9 = vector.multi_reduction <add>, %8, %cst_3 [1] : vector<64x32xf32> to vector<64xf32>
    %10 = vector.shape_cast %9 : vector<64xf32> to vector<64x1xf32>
    %cst_4 = arith.constant 3.200000e+01 : f32
    %11 = vector.broadcast %cst_4 : f32 to vector<64x1xf32>
    %12 = arith.divf %10, %11 : vector<64x1xf32>
    %cst_5 = arith.constant 9.99999974E-6 : f32
    %13 = vector.broadcast %cst_5 : f32 to vector<64x1xf32>
    %14 = arith.addf %12, %13 : vector<64x1xf32>
    %15 = math.rsqrt %14 : vector<64x1xf32>
    %16 = vector.broadcast %15 : vector<64x1xf32> to vector<64x32xf32>
    %17 = arith.mulf %7, %16 : vector<64x32xf32>
    %c0_6 = arith.constant 0 : index
    %c0_7 = arith.constant 0 : index
    %18 = vector.load %arg2[%c0_6, %c0_7] : memref<1x32xf32, #tpu.memory_space<vmem>>, vector<1x32xf32>
    %19 = vector.broadcast %18 : vector<1x32xf32> to vector<64x32xf32>
    %20 = arith.mulf %17, %19 : vector<64x32xf32>
    %c0_8 = arith.constant 0 : index
    %c0_9 = arith.constant 0 : index
    %21 = vector.load %arg3[%c0_8, %c0_9] : memref<1x32xf32, #tpu.memory_space<vmem>>, vector<1x32xf32>
    %22 = vector.broadcast %21 : vector<1x32xf32> to vector<64x32xf32>
    %23 = arith.addf %20, %22 : vector<64x32xf32>
    %c0_10 = arith.constant 0 : index
    %c0_11 = arith.constant 0 : index
    %24 = vector.load %arg4[%c0_10, %c0_11] : memref<32x96xf32, #tpu.memory_space<vmem>>, vector<32x96xf32>
    %cst_12 = arith.constant dense<0.000000e+00> : vector<64x96xf32>
    %25 = tpu.matmul %23, %24, %cst_12 {dimension_numbers = #tpu.dot_dimension_numbers<[1], [0], [0], [1], [0, 0, 1, 1], [], []>} : vector<64x32xf32>, vector<32x96xf32>, vector<64x96xf32> -> vector<64x96xf32>
    %c0_13 = arith.constant 0 : index
    %c0_14 = arith.constant 0 : index
    %26 = vector.load %arg5[%c0_13, %c0_14] : memref<1x96xf32, #tpu.memory_space<vmem>>, vector<1x96xf32>
    %27 = vector.broadcast %26 : vector<1x96xf32> to vector<64x96xf32>
    %28 = arith.addf %25, %27 : vector<64x96xf32>
    %29 = vector.extract_strided_slice %28 {offsets = [0, 0], sizes = [64, 32], strides = [1, 1]} : vector<64x96xf32> to vector<64x32xf32>
    %30 = vector.extract_strided_slice %28 {offsets = [0, 32], sizes = [64, 32], strides = [1, 1]} : vector<64x96xf32> to vector<64x32xf32>
    %31 = vector.extract_strided_slice %28 {offsets = [0, 64], sizes = [64, 32], strides = [1, 1]} : vector<64x96xf32> to vector<64x32xf32>
    %32 = vector.extract_strided_slice %29 {offsets = [0, 0], sizes = [64, 8], strides = [1, 1]} : vector<64x32xf32> to vector<64x8xf32>
    %33 = vector.extract_strided_slice %29 {offsets = [0, 8], sizes = [64, 8], strides = [1, 1]} : vector<64x32xf32> to vector<64x8xf32>
    %34 = vector.extract_strided_slice %29 {offsets = [0, 16], sizes = [64, 8], strides = [1, 1]} : vector<64x32xf32> to vector<64x8xf32>
    %35 = vector.extract_strided_slice %29 {offsets = [0, 24], sizes = [64, 8], strides = [1, 1]} : vector<64x32xf32> to vector<64x8xf32>
    %36 = vector.shape_cast %32 : vector<64x8xf32> to vector<1x64x8xf32>
    %37 = vector.shape_cast %33 : vector<64x8xf32> to vector<1x64x8xf32>
    %38 = vector.shape_cast %34 : vector<64x8xf32> to vector<1x64x8xf32>
    %39 = vector.shape_cast %35 : vector<64x8xf32> to vector<1x64x8xf32>
    %40 = tpu.concatenate %36, %37, %38, %39 in 0 : vector<1x64x8xf32>, vector<1x64x8xf32>, vector<1x64x8xf32>, vector<1x64x8xf32> -> vector<4x64x8xf32>
    %41 = vector.extract_strided_slice %30 {offsets = [0, 0], sizes = [64, 8], strides = [1, 1]} : vector<64x32xf32> to vector<64x8xf32>
    %42 = vector.extract_strided_slice %30 {offsets = [0, 8], sizes = [64, 8], strides = [1, 1]} : vector<64x32xf32> to vector<64x8xf32>
    %43 = vector.extract_strided_slice %30 {offsets = [0, 16], sizes = [64, 8], strides = [1, 1]} : vector<64x32xf32> to vector<64x8xf32>
    %44 = vector.extract_strided_slice %30 {offsets = [0, 24], sizes = [64, 8], strides = [1, 1]} : vector<64x32xf32> to vector<64x8xf32>
    %45 = vector.shape_cast %41 : vector<64x8xf32> to vector<1x64x8xf32>
    %46 = vector.shape_cast %42 : vector<64x8xf32> to vector<1x64x8xf32>
    %47 = vector.shape_cast %43 : vector<64x8xf32> to vector<1x64x8xf32>
    %48 = vector.shape_cast %44 : vector<64x8xf32> to vector<1x64x8xf32>
    %49 = tpu.concatenate %45, %46, %47, %48 in 0 : vector<1x64x8xf32>, vector<1x64x8xf32>, vector<1x64x8xf32>, vector<1x64x8xf32> -> vector<4x64x8xf32>
    %50 = vector.extract_strided_slice %31 {offsets = [0, 0], sizes = [64, 8], strides = [1, 1]} : vector<64x32xf32> to vector<64x8xf32>
    %51 = vector.extract_strided_slice %31 {offsets = [0, 8], sizes = [64, 8], strides = [1, 1]} : vector<64x32xf32> to vector<64x8xf32>
    %52 = vector.extract_strided_slice %31 {offsets = [0, 16], sizes = [64, 8], strides = [1, 1]} : vector<64x32xf32> to vector<64x8xf32>
    %53 = vector.extract_strided_slice %31 {offsets = [0, 24], sizes = [64, 8], strides = [1, 1]} : vector<64x32xf32> to vector<64x8xf32>
    %54 = vector.shape_cast %50 : vector<64x8xf32> to vector<1x64x8xf32>
    %55 = vector.shape_cast %51 : vector<64x8xf32> to vector<1x64x8xf32>
    %56 = vector.shape_cast %52 : vector<64x8xf32> to vector<1x64x8xf32>
    %57 = vector.shape_cast %53 : vector<64x8xf32> to vector<1x64x8xf32>
    %58 = tpu.concatenate %54, %55, %56, %57 in 0 : vector<1x64x8xf32>, vector<1x64x8xf32>, vector<1x64x8xf32>, vector<1x64x8xf32> -> vector<4x64x8xf32>
    "tpu.trace_start"() <{level = 10 : i32, message = "hqd,hkd->hqk"}> : () -> ()
    %cst_15 = arith.constant dense<0.000000e+00> : vector<4x64x64xf32>
    %59 = tpu.matmul %40, %49, %cst_15 {dimension_numbers = #tpu.dot_dimension_numbers<[2], [2], [1], [1], [0, 0, 0, 1, 1, 1], [0], [0]>} : vector<4x64x8xf32>, vector<4x64x8xf32>, vector<4x64x64xf32> -> vector<4x64x64xf32>
    "tpu.trace_stop"() : () -> ()
    %cst_16 = arith.constant dense<0xFF800000> : vector<4x64xf32>
    %60 = vector.multi_reduction <maximumf>, %59, %cst_16 [2] : vector<4x64x64xf32> to vector<4x64xf32>
    %61 = vector.shape_cast %60 : vector<4x64xf32> to vector<4x64x1xf32>
    %62 = vector.broadcast %61 : vector<4x64x1xf32> to vector<4x64x64xf32>
    %63 = arith.subf %59, %62 : vector<4x64x64xf32>
    %64 = math.exp %63 : vector<4x64x64xf32>
    %cst_17 = arith.constant dense<0.000000e+00> : vector<4x64xf32>
    %65 = vector.multi_reduction <add>, %64, %cst_17 [2] : vector<4x64x64xf32> to vector<4x64xf32>
    %66 = vector.shape_cast %65 : vector<4x64xf32> to vector<4x64x1xf32>
    %67 = tpu.reciprocal %66 {approx = true} : vector<4x64x1xf32> -> vector<4x64x1xf32>
    %68 = vector.broadcast %67 : vector<4x64x1xf32> to vector<4x64x64xf32>
    %69 = arith.mulf %64, %68 : vector<4x64x64xf32>
    "tpu.trace_start"() <{level = 10 : i32, message = "hqk,hkd->hqd"}> : () -> ()
    %cst_18 = arith.constant dense<0.000000e+00> : vector<4x64x8xf32>
    %70 = tpu.matmul %69, %58, %cst_18 {dimension_numbers = #tpu.dot_dimension_numbers<[2], [1], [1], [2], [0, 0, 0, 1, 1, 2], [0], [0]>} : vector<4x64x64xf32>, vector<4x64x8xf32>, vector<4x64x8xf32> -> vector<4x64x8xf32>
    "tpu.trace_stop"() : () -> ()
    %71 = vector.extract_strided_slice %70 {offsets = [0, 0, 0], sizes = [1, 64, 8], strides = [1, 1, 1]} : vector<4x64x8xf32> to vector<1x64x8xf32>
    %72 = vector.shape_cast %71 : vector<1x64x8xf32> to vector<64x8xf32>
    %73 = vector.extract_strided_slice %70 {offsets = [1, 0, 0], sizes = [1, 64, 8], strides = [1, 1, 1]} : vector<4x64x8xf32> to vector<1x64x8xf32>
    %74 = vector.shape_cast %73 : vector<1x64x8xf32> to vector<64x8xf32>
    %75 = vector.extract_strided_slice %70 {offsets = [2, 0, 0], sizes = [1, 64, 8], strides = [1, 1, 1]} : vector<4x64x8xf32> to vector<1x64x8xf32>
    %76 = vector.shape_cast %75 : vector<1x64x8xf32> to vector<64x8xf32>
    %77 = vector.extract_strided_slice %70 {offsets = [3, 0, 0], sizes = [1, 64, 8], strides = [1, 1, 1]} : vector<4x64x8xf32> to vector<1x64x8xf32>
    %78 = vector.shape_cast %77 : vector<1x64x8xf32> to vector<64x8xf32>
    %79 = tpu.concatenate %72, %74, %76, %78 in 1 : vector<64x8xf32>, vector<64x8xf32>, vector<64x8xf32>, vector<64x8xf32> -> vector<64x32xf32>
    %c0_19 = arith.constant 0 : index
    %c0_20 = arith.constant 0 : index
    %80 = vector.load %arg6[%c0_19, %c0_20] : memref<32x32xf32, #tpu.memory_space<vmem>>, vector<32x32xf32>
    %cst_21 = arith.constant dense<0.000000e+00> : vector<64x32xf32>
    %81 = tpu.matmul %79, %80, %cst_21 {dimension_numbers = #tpu.dot_dimension_numbers<[1], [0], [0], [1], [0, 0, 1, 1], [], []>} : vector<64x32xf32>, vector<32x32xf32>, vector<64x32xf32> -> vector<64x32xf32>
    %c0_22 = arith.constant 0 : index
    %c0_23 = arith.constant 0 : index
    %82 = vector.load %arg7[%c0_22, %c0_23] : memref<1x32xf32, #tpu.memory_space<vmem>>, vector<1x32xf32>
    %83 = vector.broadcast %82 : vector<1x32xf32> to vector<64x32xf32>
    %84 = arith.addf %81, %83 : vector<64x32xf32>
    %85 = arith.addf %1, %84 : vector<64x32xf32>
    %cst_24 = arith.constant dense<0.000000e+00> : vector<64xf32>
    %86 = vector.multi_reduction <add>, %85, %cst_24 [1] : vector<64x32xf32> to vector<64xf32>
    %87 = vector.shape_cast %86 : vector<64xf32> to vector<64x1xf32>
    %cst_25 = arith.constant 3.200000e+01 : f32
    %88 = vector.broadcast %cst_25 : f32 to vector<64x1xf32>
    %89 = arith.divf %87, %88 : vector<64x1xf32>
    %90 = vector.broadcast %89 : vector<64x1xf32> to vector<64x32xf32>
    %91 = arith.subf %85, %90 : vector<64x32xf32>
    %92 = arith.mulf %91, %91 : vector<64x32xf32>
    %cst_26 = arith.constant dense<0.000000e+00> : vector<64xf32>
    %93 = vector.multi_reduction <add>, %92, %cst_26 [1] : vector<64x32xf32> to vector<64xf32>
    %94 = vector.shape_cast %93 : vector<64xf32> to vector<64x1xf32>
    %cst_27 = arith.constant 3.200000e+01 : f32
    %95 = vector.broadcast %cst_27 : f32 to vector<64x1xf32>
    %96 = arith.divf %94, %95 : vector<64x1xf32>
    %cst_28 = arith.constant 9.99999974E-6 : f32
    %97 = vector.broadcast %cst_28 : f32 to vector<64x1xf32>
    %98 = arith.addf %96, %97 : vector<64x1xf32>
    %99 = math.rsqrt %98 : vector<64x1xf32>
    %100 = vector.broadcast %99 : vector<64x1xf32> to vector<64x32xf32>
    %101 = arith.mulf %91, %100 : vector<64x32xf32>
    %c0_29 = arith.constant 0 : index
    %c0_30 = arith.constant 0 : index
    %102 = vector.load %arg8[%c0_29, %c0_30] : memref<1x32xf32, #tpu.memory_space<vmem>>, vector<1x32xf32>
    %103 = vector.broadcast %102 : vector<1x32xf32> to vector<64x32xf32>
    %104 = arith.mulf %101, %103 : vector<64x32xf32>
    %c0_31 = arith.constant 0 : index
    %c0_32 = arith.constant 0 : index
    %105 = vector.load %arg9[%c0_31, %c0_32] : memref<1x32xf32, #tpu.memory_space<vmem>>, vector<1x32xf32>
    %106 = vector.broadcast %105 : vector<1x32xf32> to vector<64x32xf32>
    %107 = arith.addf %104, %106 : vector<64x32xf32>
    %c0_33 = arith.constant 0 : index
    %c0_34 = arith.constant 0 : index
    %108 = vector.load %arg10[%c0_33, %c0_34] : memref<32x128xf32, #tpu.memory_space<vmem>>, vector<32x128xf32>
    %cst_35 = arith.constant dense<0.000000e+00> : vector<64x128xf32>
    %109 = tpu.matmul %107, %108, %cst_35 {dimension_numbers = #tpu.dot_dimension_numbers<[1], [0], [0], [1], [0, 0, 1, 1], [], []>} : vector<64x32xf32>, vector<32x128xf32>, vector<64x128xf32> -> vector<64x128xf32>
    %cst_36 = arith.constant 0.000000e+00 : f32
    %110 = vector.broadcast %cst_36 : f32 to vector<64x128xf32>
    %111 = arith.maximumf %109, %110 : vector<64x128xf32>
    %c0_37 = arith.constant 0 : index
    %c0_38 = arith.constant 0 : index
    %112 = vector.load %arg11[%c0_37, %c0_38] : memref<128x32xf32, #tpu.memory_space<vmem>>, vector<128x32xf32>
    %cst_39 = arith.constant dense<0.000000e+00> : vector<64x32xf32>
    %113 = tpu.matmul %111, %112, %cst_39 {dimension_numbers = #tpu.dot_dimension_numbers<[1], [0], [0], [1], [0, 0, 1, 1], [], []>} : vector<64x128xf32>, vector<128x32xf32>, vector<64x32xf32> -> vector<64x32xf32>
    %114 = arith.addf %85, %113 : vector<64x32xf32>
    %c0_40 = arith.constant 0 : index
    %c0_41 = arith.constant 0 : index
    %c0_42 = arith.constant 0 : index
    %115 = vector.load %arg12[%c0_40, %c0_41, %c0_42] : memref<1x64x32xf32, #tpu.memory_space<vmem>>, vector<1x64x32xf32>
    %116 = vector.shape_cast %115 : vector<1x64x32xf32> to vector<64x32xf32>
    %117 = vector.shape_cast %114 : vector<64x32xf32> to vector<1x64x32xf32>
    tpu.vector_store %arg12[%c0_40, %c0_41, %c0_42], %117 {strides = array<i32>} : memref<1x64x32xf32, #tpu.memory_space<vmem>>, vector<1x64x32xf32>,
    return
  }
  func.func @transform_0(%arg0: i32) -> (i32, i32, i32) {
    %c0_i32 = arith.constant 0 : i32
    %c0_i32_0 = arith.constant 0 : i32
    %c0_i32_1 = arith.constant 0 : i32
    return %arg0, %c0_i32, %c0_i32_0 : i32, i32, i32
  }
  func.func @transform_1(%arg0: i32) -> (i32, i32) {
    %c0_i32 = arith.constant 0 : i32
    %c0_i32_0 = arith.constant 0 : i32
    %c0_i32_1 = arith.constant 0 : i32
    return %c0_i32, %c0_i32_0 : i32, i32
  }
  func.func @transform_2(%arg0: i32) -> (i32, i32) {
    %c0_i32 = arith.constant 0 : i32
    %c0_i32_0 = arith.constant 0 : i32
    %c0_i32_1 = arith.constant 0 : i32
    return %c0_i32, %c0_i32_0 : i32, i32
  }
  func.func @transform_3(%arg0: i32) -> (i32, i32) {
    %c0_i32 = arith.constant 0 : i32
    %c0_i32_0 = arith.constant 0 : i32
    %c0_i32_1 = arith.constant 0 : i32
    return %c0_i32, %c0_i32_0 : i32, i32
  }
  func.func @transform_4(%arg0: i32) -> (i32, i32) {
    %c0_i32 = arith.constant 0 : i32
    %c0_i32_0 = arith.constant 0 : i32
    %c0_i32_1 = arith.constant 0 : i32
    return %c0_i32, %c0_i32_0 : i32, i32
  }
  func.func @transform_5(%arg0: i32) -> (i32, i32) {
    %c0_i32 = arith.constant 0 : i32
    %c0_i32_0 = arith.constant 0 : i32
    %c0_i32_1 = arith.constant 0 : i32
    return %c0_i32, %c0_i32_0 : i32, i32
  }
  func.func @transform_6(%arg0: i32) -> (i32, i32) {
    %c0_i32 = arith.constant 0 : i32
    %c0_i32_0 = arith.constant 0 : i32
    %c0_i32_1 = arith.constant 0 : i32
    return %c0_i32, %c0_i32_0 : i32, i32
  }
  func.func @transform_7(%arg0: i32) -> (i32, i32) {
    %c0_i32 = arith.constant 0 : i32
    %c0_i32_0 = arith.constant 0 : i32
    %c0_i32_1 = arith.constant 0 : i32
    return %c0_i32, %c0_i32_0 : i32, i32
  }
  func.func @transform_8(%arg0: i32) -> (i32, i32) {
    %c0_i32 = arith.constant 0 : i32
    %c0_i32_0 = arith.constant 0 : i32
    %c0_i32_1 = arith.constant 0 : i32
    return %c0_i32, %c0_i32_0 : i32, i32
  }
  func.func @transform_9(%arg0: i32) -> (i32, i32) {
    %c0_i32 = arith.constant 0 : i32
    %c0_i32_0 = arith.constant 0 : i32
    %c0_i32_1 = arith.constant 0 : i32
    return %c0_i32, %c0_i32_0 : i32, i32
  }
  func.func @transform_10(%arg0: i32) -> (i32, i32) {
    %c0_i32 = arith.constant 0 : i32
    %c0_i32_0 = arith.constant 0 : i32
    %c0_i32_1 = arith.constant 0 : i32
    return %c0_i32, %c0_i32_0 : i32, i32
  }
  func.func @transform_11(%arg0: i32) -> (i32, i32, i32) {
    %c0_i32 = arith.constant 0 : i32
    %c0_i32_0 = arith.constant 0 : i32
    %c0_i32_1 = arith.constant 0 : i32
    return %arg0, %c0_i32, %c0_i32_0 : i32, i32, i32
  }
}

module attributes {stable_mosaic.version = 11 : i64} {
  func.func @kernel(%arg0: i32, %arg1: memref<1x64x32xf32, #tpu.memory_space<vmem>>, %arg2: memref<1x32xf32, #tpu.memory_space<vmem>>, %arg3: memref<1x32xf32, #tpu.memory_space<vmem>>, %arg4: memref<32x96xf32, #tpu.memory_space<vmem>>, %arg5: memref<1x96xf32, #tpu.memory_space<vmem>>, %arg6: memref<32x32xf32, #tpu.memory_space<vmem>>, %arg7: memref<1x32xf32, #tpu.memory_space<vmem>>, %arg8: memref<1x32xf32, #tpu.memory_space<vmem>>, %arg9: memref<1x32xf32, #tpu.memory_space<vmem>>, %arg10: memref<32x128xf32, #tpu.memory_space<vmem>>, %arg11: memref<128x32xf32, #tpu.memory_space<vmem>>, %arg12: memref<1x32x64xf32, #tpu.memory_space<vmem>>) attributes {dimension_semantics = [#tpu.dimension_semantics<parallel>], iteration_bounds = array<i64: 2>, scalar_prefetch = 0 : i64, scratch_operands = 0 : i64, tpu.core_type = #tpu.core_type<tc>, window_params = [{transform_indices = @transform_0, window_bounds = array<i64: 1, 64, 32>}, {pipeline_mode = #tpu.pipeline_mode<synchronous>, transform_indices = @transform_1, window_bounds = array<i64: 1, 32>}, {pipeline_mode = #tpu.pipeline_mode<synchronous>, transform_indices = @transform_2, window_bounds = array<i64: 1, 32>}, {pipeline_mode = #tpu.pipeline_mode<synchronous>, transform_indices = @transform_3, window_bounds = array<i64: 32, 96>}, {pipeline_mode = #tpu.pipeline_mode<synchronous>, transform_indices = @transform_4, window_bounds = array<i64: 1, 96>}, {pipeline_mode = #tpu.pipeline_mode<synchronous>, transform_indices = @transform_5, window_bounds = array<i64: 32, 32>}, {pipeline_mode = #tpu.pipeline_mode<synchronous>, transform_indices = @transform_6, window_bounds = array<i64: 1, 32>}, {pipeline_mode = #tpu.pipeline_mode<synchronous>, transform_indices = @transform_7, window_bounds = array<i64: 1, 32>}, {pipeline_mode = #tpu.pipeline_mode<synchronous>, transform_indices = @transform_8, window_bounds = array<i64: 1, 32>}, {pipeline_mode = #tpu.pipeline_mode<synchronous>, transform_indices = @transform_9, window_bounds = array<i64: 32, 128>}, {pipeline_mode = #tpu.pipeline_mode<synchronous>, transform_indices = @transform_10, window_bounds = array<i64: 128, 32>}, {transform_indices = @transform_11, window_bounds = array<i64: 1, 32, 64>}]} {
    %c0 = arith.constant 0 : index
    %c0_0 = arith.constant 0 : index
    %c0_1 = arith.constant 0 : index
    %0 = vector.load %arg1[%c0, %c0_0, %c0_1] : memref<1x64x32xf32, #tpu.memory_space<vmem>>, vector<1x64x32xf32>
    %1 = vector.shape_cast %0 : vector<1x64x32xf32> to vector<64x32xf32>
    %cst = arith.constant dense<0.000000e+00> : vector<64xf32>
    %2 = vector.multi_reduction <add>, %1, %cst [1] : vector<64x32xf32> to vector<64xf32>
    %3 = vector.shape_cast %2 : vector<64xf32> to vector<64x1xf32>
    %cst_2 = arith.constant 3.200000e+01 : f32
    %4 = vector.broadcast %cst_2 : f32 to vector<64x1xf32>
    %5 = arith.divf %3, %4 : vector<64x1xf32>
    %6 = vector.broadcast %5 : vector<64x1xf32> to vector<64x32xf32>
    %7 = arith.subf %1, %6 : vector<64x32xf32>
    %8 = arith.mulf %7, %7 : vector<64x32xf32>
    %cst_3 = arith.constant dense<0.000000e+00> : vector<64xf32>
    %9 = vector.multi_reduction <add>, %8, %cst_3 [1] : vector<64x32xf32> to vector<64xf32>
    %10 = vector.shape_cast %9 : vector<64xf32> to vector<64x1xf32>
    %cst_4 = arith.constant 3.200000e+01 : f32
    %11 = vector.broadcast %cst_4 : f32 to vector<64x1xf32>
    %12 = arith.divf %10, %11 : vector<64x1xf32>
    %cst_5 = arith.constant 9.99999974E-6 : f32
    %13 = vector.broadcast %cst_5 : f32 to vector<64x1xf32>
    %14 = arith.addf %12, %13 : vector<64x1xf32>
    %15 = math.rsqrt %14 : vector<64x1xf32>
    %16 = vector.broadcast %15 : vector<64x1xf32> to vector<64x32xf32>
    %17 = arith.mulf %7, %16 : vector<64x32xf32>
    %c0_6 = arith.constant 0 : index
    %c0_7 = arith.constant 0 : index
    %18 = vector.load %arg2[%c0_6, %c0_7] : memref<1x32xf32, #tpu.memory_space<vmem>>, vector<1x32xf32>
    %19 = vector.broadcast %18 : vector<1x32xf32> to vector<64x32xf32>
    %20 = arith.mulf %17, %19 : vector<64x32xf32>
    %c0_8 = arith.constant 0 : index
    %c0_9 = arith.constant 0 : index
    %21 = vector.load %arg3[%c0_8, %c0_9] : memref<1x32xf32, #tpu.memory_space<vmem>>, vector<1x32xf32>
    %22 = vector.broadcast %21 : vector<1x32xf32> to vector<64x32xf32>
    %23 = arith.addf %20, %22 : vector<64x32xf32>
    %c0_10 = arith.constant 0 : index
    %c0_11 = arith.constant 0 : index
    %24 = vector.load %arg4[%c0_10, %c0_11] : memref<32x96xf32, #tpu.memory_space<vmem>>, vector<32x96xf32>
    %cst_12 = arith.constant dense<0.000000e+00> : vector<64x96xf32>
    %25 = tpu.matmul %23, %24, %cst_12 {dimension_numbers = #tpu.dot_dimension_numbers<[1], [0], [0], [1], [0, 0, 1, 1], [], []>} : vector<64x32xf32>, vector<32x96xf32>, vector<64x96xf32> -> vector<64x96xf32>
    %c0_13 = arith.constant 0 : index
    %c0_14 = arith.constant 0 : index
    %26 = vector.load %arg5[%c0_13, %c0_14] : memref<1x96xf32, #tpu.memory_space<vmem>>, vector<1x96xf32>
    %27 = vector.broadcast %26 : vector<1x96xf32> to vector<64x96xf32>
    %28 = arith.addf %25, %27 : vector<64x96xf32>
    %29 = vector.extract_strided_slice %28 {offsets = [0, 0], sizes = [64, 32], strides = [1, 1]} : vector<64x96xf32> to vector<64x32xf32>
    %30 = vector.extract_strided_slice %28 {offsets = [0, 32], sizes = [64, 32], strides = [1, 1]} : vector<64x96xf32> to vector<64x32xf32>
    %31 = vector.extract_strided_slice %28 {offsets = [0, 64], sizes = [64, 32], strides = [1, 1]} : vector<64x96xf32> to vector<64x32xf32>
    %32 = vector.extract_strided_slice %29 {offsets = [0, 0], sizes = [64, 8], strides = [1, 1]} : vector<64x32xf32> to vector<64x8xf32>
    %33 = vector.extract_strided_slice %29 {offsets = [0, 8], sizes = [64, 8], strides = [1, 1]} : vector<64x32xf32> to vector<64x8xf32>
    %34 = vector.extract_strided_slice %29 {offsets = [0, 16], sizes = [64, 8], strides = [1, 1]} : vector<64x32xf32> to vector<64x8xf32>
    %35 = vector.extract_strided_slice %29 {offsets = [0, 24], sizes = [64, 8], strides = [1, 1]} : vector<64x32xf32> to vector<64x8xf32>
    %36 = vector.shape_cast %32 : vector<64x8xf32> to vector<1x64x8xf32>
    %37 = vector.shape_cast %33 : vector<64x8xf32> to vector<1x64x8xf32>
    %38 = vector.shape_cast %34 : vector<64x8xf32> to vector<1x64x8xf32>
    %39 = vector.shape_cast %35 : vector<64x8xf32> to vector<1x64x8xf32>
    %40 = tpu.concatenate %36, %37, %38, %39 in 0 : vector<1x64x8xf32>, vector<1x64x8xf32>, vector<1x64x8xf32>, vector<1x64x8xf32> -> vector<4x64x8xf32>
    %41 = vector.extract_strided_slice %30 {offsets = [0, 0], sizes = [64, 8], strides = [1, 1]} : vector<64x32xf32> to vector<64x8xf32>
    %42 = vector.extract_strided_slice %30 {offsets = [0, 8], sizes = [64, 8], strides = [1, 1]} : vector<64x32xf32> to vector<64x8xf32>
    %43 = vector.extract_strided_slice %30 {offsets = [0, 16], sizes = [64, 8], strides = [1, 1]} : vector<64x32xf32> to vector<64x8xf32>
    %44 = vector.extract_strided_slice %30 {offsets = [0, 24], sizes = [64, 8], strides = [1, 1]} : vector<64x32xf32> to vector<64x8xf32>
    %45 = vector.shape_cast %41 : vector<64x8xf32> to vector<1x64x8xf32>
    %46 = vector.shape_cast %42 : vector<64x8xf32> to vector<1x64x8xf32>
    %47 = vector.shape_cast %43 : vector<64x8xf32> to vector<1x64x8xf32>
    %48 = vector.shape_cast %44 : vector<64x8xf32> to vector<1x64x8xf32>
    %49 = tpu.concatenate %45, %46, %47, %48 in 0 : vector<1x64x8xf32>, vector<1x64x8xf32>, vector<1x64x8xf32>, vector<1x64x8xf32> -> vector<4x64x8xf32>
    %50 = vector.extract_strided_slice %31 {offsets = [0, 0], sizes = [64, 8], strides = [1, 1]} : vector<64x32xf32> to vector<64x8xf32>
    %51 = vector.extract_strided_slice %31 {offsets = [0, 8], sizes = [64, 8], strides = [1, 1]} : vector<64x32xf32> to vector<64x8xf32>
    %52 = vector.extract_strided_slice %31 {offsets = [0, 16], sizes = [64, 8], strides = [1, 1]} : vector<64x32xf32> to vector<64x8xf32>
    %53 = vector.extract_strided_slice %31 {offsets = [0, 24], sizes = [64, 8], strides = [1, 1]} : vector<64x32xf32> to vector<64x8xf32>
    %54 = vector.shape_cast %50 : vector<64x8xf32> to vector<1x64x8xf32>
    %55 = vector.shape_cast %51 : vector<64x8xf32> to vector<1x64x8xf32>
    %56 = vector.shape_cast %52 : vector<64x8xf32> to vector<1x64x8xf32>
    %57 = vector.shape_cast %53 : vector<64x8xf32> to vector<1x64x8xf32>
    %58 = tpu.concatenate %54, %55, %56, %57 in 0 : vector<1x64x8xf32>, vector<1x64x8xf32>, vector<1x64x8xf32>, vector<1x64x8xf32> -> vector<4x64x8xf32>
    "tpu.trace_start"() <{level = 10 : i32, message = "hqd,hkd->hqk"}> : () -> ()
    %cst_15 = arith.constant dense<0.000000e+00> : vector<4x64x64xf32>
    %59 = tpu.matmul %40, %49, %cst_15 {dimension_numbers = #tpu.dot_dimension_numbers<[2], [2], [1], [1], [0, 0, 0, 1, 1, 1], [0], [0]>} : vector<4x64x8xf32>, vector<4x64x8xf32>, vector<4x64x64xf32> -> vector<4x64x64xf32>
    "tpu.trace_stop"() : () -> ()
    %cst_16 = arith.constant dense<0xFF800000> : vector<4x64xf32>
    %60 = vector.multi_reduction <maximumf>, %59, %cst_16 [2] : vector<4x64x64xf32> to vector<4x64xf32>
    %61 = vector.shape_cast %60 : vector<4x64xf32> to vector<4x64x1xf32>
    %62 = vector.broadcast %61 : vector<4x64x1xf32> to vector<4x64x64xf32>
    %63 = arith.subf %59, %62 : vector<4x64x64xf32>
    %64 = math.exp %63 : vector<4x64x64xf32>
    %cst_17 = arith.constant dense<0.000000e+00> : vector<4x64xf32>
    %65 = vector.multi_reduction <add>, %64, %cst_17 [2] : vector<4x64x64xf32> to vector<4x64xf32>
    %66 = vector.shape_cast %65 : vector<4x64xf32> to vector<4x64x1xf32>
    %67 = tpu.reciprocal %66 {approx = true} : vector<4x64x1xf32> -> vector<4x64x1xf32>
    %68 = vector.broadcast %67 : vector<4x64x1xf32> to vector<4x64x64xf32>
    %69 = arith.mulf %64, %68 : vector<4x64x64xf32>
    "tpu.trace_start"() <{level = 10 : i32, message = "hqk,hkd->hqd"}> : () -> ()
    %cst_18 = arith.constant dense<0.000000e+00> : vector<4x64x8xf32>
    %70 = tpu.matmul %69, %58, %cst_18 {dimension_numbers = #tpu.dot_dimension_numbers<[2], [1], [1], [2], [0, 0, 0, 1, 1, 2], [0], [0]>} : vector<4x64x64xf32>, vector<4x64x8xf32>, vector<4x64x8xf32> -> vector<4x64x8xf32>
    "tpu.trace_stop"() : () -> ()
    %71 = vector.extract_strided_slice %70 {offsets = [0, 0, 0], sizes = [1, 64, 8], strides = [1, 1, 1]} : vector<4x64x8xf32> to vector<1x64x8xf32>
    %72 = vector.shape_cast %71 : vector<1x64x8xf32> to vector<64x8xf32>
    %73 = vector.extract_strided_slice %70 {offsets = [1, 0, 0], sizes = [1, 64, 8], strides = [1, 1, 1]} : vector<4x64x8xf32> to vector<1x64x8xf32>
    %74 = vector.shape_cast %73 : vector<1x64x8xf32> to vector<64x8xf32>
    %75 = vector.extract_strided_slice %70 {offsets = [2, 0, 0], sizes = [1, 64, 8], strides = [1, 1, 1]} : vector<4x64x8xf32> to vector<1x64x8xf32>
    %76 = vector.shape_cast %75 : vector<1x64x8xf32> to vector<64x8xf32>
    %77 = vector.extract_strided_slice %70 {offsets = [3, 0, 0], sizes = [1, 64, 8], strides = [1, 1, 1]} : vector<4x64x8xf32> to vector<1x64x8xf32>
    %78 = vector.shape_cast %77 : vector<1x64x8xf32> to vector<64x8xf32>
    %79 = tpu.concatenate %72, %74, %76, %78 in 1 : vector<64x8xf32>, vector<64x8xf32>, vector<64x8xf32>, vector<64x8xf32> -> vector<64x32xf32>
    %c0_19 = arith.constant 0 : index
    %c0_20 = arith.constant 0 : index
    %80 = vector.load %arg6[%c0_19, %c0_20] : memref<32x32xf32, #tpu.memory_space<vmem>>, vector<32x32xf32>
    %cst_21 = arith.constant dense<0.000000e+00> : vector<64x32xf32>
    %81 = tpu.matmul %79, %80, %cst_21 {dimension_numbers = #tpu.dot_dimension_numbers<[1], [0], [0], [1], [0, 0, 1, 1], [], []>} : vector<64x32xf32>, vector<32x32xf32>, vector<64x32xf32> -> vector<64x32xf32>
    %c0_22 = arith.constant 0 : index
    %c0_23 = arith.constant 0 : index
    %82 = vector.load %arg7[%c0_22, %c0_23] : memref<1x32xf32, #tpu.memory_space<vmem>>, vector<1x32xf32>
    %83 = vector.broadcast %82 : vector<1x32xf32> to vector<64x32xf32>
    %84 = arith.addf %81, %83 : vector<64x32xf32>
    %85 = arith.addf %1, %84 : vector<64x32xf32>
    %cst_24 = arith.constant dense<0.000000e+00> : vector<64xf32>
    %86 = vector.multi_reduction <add>, %85, %cst_24 [1] : vector<64x32xf32> to vector<64xf32>
    %87 = vector.shape_cast %86 : vector<64xf32> to vector<64x1xf32>
    %cst_25 = arith.constant 3.200000e+01 : f32
    %88 = vector.broadcast %cst_25 : f32 to vector<64x1xf32>
    %89 = arith.divf %87, %88 : vector<64x1xf32>
    %90 = vector.broadcast %89 : vector<64x1xf32> to vector<64x32xf32>
    %91 = arith.subf %85, %90 : vector<64x32xf32>
    %92 = arith.mulf %91, %91 : vector<64x32xf32>
    %cst_26 = arith.constant dense<0.000000e+00> : vector<64xf32>
    %93 = vector.multi_reduction <add>, %92, %cst_26 [1] : vector<64x32xf32> to vector<64xf32>
    %94 = vector.shape_cast %93 : vector<64xf32> to vector<64x1xf32>
    %cst_27 = arith.constant 3.200000e+01 : f32
    %95 = vector.broadcast %cst_27 : f32 to vector<64x1xf32>
    %96 = arith.divf %94, %95 : vector<64x1xf32>
    %cst_28 = arith.constant 9.99999974E-6 : f32
    %97 = vector.broadcast %cst_28 : f32 to vector<64x1xf32>
    %98 = arith.addf %96, %97 : vector<64x1xf32>
    %99 = math.rsqrt %98 : vector<64x1xf32>
    %100 = vector.broadcast %99 : vector<64x1xf32> to vector<64x32xf32>
    %101 = arith.mulf %91, %100 : vector<64x32xf32>
    %c0_29 = arith.constant 0 : index
    %c0_30 = arith.constant 0 : index
    %102 = vector.load %arg8[%c0_29, %c0_30] : memref<1x32xf32, #tpu.memory_space<vmem>>, vector<1x32xf32>
    %103 = vector.broadcast %102 : vector<1x32xf32> to vector<64x32xf32>
    %104 = arith.mulf %101, %103 : vector<64x32xf32>
    %c0_31 = arith.constant 0 : index
    %c0_32 = arith.constant 0 : index
    %105 = vector.load %arg9[%c0_31, %c0_32] : memref<1x32xf32, #tpu.memory_space<vmem>>, vector<1x32xf32>
    %106 = vector.broadcast %105 : vector<1x32xf32> to vector<64x32xf32>
    %107 = arith.addf %104, %106 : vector<64x32xf32>
    %c0_33 = arith.constant 0 : index
    %c0_34 = arith.constant 0 : index
    %108 = vector.load %arg10[%c0_33, %c0_34] : memref<32x128xf32, #tpu.memory_space<vmem>>, vector<32x128xf32>
    %cst_35 = arith.constant dense<0.000000e+00> : vector<64x128xf32>
    %109 = tpu.matmul %107, %108, %cst_35 {dimension_numbers = #tpu.dot_dimension_numbers<[1], [0], [0], [1], [0, 0, 1, 1], [], []>} : vector<64x32xf32>, vector<32x128xf32>, vector<64x128xf32> -> vector<64x128xf32>
    %cst_36 = arith.constant 0.000000e+00 : f32
    %110 = vector.broadcast %cst_36 : f32 to vector<64x128xf32>
    %111 = arith.maximumf %109, %110 : vector<64x128xf32>
    %c0_37 = arith.constant 0 : index
    %c0_38 = arith.constant 0 : index
    %112 = vector.load %arg11[%c0_37, %c0_38] : memref<128x32xf32, #tpu.memory_space<vmem>>, vector<128x32xf32>
    %cst_39 = arith.constant dense<0.000000e+00> : vector<64x32xf32>
    %113 = tpu.matmul %111, %112, %cst_39 {dimension_numbers = #tpu.dot_dimension_numbers<[1], [0], [0], [1], [0, 0, 1, 1], [], []>} : vector<64x128xf32>, vector<128x32xf32>, vector<64x32xf32> -> vector<64x32xf32>
    %114 = arith.addf %85, %113 : vector<64x32xf32>
    %115 = tpu.transpose %114, [1, 0] : vector<64x32xf32> -> vector<32x64xf32>
    %c0_40 = arith.constant 0 : index
    %c0_41 = arith.constant 0 : index
    %c0_42 = arith.constant 0 : index
    %116 = vector.load %arg12[%c0_40, %c0_41, %c0_42] : memref<1x32x64xf32, #tpu.memory_space<vmem>>, vector<1x32x64xf32>
    %117 = vector.shape_cast %116 : vector<1x32x64xf32> to vector<32x64xf32>
    %118 = vector.shape_cast %115 : vector<32x64xf32> to vector<1x32x64xf32>
    tpu.vector_store %arg12[%c0_40, %c0_41, %c0_42], %118 {strides = array<i32>} : memref<1x32x64xf32, #tpu.memory_space<vmem>>, vector<1x32x64xf32>,
    return
  }
  func.func @transform_0(%arg0: i32) -> (i32, i32, i32) {
    %c0_i32 = arith.constant 0 : i32
    %c0_i32_0 = arith.constant 0 : i32
    %c0_i32_1 = arith.constant 0 : i32
    return %arg0, %c0_i32, %c0_i32_0 : i32, i32, i32
  }
  func.func @transform_1(%arg0: i32) -> (i32, i32) {
    %c0_i32 = arith.constant 0 : i32
    %c0_i32_0 = arith.constant 0 : i32
    %c0_i32_1 = arith.constant 0 : i32
    return %c0_i32, %c0_i32_0 : i32, i32
  }
  func.func @transform_2(%arg0: i32) -> (i32, i32) {
    %c0_i32 = arith.constant 0 : i32
    %c0_i32_0 = arith.constant 0 : i32
    %c0_i32_1 = arith.constant 0 : i32
    return %c0_i32, %c0_i32_0 : i32, i32
  }
  func.func @transform_3(%arg0: i32) -> (i32, i32) {
    %c0_i32 = arith.constant 0 : i32
    %c0_i32_0 = arith.constant 0 : i32
    %c0_i32_1 = arith.constant 0 : i32
    return %c0_i32, %c0_i32_0 : i32, i32
  }
  func.func @transform_4(%arg0: i32) -> (i32, i32) {
    %c0_i32 = arith.constant 0 : i32
    %c0_i32_0 = arith.constant 0 : i32
    %c0_i32_1 = arith.constant 0 : i32
    return %c0_i32, %c0_i32_0 : i32, i32
  }
  func.func @transform_5(%arg0: i32) -> (i32, i32) {
    %c0_i32 = arith.constant 0 : i32
    %c0_i32_0 = arith.constant 0 : i32
    %c0_i32_1 = arith.constant 0 : i32
    return %c0_i32, %c0_i32_0 : i32, i32
  }
  func.func @transform_6(%arg0: i32) -> (i32, i32) {
    %c0_i32 = arith.constant 0 : i32
    %c0_i32_0 = arith.constant 0 : i32
    %c0_i32_1 = arith.constant 0 : i32
    return %c0_i32, %c0_i32_0 : i32, i32
  }
  func.func @transform_7(%arg0: i32) -> (i32, i32) {
    %c0_i32 = arith.constant 0 : i32
    %c0_i32_0 = arith.constant 0 : i32
    %c0_i32_1 = arith.constant 0 : i32
    return %c0_i32, %c0_i32_0 : i32, i32
  }
  func.func @transform_8(%arg0: i32) -> (i32, i32) {
    %c0_i32 = arith.constant 0 : i32
    %c0_i32_0 = arith.constant 0 : i32
    %c0_i32_1 = arith.constant 0 : i32
    return %c0_i32, %c0_i32_0 : i32, i32
  }
  func.func @transform_9(%arg0: i32) -> (i32, i32) {
    %c0_i32 = arith.constant 0 : i32
    %c0_i32_0 = arith.constant 0 : i32
    %c0_i32_1 = arith.constant 0 : i32
    return %c0_i32, %c0_i32_0 : i32, i32
  }
  func.func @transform_10(%arg0: i32) -> (i32, i32) {
    %c0_i32 = arith.constant 0 : i32
    %c0_i32_0 = arith.constant 0 : i32
    %c0_i32_1 = arith.constant 0 : i32
    return %c0_i32, %c0_i32_0 : i32, i32
  }
  func.func @transform_11(%arg0: i32) -> (i32, i32, i32) {
    %c0_i32 = arith.constant 0 : i32
    %c0_i32_0 = arith.constant 0 : i32
    %c0_i32_1 = arith.constant 0 : i32
    return %arg0, %c0_i32, %c0_i32_0 : i32, i32, i32
  }
}

</mosaic_0001>

<bundles_post_ra>
// kernel: transformer_block_forward.3
= control target key start
LH: loop header
LB: loop body
LE: loop exit
PB: predicated region body
PF: predicated region fallthrough
CT: control target
= control target key end

     0   :  { %s960_s18 = smov 0   ;;  %s962_s19 = smov 0   ;;  %s1045_s0 = inlined_call_operand.vmem [shape: f32[2,16,64], index: 0, kind: input, shape index: {}]   ;;  %s1046_s1 = inlined_call_operand.vmem [shape: f32[16,32], index: 1, kind: input, shape index: {}]   ;;  %s1047_s2 = inlined_call_operand.vmem [shape: f32[1,32], index: 2, kind: input, shape index: {}]   ;;  %s1048_s3 = inlined_call_operand.vmem [shape: f32[32,32], index: 3, kind: input, shape index: {}]   ;;  %s1049_s4 = inlined_call_operand.vmem [shape: f32[1,32], index: 4, kind: input, shape index: {}]   ;;  %s1050_s5 = inlined_call_operand.vmem [shape: f32[2,64,32], index: 5, kind: output, shape index: {}]  }
   0x1   :  { %s964_s20 = smov 0  }
   0x2 LB: > { %s27_s21 = sadd.s32 1, %s924_s19  ;;  %p744_p0 = scmp.ge.s32.totalorder %s928_s20, 1  ;;  %s928_s20 = sphi %s964_s20, %s15_s20   ;;  %s924_s19 = sphi %s962_s19, %s1052_s19   ;;  %s920_s18 = sphi %s960_s18, %s1051_s18  }
   0x3   : > { %p29_p1 = scmp.ge.s32.totalorder %s27_s21, 2  ;;  %p206_p2 = scmp.lt.s32.totalorder %s928_s20, 3 }
   0x5   : > { %s1054_s21 = smov (%p29_p1, %s27_s21), 0  ;;  %p207_p3 = pnand %p744_p0, %p206_p2 }
   0x6   : > { %p241_p4 = scmp.lt.s32.totalorder (!%p207_p3), %s920_s18, 1  ;;  %v293_v0 = vld [vmem:[%s1046_s1] sm:$0xff] (!%p207_p3)  ;;  %v294_v1 = vld [vmem:[%s1046_s1 + $0x8] sm:$0xff] (!%p207_p3)  ;;  %vm302_vm0 = vcmask (!%p207_p3), 130048   ;;  %v490_v16 = vld [vmem:[%s1048_s3 + $0x10] sm:$0xff] (!%p207_p3)  ;;  %vm492_vm1 = vcmask (!%p207_p3), 261120  }
   0x7   : > { %210 = sbr.rel (%p207_p3) target bundleno = 637 (0x27d), region = 40  ;;  %v837_v3 = vpack.c.bf16 (!%p207_p3), %v294_v1, %v293_v0  ;;  %v488_v13 = vld [vmem:[%s1048_s3] sm:$0xff] (!%p207_p3)  ;;  %v489_v14 = vld [vmem:[%s1048_s3 + $0x8] sm:$0xff] (!%p207_p3)  ;;  %v491_v17 = vld [vmem:[%s1048_s3 + $0x18] sm:$0xff] (!%p207_p3) }
   0x8   : > { %v841_v15 = vpack.c.bf16 (!%p207_p3), %v489_v14, %v488_v13  ;;  %v845_v18 = vpack.c.bf16 (!%p207_p3), %v491_v17, %v490_v16  ;;  %v749_v19 = vld [vmem:[%s1047_s2] ss:$0 sm:$0xff] (!%p207_p3) }
   0x9   : > { %838 = vmatprep.subr.bf16.mxu0 (!%p207_p3), %v837_v3  ;;  %v774_v13 = vld [vmem:[%s1049_s4] ss:$0 sm:$0xff] (!%p207_p3) }
   0xa   : > { %840 = vmatpush3.bf16.msra.mxu0 (!%p207_p3), %v837_v3  ;;  %842 = vmatprep.subr.bf16.mxu1 (!%p207_p3), %v841_v15 }
   0xb   : > { %844 = vmatpush3.bf16.msra.mxu1 (!%p207_p3), %v841_v15 }
   0xc   : > { %846 = vmatprep.subr.bf16.mxu1 (!%p207_p3), %v845_v18 }
   0xe   : > { %s1056_s18 = smov (!%p241_p4, %s920_s18), 1 }
   0xf   : > { %s777_s22 = sshll.u32 %s1056_s18, 4  ;;  %848 = vmatpush3.bf16.msra.mxu1 %v845_v18  ;;  %s778_s15 = sshll.u32 %s1056_s18, 6 }
  0x10   : > { %s248_s25 = scalar_lea.vmem %s1045_s0, %s777_s22  ;;  %s257_s24 = scalar_lea.vmem %s1050_s5, %s778_s15 }
  0x11   : > { %v259_v2 = vld [vmem:[%s248_s25] sm:$0xff]  ;;  %v260_v4 = vld [vmem:[%s248_s25 + $0x8] sm:$0xff] }
  0x12   : > { %261 = vxpose.xlu0.b32.start [1/2] (short) (narrow) %v259_v2, 64 }
  0x16   : > { %262 = vxpose.xlu0.b32.end [2/2] (short) (narrow) %v260_v4, 64 }
  0x92   : > { %v277_v5 = vpop.trf.xlu0 }
  0x93   : > { %805 = vmatprep.mubr.msk.f32.mxu0 %vm302_vm0, %v277_v5 }
  0x96   : > { %v278_v6 = vpop.trf.xlu0 }
  0x97   : > { %806 = vmatmul.mubr.msk.f32.vlgmr.msra.gmra.mrb[0].mxu0 %vm302_vm0, %v278_v6 }
  0x9a   : > { %v279_v7 = vpop.trf.xlu0 }
  0x9b   : > { %808 = vmatprep.mubr.msk.f32.mxu0 %vm302_vm0, %v279_v7 }
  0x9e   : > { %v280_v8 = vpop.trf.xlu0 }
  0x9f   : > { %809 = vmatmul.mubr.msk.f32.gmra.mrb[2].mxu0 %vm302_vm0, %v280_v8 }
  0xa2   : > { %v281_v9 = vpop.trf.xlu0 }
  0xa3   : > { %811 = vmatprep.mubr.msk.f32.mxu0 %vm302_vm0, %v281_v9 }
  0xa6   : > { %v282_v10 = vpop.trf.xlu0 }
  0xa7   : > { %812 = vmatmul.mubr.msk.f32.gmra.mrb[4].mxu0 %vm302_vm0, %v282_v10 }
  0xaa   : > { %v283_v11 = vpop.trf.xlu0 }
  0xab   : > { %814 = vmatprep.mubr.msk.f32.mxu0 %vm302_vm0, %v283_v11 }
  0xae   : > { %v284_v12 = vpop.trf.xlu0 }
  0xaf   : > { %815 = vmatmul.mubr.msk.f32.gmra.mrb[6].mxu0 %vm302_vm0, %v284_v12 }
 0x16a   : > { %v807_v20 = vpop.f32.mrb[0].mxu0 }
 0x16b   : > { %v399_v21 = vadd.f32 %v807_v20, %v749_v19  ;;  %v393_v22 = vpop.f32.mrb[1].mxu0 }
 0x16c   : > { %v394_v23 = vadd.f32 %v749_v19, %v393_v22 }
 0x16d   : > { %v759_v24 = vmul.f32 -1.442695, %v399_v21 }
 0x16e   : > { %v758_v25 = vmul.f32 -1.442695, %v394_v23 }
 0x16f   : > { %874 = vpow2.f32 %v759_v24 }
 0x170   : > { %876 = vpow2.f32 %v758_v25 }
 0x172   : > { %v810_v26 = vpop.f32.mrb[2].mxu0 }
 0x173   : > { %v409_v27 = vadd.f32 %v810_v26, %v749_v19  ;;  %v403_v28 = vpop.f32.mrb[3].mxu0 }
 0x174   : > { %v404_v29 = vadd.f32 %v749_v19, %v403_v28 }
 0x175   : > { %v761_v30 = vmul.f32 -1.442695, %v409_v27 }
 0x176   : > { %v760_v31 = vmul.f32 -1.442695, %v404_v29 }
 0x177   : > { %878 = vpow2.f32 %v761_v30 }
 0x178   : > { %880 = vpow2.f32 %v760_v31 }
 0x179   : > { %v875_v32 = vpop.eup %874 }
 0x17a   : > { %v877_v33 = vpop.eup %876  ;;  %v457_v34 = vadd.f32 1.0, %v875_v32  ;;  %v813_v35 = vpop.f32.mrb[4].mxu0 }
 0x17b   : > { %v456_v36 = vadd.f32 1.0, %v877_v33  ;;  %v419_v37 = vadd.f32 %v813_v35, %v749_v19  ;;  %v413_v38 = vpop.f32.mrb[5].mxu0 }
 0x17c   : > { %882 = vrcp.f32 %v457_v34  ;;  %v414_v39 = vadd.f32 %v749_v19, %v413_v38 }
 0x17d   : > { %884 = vrcp.f32 %v456_v36  ;;  %v763_v40 = vmul.f32 -1.442695, %v419_v37 }
 0x17e   : > { %v762_v41 = vmul.f32 -1.442695, %v414_v39 }
 0x17f   : > { %886 = vpow2.f32 %v763_v40 }
 0x180   : > { %888 = vpow2.f32 %v762_v41 }
 0x181   : > { %v879_v42 = vpop.eup %878 }
 0x182   : > { %v881_v43 = vpop.eup %880  ;;  %v459_v44 = vadd.f32 1.0, %v879_v42  ;;  %v816_v45 = vpop.f32.mrb[6].mxu0 }
 0x183   : > { %v458_v46 = vadd.f32 1.0, %v881_v43  ;;  %v429_v47 = vadd.f32 %v816_v45, %v749_v19  ;;  %v423_v48 = vpop.f32.mrb[7].mxu0 }
 0x184   : > { %890 = vrcp.f32 %v459_v44  ;;  %v424_v49 = vadd.f32 %v749_v19, %v423_v48 }
 0x185   : > { %892 = vrcp.f32 %v458_v46  ;;  %v765_v50 = vmul.f32 -1.442695, %v429_v47 }
 0x186   : > { %v883_v51 = vpop.eup %882  ;;  %v764_v52 = vmul.f32 -1.442695, %v424_v49 }
 0x187   : > { %v885_v53 = vpop.eup %884  ;;  %894 = vpow2.f32 %v765_v50  ;;  %v481_v56 = vmul.f32 %v883_v51, %v399_v21 }
 0x188   : > { %896 = vpow2.f32 %v764_v52  ;;  %v480_v54 = vmul.f32 %v885_v53, %v394_v23 }
 0x189   : > { %v887_v55 = vpop.eup %886 }
 0x18a   : > { %v889_v57 = vpop.eup %888  ;;  %v461_v58 = vadd.f32 1.0, %v887_v55  ;;  %825 = vmatprep.mubr.msk.f32.mxu1 %vm492_vm1, %v480_v54 }
 0x18b   : > { %v460_v59 = vadd.f32 1.0, %v889_v57  ;;  %826 = vmatmul.mubr.msk.f32.vlgmr.msra.gmra.mrb[0].mxu1 %vm492_vm1, %v481_v56 }
 0x18c   : > { %898 = vrcp.f32 %v461_v58 }
 0x18d   : > { %900 = vrcp.f32 %v460_v59 }
 0x18e   : > { %v891_v60 = vpop.eup %890 }
 0x18f   : > { %v893_v61 = vpop.eup %892  ;;  %v483_v0 = vmul.f32 %v891_v60, %v409_v27 }
 0x190   : > { %v482_v62 = vmul.f32 %v893_v61, %v404_v29 }
 0x191   : > { %v895_v63 = vpop.eup %894 }
 0x192   : > { %v897_v1 = vpop.eup %896  ;;  %v463_v2 = vadd.f32 1.0, %v895_v63  ;;  %828 = vmatprep.mubr.msk.f32.mxu1 %vm492_vm1, %v482_v62 }
 0x193   : > { %v462_v3 = vadd.f32 1.0, %v897_v1  ;;  %829 = vmatmul.mubr.msk.f32.gmra.mrb[2].mxu1 %vm492_vm1, %v483_v0 }
 0x194   : > { %902 = vrcp.f32 %v463_v2 }
 0x195   : > { %904 = vrcp.f32 %v462_v3 }
 0x196   : > { %v899_v4 = vpop.eup %898 }
 0x197   : > { %v901_v5 = vpop.eup %900  ;;  %v485_v7 = vmul.f32 %v899_v4, %v419_v37 }
 0x198   : > { %v484_v6 = vmul.f32 %v901_v5, %v414_v39 }
 0x19a   : > { %831 = vmatprep.mubr.msk.f32.mxu1 %vm492_vm1, %v484_v6 }
 0x19b   : > { %832 = vmatmul.mubr.msk.f32.gmra.mrb[4].mxu1 %vm492_vm1, %v485_v7 }
 0x19e   : > { %v903_v8 = vpop.eup %902 }
 0x19f   : > { %v905_v9 = vpop.eup %904  ;;  %v487_v11 = vmul.f32 %v903_v8, %v429_v47 }
 0x1a0   : > { %v486_v10 = vmul.f32 %v905_v9, %v424_v49 }
 0x1a2   : > { %834 = vmatprep.mubr.msk.f32.mxu1 %vm492_vm1, %v486_v10 }
 0x1a3   : > { %835 = vmatmul.mubr.msk.f32.gmra.mrb[6].mxu1 %vm492_vm1, %v487_v11 }
 0x25e   : > { %v827_v12 = vpop.f32.mrb[0].mxu1 }
 0x25f   : > { %v623_v14 = vadd.f32 %v827_v12, %v481_v56  ;;  %v583_v15 = vpop.f32.mrb[1].mxu1 }
 0x260   : > { %v622_v16 = vadd.f32 %v583_v15, %v480_v54 }
 0x261   : > { %v638_v17 = vadd.f32 %v774_v13, %v623_v14 }
 0x262   : > { %v637_v18 = vadd.f32 %v774_v13, %v622_v16 }
 0x263   : > { %646 = vst.msk [vmem:[%s257_s24 + $0x8] sm:$0xff] %vm492_vm1, %v638_v17 }
 0x264   : > { %645 = vst.msk [vmem:[%s257_s24] sm:$0xff] %vm492_vm1, %v637_v18 }
 0x266   : > { %v830_v19 = vpop.f32.mrb[2].mxu1 }
 0x267   : > { %v625_v20 = vadd.f32 %v830_v19, %v483_v0  ;;  %v593_v21 = vpop.f32.mrb[3].mxu1 }
 0x268   : > { %v624_v22 = vadd.f32 %v593_v21, %v482_v62 }
 0x269   : > { %v640_v23 = vadd.f32 %v774_v13, %v625_v20 }
 0x26a   : > { %v639_v24 = vadd.f32 %v774_v13, %v624_v22 }
 0x26b   : > { %648 = vst.msk [vmem:[%s257_s24 + $0x18] sm:$0xff] %vm492_vm1, %v640_v23 }
 0x26c   : > { %647 = vst.msk [vmem:[%s257_s24 + $0x10] sm:$0xff] %vm492_vm1, %v639_v24 }
 0x26e   : > { %v833_v25 = vpop.f32.mrb[4].mxu1 }
 0x26f   : > { %v627_v26 = vadd.f32 %v833_v25, %v485_v7  ;;  %v603_v27 = vpop.f32.mrb[5].mxu1 }
 0x270   : > { %v626_v28 = vadd.f32 %v603_v27, %v484_v6 }
 0x271   : > { %v642_v29 = vadd.f32 %v774_v13, %v627_v26 }
 0x272   : > { %v641_v30 = vadd.f32 %v774_v13, %v626_v28 }
 0x273   : > { %650 = vst.msk [vmem:[%s257_s24 + $0x28] sm:$0xff] %vm492_vm1, %v642_v29 }
 0x274   : > { %649 = vst.msk [vmem:[%s257_s24 + $0x20] sm:$0xff] %vm492_vm1, %v641_v30 }
 0x276   : > { %v836_v31 = vpop.f32.mrb[6].mxu1 }
 0x277   : > { %v629_v32 = vadd.f32 %v836_v31, %v487_v11  ;;  %v613_v33 = vpop.f32.mrb[7].mxu1 }
 0x278   : > { %v628_v34 = vadd.f32 %v613_v33, %v486_v10 }
 0x279   : > { %v644_v35 = vadd.f32 %v774_v13, %v629_v32 }
 0x27a   : > { %v643_v36 = vadd.f32 %v774_v13, %v628_v34 }
 0x27b   : > { %652 = vst.msk [vmem:[%s257_s24 + $0x38] sm:$0xff] %vm492_vm1, %v644_v35 }
 0x27c   : > { %651 = vst.msk [vmem:[%s257_s24 + $0x30] sm:$0xff] %vm492_vm1, %v643_v36 }
 0x27d PF: > { %s15_s20 = sadd.s32 1, %s928_s20   ;;  %s1051_s18 = smov %s924_s19 }
 0x27e   : > { %p12_p5 = scmp.ge.s32.totalorder %s15_s20, 4   ;;  %s1052_s19 = smov %s1054_s21 }
 0x280   :  { %14 = sbr.rel (!%p12_p5) target bundleno = 2 (0x2), region = 70 }

// kernel: transformer_block_forward.4
= control target key start
LH: loop header
LB: loop body
LE: loop exit
PB: predicated region body
PF: predicated region fallthrough
CT: control target
= control target key end

     0   :  { %s4333_s17 = smov 0   ;;  %s5428_s0 = inlined_call_operand.vmem [shape: f32[2,64,32], index: 0, kind: input, shape index: {}]   ;;  %s5429_s1 = inlined_call_operand.vmem [shape: f32[1,32], index: 1, kind: input, shape index: {}]   ;;  %s5430_s2 = inlined_call_operand.vmem [shape: f32[1,32], index: 2, kind: input, shape index: {}]   ;;  %s5431_s3 = inlined_call_operand.vmem [shape: f32[32,96], index: 3, kind: input, shape index: {}]   ;;  %s5432_s4 = inlined_call_operand.vmem [shape: f32[1,96], index: 4, kind: input, shape index: {}]   ;;  %s5433_s5 = inlined_call_operand.vmem [shape: f32[32,32], index: 5, kind: input, shape index: {}]   ;;  %s5434_s6 = inlined_call_operand.vmem [shape: f32[1,32], index: 6, kind: input, shape index: {}]   ;;  %s5435_s7 = inlined_call_operand.vmem [shape: f32[1,32], index: 7, kind: input, shape index: {}]   ;;  %s5436_s8 = inlined_call_operand.vmem [shape: f32[1,32], index: 8, kind: input, shape index: {}]   ;;  %s5437_s9 = inlined_call_operand.vmem [shape: f32[32,128], index: 9, kind: input, shape index: {}]   ;;  %s5438_s10 = inlined_call_operand.vmem [shape: f32[128,32], index: 10, kind: input, shape index: {}]   ;;  %s5439_s11 = inlined_call_operand.vmem [shape: f32[2,64,32], index: 11, kind: output, shape index: {}]  }
   0x1 LB: > { %s3042_s18 = sadd.s32 4294967295, %s4263_s17   ;;  %p3046_p0 = scmp.ge.s32.totalorder %s4263_s17, 1  ;;  %s4263_s17 = sphi %s4333_s17, %s21_s17  }
   0x2   : > { %p337_p1 = scmp.lt.s32.totalorder %s4263_s17, 3 }
   0x4   : > { %p338_p2 = pnand %p3046_p0, %p337_p1 }
   0x5   : > { %p377_p3 = scmp.lt.s32.totalorder (!%p338_p2), %s3042_s18, 1  ;;  %vm395_vm0 = vcmask (!%p338_p2), 261120   ;;  %v531_v56 = vld [vmem:[%s5431_s3] sm:$0xff] (!%p338_p2)  ;;  %v532_v57 = vld [vmem:[%s5431_s3 + $0x8] sm:$0xff] (!%p338_p2)  ;;  %v533_v59 = vld [vmem:[%s5431_s3 + $0x10] sm:$0xff] (!%p338_p2)  ;;  %vm743_vm1 = vcmask (!%p338_p2), 64512  }
   0x6   : > { %341 = sbr.rel (%p338_p2) target bundleno = 2769 (0xad1), region = 64  ;;  %v3697_v58 = vpack.c.bf16 (!%p338_p2), %v532_v57, %v531_v56  ;;  %v534_v60 = vld [vmem:[%s5431_s3 + $0x18] sm:$0xff] (!%p338_p2)  ;;  %s4265_s21 = smov (!%p338_p2), 120   ;;  %vm4603_vm2 = vmpackc.low (!%p338_p2), %vm743_vm1, %vm743_vm1  ;;  %vm1340_vm3 = vcmask (!%p338_p2), 523264   ;;  %vm2409_vm4 = vcmask (!%p338_p2), 130048   ;;  %vm2418_vm5 = vcmask (!%p338_p2), 195584  }
   0x7   : > { %v3701_v61 = vpack.c.bf16 (!%p338_p2), %v534_v60, %v533_v59  ;;  %s4266_s23 = smov (!%p338_p2), 112   ;;  %s4267_s24 = smov (!%p338_p2), 104  }
   0x8   : > { %3698 = vmatprep.subr.bf16.mxu0 (!%p338_p2), %v3697_v58  ;;  %s4268_s25 = smov (!%p338_p2), 96   ;;  %s4269_s26 = smov (!%p338_p2), 64  }
   0x9   : > { %3700 = vmatpush3.bf16.msra.mxu0 (!%p338_p2), %v3697_v58  ;;  %s4270_s27 = smov (!%p338_p2), 8   ;;  %s4271_s28 = smov (!%p338_p2), 16  }
   0xa   : > { %3702 = vmatprep.subr.bf16.mxu0 (!%p338_p2), %v3701_v61 }
   0xd   : > { %s5443_s18 = smov (!%p377_p3, %s3042_s18), 1  ;;  %3704 = vmatpush3.bf16.msra.mxu0 %v3701_v61 }
   0xe   : > { %s3179_s19 = sshll.u32 %s5443_s18, 6 }
   0xf   : > { %s4349_s22 = scalar_lea.vmem %s5428_s0, %s3179_s19 }
  0x10   : > { %v387_v0 = vld [vmem:[%s4349_s22] sm:$0xff]  ;;  %v389_v1 = vld [vmem:[%s4349_s22 + $0x10] sm:$0xff]  ;;  %v388_v2 = vld [vmem:[%s4349_s22 + $0x8] sm:$0xff] }
  0x11   : > { %v396_v3 = vsel %vm395_vm0, %v387_v0, 0.0  ;;  %v402_v4 = vsel %vm395_vm0, %v389_v1, 0.0  ;;  %v390_v5 = vld [vmem:[%s4349_s22 + $0x18] sm:$0xff]  ;;  %v399_v6 = vsel %vm395_vm0, %v388_v2, 0.0  ;;  %v391_v8 = vld [vmem:[%s4349_s22 + $0x20] sm:$0xff]  ;;  %v392_v9 = vld [vmem:[%s4349_s22 + $0x28] sm:$0xff] }
  0x12   : > { %397 = vadd.xlane.f32.xlu0 %v396_v3  ;;  %403 = vadd.xlane.f32.xlu1 %v402_v4  ;;  %v405_v7 = vsel %vm395_vm0, %v390_v5, 0.0  ;;  %v408_v10 = vsel %vm395_vm0, %v391_v8, 0.0  ;;  %v411_v11 = vsel %vm395_vm0, %v392_v9, 0.0  ;;  %v393_v12 = vld [vmem:[%s4349_s22 + $0x30] sm:$0xff]  ;;  %v394_v13 = vld [vmem:[%s4349_s22 + $0x38] sm:$0xff] }
  0x13   : > { %v414_v14 = vsel %vm395_vm0, %v393_v12, 0.0  ;;  %v417_v15 = vsel %vm395_vm0, %v394_v13, 0.0 }
  0x16   : > { %400 = vadd.xlane.f32.xlu0 %v399_v6  ;;  %406 = vadd.xlane.f32.xlu1 %v405_v7 }
  0x1a   : > { %409 = vadd.xlane.f32.xlu0 %v408_v10  ;;  %412 = vadd.xlane.f32.xlu1 %v411_v11 }
  0x1e   : > { %415 = vadd.xlane.f32.xlu0 %v414_v14  ;;  %418 = vadd.xlane.f32.xlu1 %v417_v15 }
  0x9f   : > { %v398_v16 = vpop.xlane.xlu0 %397  ;;  %v404_v17 = vpop.xlane.xlu1 %403 }
  0xa0   : > { %v421_v18 = vmul.f32 0.03125, %v398_v16  ;;  %v423_v19 = vmul.f32 0.03125, %v404_v17 }
  0xa2   : > { %v4367_v20 = vsub.f32 %v387_v0, %v421_v18  ;;  %v4369_v21 = vsub.f32 %v389_v1, %v423_v19 }
  0xa3   : > { %v401_v22 = vpop.xlane.xlu0 %400  ;;  %v407_v23 = vpop.xlane.xlu1 %406 }
  0xa4   : > { %v422_v24 = vmul.f32 0.03125, %v401_v22  ;;  %v424_v25 = vmul.f32 0.03125, %v407_v23  ;;  %v437_v26 = vmul.f32 %v4367_v20, %v4367_v20  ;;  %v439_v27 = vmul.f32 %v4369_v21, %v4369_v21  ;;  %v3051_v22 = vld [vmem:[%s5429_s1] ss:$0 sm:$0xff] }
  0xa6   : > { %v4375_v28 = vsub.f32 %v388_v2, %v422_v24  ;;  %v4377_v29 = vsub.f32 %v390_v5, %v424_v25  ;;  %v445_v30 = vsel %vm395_vm0, %v437_v26, 0.0  ;;  %v451_v33 = vsel %vm395_vm0, %v439_v27, 0.0  ;;  %v3052_v26 = vld [vmem:[%s5430_s2] ss:$0 sm:$0xff] }
  0xa7   : > { %446 = vadd.xlane.f32.xlu0 %v445_v30  ;;  %v410_v31 = vpop.xlane.xlu0 %409  ;;  %v413_v32 = vpop.xlane.xlu1 %412 }
  0xa8   : > { %v425_v34 = vmul.f32 0.03125, %v410_v31  ;;  %v426_v35 = vmul.f32 0.03125, %v413_v32  ;;  %v438_v36 = vmul.f32 %v4375_v28, %v4375_v28  ;;  %v440_v37 = vmul.f32 %v4377_v29, %v4377_v29 }
  0xaa   : > { %v4385_v38 = vsub.f32 %v391_v8, %v425_v34  ;;  %v4387_v39 = vsub.f32 %v392_v9, %v426_v35  ;;  %v448_v40 = vsel %vm395_vm0, %v438_v36, 0.0  ;;  %v454_v43 = vsel %vm395_vm0, %v440_v37, 0.0 }
  0xab   : > { %452 = vadd.xlane.f32.xlu0 %v451_v33  ;;  %449 = vadd.xlane.f32.xlu1 %v448_v40  ;;  %v416_v41 = vpop.xlane.xlu0 %415  ;;  %v419_v42 = vpop.xlane.xlu1 %418 }
  0xac   : > { %v427_v44 = vmul.f32 0.03125, %v416_v41  ;;  %v428_v45 = vmul.f32 0.03125, %v419_v42  ;;  %v441_v46 = vmul.f32 %v4385_v38, %v4385_v38  ;;  %v442_v47 = vmul.f32 %v4387_v39, %v4387_v39 }
  0xae   : > { %v4395_v48 = vsub.f32 %v393_v12, %v427_v44  ;;  %v4397_v49 = vsub.f32 %v394_v13, %v428_v45  ;;  %v457_v50 = vsel %vm395_vm0, %v441_v46, 0.0  ;;  %v460_v51 = vsel %vm395_vm0, %v442_v47, 0.0 }
  0xaf   : > { %455 = vadd.xlane.f32.xlu1 %v454_v43  ;;  %458 = vadd.xlane.f32.xlu0 %v457_v50 }
  0xb0   : > { %v443_v52 = vmul.f32 %v4395_v48, %v4395_v48  ;;  %v444_v53 = vmul.f32 %v4397_v49, %v4397_v49 }
  0xb2   : > { %v463_v54 = vsel %vm395_vm0, %v443_v52, 0.0  ;;  %v466_v55 = vsel %vm395_vm0, %v444_v53, 0.0 }
  0xb3   : > { %461 = vadd.xlane.f32.xlu1 %v460_v51  ;;  %464 = vadd.xlane.f32.xlu0 %v463_v54 }
  0xb7   : > { %467 = vadd.xlane.f32.xlu1 %v466_v55 }
 0x134   : > { %v447_v62 = vpop.xlane.xlu0 %446 }
 0x135   : > { %v469_v63 = vmul.f32 0.03125, %v447_v62 }
 0x137   : > { %v477_v0 = vadd.f32 1e-05, %v469_v63 }
 0x138   : > { %v450_v1 = vpop.xlane.xlu1 %449  ;;  %v453_v2 = vpop.xlane.xlu0 %452 }
 0x139   : > { %4089 = vrsqrt.f32 %v477_v0  ;;  %v470_v3 = vmul.f32 0.03125, %v450_v1  ;;  %v471_v4 = vmul.f32 0.03125, %v453_v2 }
 0x13b   : > { %v478_v5 = vadd.f32 1e-05, %v470_v3  ;;  %v479_v6 = vadd.f32 1e-05, %v471_v4 }
 0x13c   : > { %v456_v7 = vpop.xlane.xlu1 %455  ;;  %v459_v8 = vpop.xlane.xlu0 %458 }
 0x13d   : > { %4091 = vrsqrt.f32 %v478_v5  ;;  %v472_v9 = vmul.f32 0.03125, %v456_v7  ;;  %v473_v10 = vmul.f32 0.03125, %v459_v8 }
 0x13e   : > { %4093 = vrsqrt.f32 %v479_v6 }
 0x13f   : > { %v480_v11 = vadd.f32 1e-05, %v472_v9  ;;  %v481_v12 = vadd.f32 1e-05, %v473_v10 }
 0x140   : > { %v462_v13 = vpop.xlane.xlu1 %461  ;;  %v465_v14 = vpop.xlane.xlu0 %464 }
 0x141   : > { %4095 = vrsqrt.f32 %v480_v11  ;;  %v474_v15 = vmul.f32 0.03125, %v462_v13  ;;  %v475_v16 = vmul.f32 0.03125, %v465_v14 }
 0x142   : > { %4097 = vrsqrt.f32 %v481_v12 }
 0x143   : > { %v4090_v17 = vpop.eup %4089  ;;  %v482_v18 = vadd.f32 1e-05, %v474_v15  ;;  %v483_v19 = vadd.f32 1e-05, %v475_v16 }
 0x144   : > { %v468_v23 = vpop.xlane.xlu1 %467  ;;  %v493_v24 = vmul.f32 %v4090_v17, %v4367_v20 }
 0x145   : > { %4099 = vrsqrt.f32 %v482_v18  ;;  %v476_v25 = vmul.f32 0.03125, %v468_v23 }
 0x146   : > { %4101 = vrsqrt.f32 %v483_v19  ;;  %v508_v27 = vmul.f32 %v3051_v22, %v493_v24 }
 0x147   : > { %v4092_v30 = vpop.eup %4091  ;;  %v484_v31 = vadd.f32 1e-05, %v476_v25 }
 0x148   : > { %v4094_v32 = vpop.eup %4093  ;;  %v523_v33 = vadd.f32 %v3052_v26, %v508_v27  ;;  %v494_v34 = vmul.f32 %v4092_v30, %v4375_v28 }
 0x149   : > { %4103 = vrsqrt.f32 %v484_v31  ;;  %v495_v35 = vmul.f32 %v4094_v32, %v4369_v21 }
 0x14a   : > { %3377 = vmatprep.mubr.msk.f32.mxu0 %vm395_vm0, %v523_v33  ;;  %v509_v20 = vmul.f32 %v3051_v22, %v494_v34 }
 0x14b   : > { %v4096_v36 = vpop.eup %4095  ;;  %v510_v37 = vmul.f32 %v3051_v22, %v495_v35 }
 0x14c   : > { %v4098_v40 = vpop.eup %4097  ;;  %v524_v41 = vadd.f32 %v3052_v26, %v509_v20  ;;  %v496_v42 = vmul.f32 %v4096_v36, %v4377_v29 }
 0x14d   : > { %v525_v43 = vadd.f32 %v3052_v26, %v510_v37  ;;  %v497_v44 = vmul.f32 %v4098_v40, %v4385_v38 }
 0x14e   : > { %3378 = vmatmul.mubr.msk.f32.vlgmr.msra.gmra.mrb[0].mxu0 %vm395_vm0, %v524_v41  ;;  %v511_v45 = vmul.f32 %v3051_v22, %v496_v42 }
 0x14f   : > { %v4100_v46 = vpop.eup %4099  ;;  %3380 = vmatprep.mubr.msk.f32.mxu0 %vm395_vm0, %v525_v43  ;;  %v512_v28 = vmul.f32 %v3051_v22, %v497_v44 }
 0x150   : > { %v4102_v21 = vpop.eup %4101  ;;  %v526_v47 = vadd.f32 %v3052_v26, %v511_v45  ;;  %v498_v50 = vmul.f32 %v4100_v46, %v4387_v39 }
 0x151   : > { %v527_v51 = vadd.f32 %v3052_v26, %v512_v28  ;;  %v499_v52 = vmul.f32 %v4102_v21, %v4395_v48  ;;  %v3053_v48 = vld [vmem:[%s5432_s4] ss:$0 sm:$0xff] }
 0x152   : > { %3381 = vmatmul.mubr.msk.f32.gmra.mrb[2].mxu0 %vm395_vm0, %v526_v47  ;;  %v513_v29 = vmul.f32 %v3051_v22, %v498_v50 }
 0x153   : > { %v4104_v53 = vpop.eup %4103  ;;  %3383 = vmatprep.mubr.msk.f32.mxu0 %vm395_vm0, %v527_v51  ;;  %v514_v38 = vmul.f32 %v3051_v22, %v499_v52 }
 0x154   : > { %v528_v54 = vadd.f32 %v3052_v26, %v513_v29  ;;  %v500_v55 = vmul.f32 %v4104_v53, %v4397_v49 }
 0x155   : > { %v529_v56 = vadd.f32 %v3052_v26, %v514_v38 }
 0x156   : > { %3384 = vmatmul.mubr.msk.f32.gmra.mrb[4].mxu0 %vm395_vm0, %v528_v54  ;;  %v515_v57 = vmul.f32 %v3051_v22, %v500_v55 }
 0x157   : > { %3386 = vmatprep.mubr.msk.f32.mxu0 %vm395_vm0, %v529_v56 }
 0x158   : > { %v530_v39 = vadd.f32 %v3052_v26, %v515_v57 }
 0x15a   : > { %3387 = vmatmul.mubr.msk.f32.gmra.mrb[6].mxu0 %vm395_vm0, %v530_v39 }
 0x221   : > { %v3379_v58 = vpop.f32.mrb[0].mxu0 }
 0x222   : > { %v4444_v59 = vadd.f32 %v3379_v58, %v3053_v48  ;;  %v632_v60 = vpop.f32.mrb[1].mxu0 }
 0x223   : > { %v633_v61 = vadd.f32 %v3053_v48, %v632_v60 }
 0x224   : > { %681 = vrot.lane.b32.xlu1 %v4444_v59, %s4265_s21 }
 0x225   : > { %679 = vrot.lane.b32.xlu0 %v633_v61, %s4265_s21  ;;  %v3382_v49 = vpop.f32.mrb[2].mxu0  ;;  %3405 = vmatprep.mubr.msk.f32.mxu1 %vm743_vm1, %v633_v61  ;;  %v3929_v9 = vpack.i.bf16 %v4444_v59, %v633_v61 }
 0x226   : > { %v642_v62 = vpop.f32.mrb[3].mxu0  ;;  %v4451_v2 = vadd.f32 %v3382_v49, %v3053_v48 }
 0x227   : > { %v4448_v63 = vadd.f32 %v3053_v48, %v642_v62 }
 0x229   : > { %683 = vrot.lane.b32.xlu1 %v4448_v63, %s4265_s21  ;;  %v3385_v0 = vpop.f32.mrb[4].mxu0  ;;  %v4484_v10 = vpack.i.bf16 %v4451_v2, %v4448_v63 }
 0x22a   : > { %v652_v1 = vpop.f32.mrb[5].mxu0  ;;  %v4457_v6 = vadd.f32 %v3385_v0, %v3053_v48 }
 0x22b   : > { %v4453_v3 = vadd.f32 %v3053_v48, %v652_v1 }
 0x22d   : > { %685 = vrot.lane.b32.xlu1 %v4451_v2, %s4265_s21  ;;  %687 = vrot.lane.b32.xlu0 %v4453_v3, %s4265_s21  ;;  %v3388_v4 = vpop.f32.mrb[6].mxu0  ;;  %v4490_v11 = vpack.i.bf16 %v4457_v6, %v4453_v3 }
 0x22e   : > { %v662_v5 = vpop.f32.mrb[7].mxu0  ;;  %v4463_v8 = vadd.f32 %v3388_v4, %v3053_v48 }
 0x22f   : > { %v4459_v7 = vadd.f32 %v3053_v48, %v662_v5 }
 0x231   : > { %689 = vrot.lane.b32.xlu1 %v4457_v6, %s4265_s21  ;;  %691 = vrot.lane.b32.xlu0 %v4459_v7, %s4265_s21  ;;  %v4496_v12 = vpack.i.bf16 %v4463_v8, %v4459_v7 }
 0x235   : > { %693 = vrot.lane.b32.xlu1 %v4463_v8, %s4265_s21  ;;  %695 = vrot.lane.b32.xlu0 %v633_v61, %s4266_s23  ;;  %s4272_s21 = smov 24  }
 0x239   : > { %697 = vrot.lane.b32.xlu1 %v4444_v59, %s4266_s23  ;;  %711 = vrot.lane.b32.xlu0 %v633_v61, %s4267_s24 }
 0x23d   : > { %713 = vrot.lane.b32.xlu1 %v4444_v59, %s4267_s24  ;;  %699 = vrot.lane.b32.xlu0 %v4448_v63, %s4266_s23 }
 0x241   : > { %701 = vrot.lane.b32.xlu1 %v4451_v2, %s4266_s23  ;;  %715 = vrot.lane.b32.xlu0 %v4448_v63, %s4267_s24 }
 0x245   : > { %717 = vrot.lane.b32.xlu1 %v4451_v2, %s4267_s24  ;;  %703 = vrot.lane.b32.xlu0 %v4453_v3, %s4266_s23 }
 0x249   : > { %705 = vrot.lane.b32.xlu1 %v4457_v6, %s4266_s23  ;;  %719 = vrot.lane.b32.xlu0 %v4453_v3, %s4267_s24 }
 0x24d   : > { %721 = vrot.lane.b32.xlu1 %v4457_v6, %s4267_s24  ;;  %707 = vrot.lane.b32.xlu0 %v4459_v7, %s4266_s23 }
 0x251   : > { %709 = vrot.lane.b32.xlu1 %v4463_v8, %s4266_s23  ;;  %723 = vrot.lane.b32.xlu0 %v4459_v7, %s4267_s24  ;;  %s386_s23 = scalar_lea.vmem %s5439_s11, %s3179_s19 }
 0x255   : > { %725 = vrot.lane.b32.xlu1 %v4463_v8, %s4267_s24  ;;  %3930 = vrot.lane.b32.xlu0 %v3929_v9, %s4268_s25 }
 0x259   : > { %3940 = vrot.lane.b32.xlu0 %v4484_v10, %s4268_s25 }
 0x25d   : > { %3950 = vrot.lane.b32.xlu0 %v4490_v11, %s4268_s25 }
 0x261   : > { %3960 = vrot.lane.b32.xlu0 %v4496_v12, %s4268_s25 }
 0x296   : > { %v4500_v13 = vpop.permute.xlu1 %681 }
 0x297   : > { %v680_v14 = vpop.permute.xlu0 %679 }
 0x298   : > { %3433 = vmatprep.mubr.msk.f32.mxu0 %vm743_vm1, %v680_v14  ;;  %v4504_v15 = vpack.i.bf16 %v4500_v13, %v680_v14 }
 0x29a   : > { %3935 = vrot.lane.b32.xlu1 %v4504_v15, %s4268_s25 }
 0x29b   : > { %v4508_v16 = vpop.permute.xlu1 %683 }
 0x29f   : > { %v4510_v17 = vpop.permute.xlu1 %685  ;;  %v4512_v18 = vpop.permute.xlu0 %687 }
 0x2a0   : > { %v4516_v19 = vpack.i.bf16 %v4510_v17, %v4508_v16 }
 0x2a2   : > { %3945 = vrot.lane.b32.xlu1 %v4516_v19, %s4268_s25 }
 0x2a3   : > { %v4520_v22 = vpop.permute.xlu1 %689  ;;  %v4522_v23 = vpop.permute.xlu0 %691 }
 0x2a4   : > { %v3954_v24 = vpack.i.bf16 %v4520_v22, %v4512_v18 }
 0x2a6   : > { %3955 = vrot.lane.b32.xlu1 %v3954_v24, %s4268_s25 }
 0x2a7   : > { %v4527_v25 = vpop.permute.xlu1 %693  ;;  %v4529_v26 = vpop.permute.xlu0 %695 }
 0x2a8   : > { %v4533_v27 = vpack.i.bf16 %v4527_v25, %v4522_v23 }
 0x2aa   : > { %3965 = vrot.lane.b32.xlu1 %v4533_v27, %s4268_s25 }
 0x2ab   : > { %v4537_v30 = vpop.permute.xlu1 %697  ;;  %v4539_v31 = vpop.permute.xlu0 %711 }
 0x2ac   : > { %v3969_v32 = vpack.i.bf16 %v4537_v30, %v4529_v26 }
 0x2ae   : > { %3970 = vrot.lane.b32.xlu0 %v3969_v32, %s4268_s25 }
 0x2af   : > { %v4544_v33 = vpop.permute.xlu1 %713  ;;  %v4546_v34 = vpop.permute.xlu0 %699 }
 0x2b0   : > { %v3974_v35 = vpack.i.bf16 %v4544_v33, %v4539_v31 }
 0x2b2   : > { %3975 = vrot.lane.b32.xlu1 %v3974_v35, %s4268_s25 }
 0x2b3   : > { %v4551_v20 = vpop.permute.xlu1 %701  ;;  %v4553_v36 = vpop.permute.xlu0 %715 }
 0x2b4   : > { %v3979_v37 = vpack.i.bf16 %v4551_v20, %v4546_v34 }
 0x2b6   : > { %3980 = vrot.lane.b32.xlu0 %v3979_v37, %s4268_s25 }
 0x2b7   : > { %v4558_v40 = vpop.permute.xlu1 %717  ;;  %v4560_v41 = vpop.permute.xlu0 %703 }
 0x2b8   : > { %v3984_v42 = vpack.i.bf16 %v4558_v40, %v4553_v36 }
 0x2ba   : > { %3985 = vrot.lane.b32.xlu1 %v3984_v42, %s4268_s25 }
 0x2bb   : > { %v4565_v43 = vpop.permute.xlu1 %705  ;;  %v4567_v44 = vpop.permute.xlu0 %719 }
 0x2bc   : > { %v4571_v45 = vpack.i.bf16 %v4565_v43, %v4560_v41 }
 0x2be   : > { %3990 = vrot.lane.b32.xlu0 %v4571_v45, %s4268_s25 }
 0x2bf   : > { %v4575_v46 = vpop.permute.xlu1 %721  ;;  %v4577_v28 = vpop.permute.xlu0 %707 }
 0x2c0   : > { %v4581_v21 = vpack.i.bf16 %v4575_v46, %v4567_v44 }
 0x2c2   : > { %3995 = vrot.lane.b32.xlu1 %v4581_v21, %s4268_s25 }
 0x2c3   : > { %v4585_v47 = vpop.permute.xlu1 %709  ;;  %v4587_v50 = vpop.permute.xlu0 %723 }
 0x2c4   : > { %v4591_v51 = vpack.i.bf16 %v4585_v47, %v4577_v28 }
 0x2c6   : > { %4000 = vrot.lane.b32.xlu0 %v4591_v51, %s4268_s25 }
 0x2c7   : > { %v4595_v52 = vpop.permute.xlu1 %725  ;;  %v3931_v29 = vpop.permute.xlu0 %3930 }
 0x2c8   : > { %v4599_v53 = vpack.i.bf16 %v4595_v52, %v4587_v50  ;;  %v3933_v38 = vunpack.i.h.bf16 %v3931_v29  ;;  %v3932_v54 = vunpack.i.l.bf16 %v3931_v29 }
 0x2ca   : > { %4010 = vrot.lane.b32.xlu0 %v3929_v9, %s4269_s26  ;;  %4005 = vrot.lane.b32.xlu1 %v4599_v53, %s4268_s25  ;;  %v3705_v56 = vpack.c.bf16 %v3933_v38, %v3932_v54 }
 0x2cb   : > { %v3941_v57 = vpop.permute.xlu0 %3940 }
 0x2cc   : > { %v3943_v39 = vunpack.i.h.bf16 %v3941_v57  ;;  %v3942_v48 = vunpack.i.l.bf16 %v3941_v57  ;;  %3707 = vmatprep.subr.msk.bf16.mxu1 %vm4603_vm2, %v3705_v56 }
 0x2cd   : > { %3710 = vmatpush3.bf16.xpose.msk.msra.mxu1 %vm4603_vm2, %v3705_v56 }
 0x2ce   : > { %v3711_v58 = vpack.c.bf16 %v3943_v39, %v3942_v48  ;;  %4020 = vrot.lane.b32.xlu0 %v4490_v11, %s4269_s26  ;;  %4015 = vrot.lane.b32.xlu1 %v4484_v10, %s4269_s26 }
 0x2cf   : > { %v3951_v60 = vpop.permute.xlu0 %3950 }
 0x2d0   : > { %3713 = vmatprep.subr.msk.bf16.mxu1 %vm4603_vm2, %v3711_v58  ;;  %v3953_v61 = vunpack.i.h.bf16 %v3951_v60  ;;  %v3952_v49 = vunpack.i.l.bf16 %v3951_v60 }
 0x2d2   : > { %4030 = vrot.lane.b32.xlu0 %v4504_v15, %s4269_s26  ;;  %4025 = vrot.lane.b32.xlu1 %v4496_v12, %s4269_s26  ;;  %v3717_v62 = vpack.c.bf16 %v3953_v61, %v3952_v49 }
 0x2d3   : > { %v3961_v0 = vpop.permute.xlu0 %3960 }
 0x2d4   : > { %v3963_v1 = vunpack.i.h.bf16 %v3961_v0  ;;  %v3962_v4 = vunpack.i.l.bf16 %v3961_v0 }
 0x2d5   : > { %3716 = vmatpush3.bf16.xpose.msk.msra.mxu1 %vm4603_vm2, %v3711_v58 }
 0x2d6   : > { %4035 = vrot.lane.b32.xlu0 %v4516_v19, %s4269_s26  ;;  %4040 = vrot.lane.b32.xlu1 %v3954_v24, %s4269_s26  ;;  %v3723_v5 = vpack.c.bf16 %v3963_v1, %v3962_v4 }
 0x2d7   : > { %3719 = vmatprep.subr.msk.bf16.mxu1 %vm4603_vm2, %v3717_v62 }
 0x2da   : > { %4055 = vrot.lane.b32.xlu0 %v3979_v37, %s4269_s26  ;;  %4045 = vrot.lane.b32.xlu1 %v3969_v32, %s4269_s26 }
 0x2dd   : > { %3722 = vmatpush3.bf16.xpose.msk.msra.mxu1 %vm4603_vm2, %v3717_v62 }
 0x2de   : > { %4060 = vrot.lane.b32.xlu0 %v3984_v42, %s4269_s26  ;;  %4050 = vrot.lane.b32.xlu1 %v3974_v35, %s4269_s26 }
 0x2df   : > { %3725 = vmatprep.subr.msk.bf16.mxu1 %vm4603_vm2, %v3723_v5 }
 0x2e2   : > { %4065 = vrot.lane.b32.xlu0 %v4533_v27, %s4269_s26 }
 0x2e5   : > { %3728 = vmatpush3.bf16.xpose.msk.msra.mxu1 %vm4603_vm2, %v3723_v5 }
 0x2ec   : > { %3406 = vmatmul.mubr.msk.f32.vlgmr.msra.gmra.mrb[0].mxu1 %vm743_vm1, %v4444_v59 }
 0x2ed   : > { %3408 = vmatprep.mubr.msk.f32.mxu1 %vm743_vm1, %v4448_v63 }
 0x2f0   : > { %3409 = vmatmul.mubr.msk.f32.gmra.mrb[2].mxu1 %vm743_vm1, %v4451_v2 }
 0x2f1   : > { %3411 = vmatprep.mubr.msk.f32.mxu1 %vm743_vm1, %v4453_v3 }
 0x2f4   : > { %3412 = vmatmul.mubr.msk.f32.gmra.mrb[4].mxu1 %vm743_vm1, %v4457_v6 }
 0x2f5   : > { %3414 = vmatprep.mubr.msk.f32.mxu1 %vm743_vm1, %v4459_v7 }
 0x2f8   : > { %3415 = vmatmul.mubr.msk.f32.gmra.mrb[6].mxu1 %vm743_vm1, %v4463_v8 }
 0x2f9   : > { %3461 = vmatprep.mubr.msk.f32.mxu1 %vm743_vm1, %v4529_v26 }
 0x30c   : > { %v3936_v59 = vpop.permute.xlu1 %3935 }
 0x30d   : > { %v3938_v63 = vunpack.i.h.bf16 %v3936_v59  ;;  %v3937_v9 = vunpack.i.l.bf16 %v3936_v59 }
 0x30f   : > { %v3729_v10 = vpack.c.bf16 %v3938_v63, %v3937_v9 }
 0x311   : > { %3731 = vmatprep.subr.msk.bf16.mxu0 %vm4603_vm2, %v3729_v10 }
 0x312   : > { %3734 = vmatpush3.bf16.xpose.msk.msra.mxu0 %vm4603_vm2, %v3729_v10 }
 0x314   : > { %v3946_v2 = vpop.permute.xlu1 %3945 }
 0x315   : > { %v3948_v3 = vunpack.i.h.bf16 %v3946_v2  ;;  %v3947_v6 = vunpack.i.l.bf16 %v3946_v2 }
 0x317   : > { %v3735_v7 = vpack.c.bf16 %v3948_v3, %v3947_v6 }
 0x318   : > { %v3956_v11 = vpop.permute.xlu1 %3955 }
 0x319   : > { %v3958_v12 = vunpack.i.h.bf16 %v3956_v11  ;;  %v3957_v8 = vunpack.i.l.bf16 %v3956_v11  ;;  %3737 = vmatprep.subr.msk.bf16.mxu0 %vm4603_vm2, %v3735_v7 }
 0x31a   : > { %3740 = vmatpush3.bf16.xpose.msk.msra.mxu0 %vm4603_vm2, %v3735_v7 }
 0x31b   : > { %v3741_v14 = vpack.c.bf16 %v3958_v12, %v3957_v8 }
 0x31c   : > { %v3966_v15 = vpop.permute.xlu1 %3965 }
 0x31d   : > { %v3968_v19 = vunpack.i.h.bf16 %v3966_v15  ;;  %v3967_v24 = vunpack.i.l.bf16 %v3966_v15  ;;  %3743 = vmatprep.subr.msk.bf16.mxu0 %vm4603_vm2, %v3741_v14 }
 0x31f   : > { %v3747_v27 = vpack.c.bf16 %v3968_v19, %v3967_v24 }
 0x320   : > { %v3971_v26 = vpop.permute.xlu0 %3970 }
 0x321   : > { %v3973_v32 = vunpack.i.h.bf16 %v3971_v26  ;;  %v3972_v35 = vunpack.i.l.bf16 %v3971_v26 }
 0x322   : > { %3746 = vmatpush3.bf16.xpose.msk.msra.mxu0 %vm4603_vm2, %v3741_v14 }
 0x323   : > { %v3753_v37 = vpack.c.bf16 %v3973_v32, %v3972_v35  ;;  %3749 = vmatprep.subr.msk.bf16.mxu0 %vm4603_vm2, %v3747_v27 }
 0x324   : > { %v3976_v42 = vpop.permute.xlu1 %3975 }
 0x325   : > { %v3978_v29 = vunpack.i.h.bf16 %v3976_v42  ;;  %v3977_v38 = vunpack.i.l.bf16 %v3976_v42  ;;  %3755 = vmatprep.subr.msk.bf16.mxu1 %vm4603_vm2, %v3753_v37 }
 0x326   : > { %3758 = vmatpush3.bf16.xpose.msk.msra.mxu1 %vm4603_vm2, %v3753_v37 }
 0x327   : > { %v3777_v56 = vpack.c.bf16 %v3978_v29, %v3977_v38 }
 0x328   : > { %v3981_v54 = vpop.permute.xlu0 %3980 }
 0x329   : > { %v3983_v57 = vunpack.i.h.bf16 %v3981_v54  ;;  %v3982_v39 = vunpack.i.l.bf16 %v3981_v54 }
 0x32a   : > { %3752 = vmatpush3.bf16.xpose.msk.msra.mxu0 %vm4603_vm2, %v3747_v27 }
 0x32b   : > { %v3759_v48 = vpack.c.bf16 %v3983_v57, %v3982_v39  ;;  %3779 = vmatprep.subr.msk.bf16.mxu0 %vm4603_vm2, %v3777_v56 }
 0x32c   : > { %v3986_v58 = vpop.permute.xlu1 %3985 }
 0x32d   : > { %v3988_v60 = vunpack.i.h.bf16 %v3986_v58  ;;  %v3987_v61 = vunpack.i.l.bf16 %v3986_v58  ;;  %3761 = vmatprep.subr.msk.bf16.mxu1 %vm4603_vm2, %v3759_v48 }
 0x32e   : > { %3764 = vmatpush3.bf16.xpose.msk.msra.mxu1 %vm4603_vm2, %v3759_v48 }
 0x32f   : > { %v3783_v62 = vpack.c.bf16 %v3988_v60, %v3987_v61 }
 0x330   : > { %v3991_v49 = vpop.permute.xlu0 %3990 }
 0x331   : > { %v3993_v0 = vunpack.i.h.bf16 %v3991_v49  ;;  %v3992_v1 = vunpack.i.l.bf16 %v3991_v49  ;;  %3434 = vmatmul.mubr.msk.f32.vlgmr.msra.gmra.mrb[8].mxu0 %vm743_vm1, %v4500_v13 }
 0x332   : > { %3436 = vmatprep.mubr.msk.f32.mxu0 %vm743_vm1, %v4508_v16  ;;  %3782 = vmatpush3.bf16.xpose.msk.msra.mxu0 %vm4603_vm2, %v3777_v56 }
 0x333   : > { %v3765_v4 = vpack.c.bf16 %v3993_v0, %v3992_v1  ;;  %3785 = vmatprep.subr.msk.bf16.mxu0 %vm4603_vm2, %v3783_v62 }
 0x334   : > { %v3996_v5 = vpop.permute.xlu1 %3995 }
 0x335   : > { %v3998_v59 = vunpack.i.h.bf16 %v3996_v5  ;;  %v3997_v63 = vunpack.i.l.bf16 %v3996_v5  ;;  %3437 = vmatmul.mubr.msk.f32.gmra.mrb[10].mxu0 %vm743_vm1, %v4510_v17  ;;  %3767 = vmatprep.subr.msk.bf16.mxu1 %vm4603_vm2, %v3765_v4 }
 0x336   : > { %3439 = vmatprep.mubr.msk.f32.mxu0 %vm743_vm1, %v4512_v18  ;;  %3770 = vmatpush3.bf16.xpose.msk.msra.mxu1 %vm4603_vm2, %v3765_v4 }
 0x337   : > { %v3789_v16 = vpack.c.bf16 %v3998_v59, %v3997_v63 }
 0x338   : > { %v4001_v13 = vpop.permute.xlu0 %4000 }
 0x339   : > { %v4003_v9 = vunpack.i.h.bf16 %v4001_v13  ;;  %v4002_v10 = vunpack.i.l.bf16 %v4001_v13  ;;  %3440 = vmatmul.mubr.msk.f32.gmra.mrb[12].mxu0 %vm743_vm1, %v4520_v22 }
 0x33a   : > { %3442 = vmatprep.mubr.msk.f32.mxu0 %vm743_vm1, %v4522_v23  ;;  %3788 = vmatpush3.bf16.xpose.msk.msra.mxu0 %vm4603_vm2, %v3783_v62 }
 0x33b   : > { %v3771_v17 = vpack.c.bf16 %v4003_v9, %v4002_v10  ;;  %3791 = vmatprep.subr.msk.bf16.mxu0 %vm4603_vm2, %v3789_v16 }
 0x33c   : > { %v4006_v18 = vpop.permute.xlu1 %4005  ;;  %v4011_v2 = vpop.permute.xlu0 %4010 }
 0x33d   : > { %v4008_v3 = vunpack.i.h.bf16 %v4006_v18  ;;  %v4007_v6 = vunpack.i.l.bf16 %v4006_v18  ;;  %3443 = vmatmul.mubr.msk.f32.gmra.mrb[14].mxu0 %vm743_vm1, %v4527_v25  ;;  %3773 = vmatprep.subr.msk.bf16.mxu1 %vm4603_vm2, %v3771_v17  ;;  %v4013_v12 = vunpack.i.h.bf16 %v4011_v2  ;;  %v4012_v8 = vunpack.i.l.bf16 %v4011_v2 }
 0x33e   : > { %3776 = vmatpush3.bf16.xpose.msk.msra.mxu1 %vm4603_vm2, %v3771_v17  ;;  %3489 = vmatprep.mubr.msk.f32.mxu0 %vm743_vm1, %v4539_v31 }
 0x33f   : > { %v3795_v7 = vpack.c.bf16 %v4008_v3, %v4007_v6  ;;  %v3801_v15 = vpack.c.bf16 %v4013_v12, %v4012_v8 }
 0x340   : > { %v4016_v22 = vpop.permute.xlu1 %4015  ;;  %v4021_v23 = vpop.permute.xlu0 %4020 }
 0x341   : > { %v4017_v27 = vunpack.i.l.bf16 %v4016_v22  ;;  %v4022_v55 = vunpack.i.l.bf16 %v4021_v23 }
 0x342   : > { %3794 = vmatpush3.bf16.xpose.msk.msra.mxu0 %vm4603_vm2, %v3789_v16 }
 0x343   : > { %3797 = vmatprep.subr.msk.bf16.mxu0 %vm4603_vm2, %v3795_v7 }
 0x344   : > { %v4026_v11 = vpop.permute.xlu1 %4025  ;;  %v4031_v25 = vpop.permute.xlu0 %4030 }
 0x345   : > { %3462 = vmatmul.mubr.msk.f32.vlgmr.msra.gmra.mrb[8].mxu1 %vm743_vm1, %v4537_v30  ;;  %v4032_v42 = vunpack.i.l.bf16 %v4031_v25 }
 0x346   : > { %3464 = vmatprep.mubr.msk.f32.mxu1 %vm743_vm1, %v4546_v34  ;;  %v4018_v34 = vunpack.i.h.bf16 %v4016_v22 }
 0x348   : > { %v4725_v31 = vpop.permute.xlu1 %4040  ;;  %v4727_v14 = vpop.permute.xlu0 %4035 }
 0x349   : > { %3465 = vmatmul.mubr.msk.f32.gmra.mrb[10].mxu1 %vm743_vm1, %v4551_v20 }
 0x34a   : > { %3467 = vmatprep.mubr.msk.f32.mxu1 %vm743_vm1, %v4560_v41  ;;  %3800 = vmatpush3.bf16.xpose.msk.msra.mxu0 %vm4603_vm2, %v3795_v7  ;;  %v4023_v41 = vunpack.i.h.bf16 %v4021_v23 }
 0x34b   : > { %3802 = vmatprep.subr.bf16.mxu0 %v3801_v15 }
 0x34c   : > { %v4046_v19 = vpop.permute.xlu1 %4045  ;;  %v4056_v30 = vpop.permute.xlu0 %4055 }
 0x34d   : > { %v4048_v24 = vunpack.i.h.bf16 %v4046_v19  ;;  %v4047_v26 = vunpack.i.l.bf16 %v4046_v19  ;;  %3468 = vmatmul.mubr.msk.f32.gmra.mrb[12].mxu1 %vm743_vm1, %v4565_v43  ;;  %v4058_v32 = vunpack.i.h.bf16 %v4056_v30  ;;  %v4057_v35 = vunpack.i.l.bf16 %v4056_v30 }
 0x34e   : > { %3470 = vmatprep.mubr.msk.f32.mxu1 %vm743_vm1, %v4577_v28  ;;  %v3805_v43 = vpack.c.bf16 %v4018_v34, %v4017_v27  ;;  %v4028_v28 = vunpack.i.h.bf16 %v4026_v11 }
 0x34f   : > { %v3833_v20 = vpack.c.bf16 %v4048_v24, %v4047_v26  ;;  %v3837_v37 = vpack.c.bf16 %v4058_v32, %v4057_v35 }
 0x351   : > { %3471 = vmatmul.mubr.msk.f32.gmra.mrb[14].mxu1 %vm743_vm1, %v4585_v47  ;;  %3490 = vmatmul.mubr.msk.f32.vlgmr.msra.gmra.mrb[16].mxu0 %vm743_vm1, %v4544_v33  ;;  %v4027_v47 = vunpack.i.l.bf16 %v4026_v11  ;;  %v3809_v33 = vpack.c.bf16 %v4023_v41, %v4022_v55 }
 0x352   : > { %3834 = vmatprep.subr.bf16.mxu1 %v3833_v20  ;;  %3492 = vmatprep.mubr.msk.f32.mxu0 %vm743_vm1, %v4553_v36  ;;  %v4033_v36 = vunpack.i.h.bf16 %v4031_v25 }
 0x353   : > { %3804 = vmatpush3.bf16.msra.mxu0 %v3801_v15  ;;  %3836 = vmatpush3.bf16.msra.mxu1 %v3833_v20  ;;  %v3813_v29 = vpack.c.bf16 %v4028_v28, %v4027_v47 }
 0x354   : > { %3806 = vmatprep.subr.bf16.mxu0 %v3805_v43  ;;  %3838 = vmatprep.subr.bf16.mxu1 %v3837_v37 }
 0x355   : > { %3493 = vmatmul.mubr.msk.f32.gmra.mrb[18].mxu0 %vm743_vm1, %v4558_v40  ;;  %v4755_v40 = vpack.c.bf16 %v4033_v36, %v4032_v42 }
 0x356   : > { %3495 = vmatprep.mubr.msk.f32.mxu0 %vm743_vm1, %v4567_v44 }
 0x357   : > { %3808 = vmatpush3.bf16.msra.mxu0 %v3805_v43  ;;  %3840 = vmatpush3.bf16.msra.mxu1 %v3837_v37 }
 0x358   : > { %3810 = vmatprep.subr.bf16.mxu0 %v3809_v33 }
 0x359   : > { %3496 = vmatmul.mubr.msk.f32.gmra.mrb[20].mxu0 %vm743_vm1, %v4575_v46 }
 0x35a   : > { %3498 = vmatprep.mubr.msk.f32.mxu0 %vm743_vm1, %v4587_v50 }
 0x35b   : > { %3812 = vmatpush3.bf16.msra.mxu0 %v3809_v33 }
 0x35c   : > { %3814 = vmatprep.subr.bf16.mxu0 %v3813_v29 }
 0x35d   : > { %3499 = vmatmul.mubr.msk.f32.gmra.mrb[22].mxu0 %vm743_vm1, %v4595_v52 }
 0x35f   : > { %3816 = vmatpush3.bf16.msra.mxu0 %v3813_v29 }
 0x360   : > { %3818 = vmatprep.subr.bf16.mxu0 %v4755_v40 }
 0x3bf   : > { %v4758_v44 = vpop.f32.mrb[0].mxu1 }
 0x3c0   : > { %v4760_v46 = vpop.f32.mrb[1].mxu1  ;;  %v1344_v38 = vsel %vm1340_vm3, %v4758_v44, -inf }
 0x3c1   : > { %1345 = vmax.xlane.f32.xlu1 %v1344_v38  ;;  %v1341_v50 = vsel %vm1340_vm3, %v4760_v46, -inf }
 0x3c2   : > { %1342 = vmax.xlane.f32.xlu0 %v1341_v50 }
 0x3c3   : > { %v4766_v54 = vpop.f32.mrb[2].mxu1 }
 0x3c4   : > { %v4768_v52 = vpop.f32.mrb[3].mxu1  ;;  %v1350_v56 = vsel %vm1340_vm3, %v4766_v54, -inf }
 0x3c5   : > { %v1347_v58 = vsel %vm1340_vm3, %v4768_v52, -inf }
 0x3c6   : > { %1351 = vmax.xlane.f32.xlu0 %v1350_v56 }
 0x3c7   : > { %v4772_v57 = vpop.f32.mrb[4].mxu1 }
 0x3c8   : > { %v4774_v39 = vpop.f32.mrb[5].mxu1  ;;  %v1356_v48 = vsel %vm1340_vm3, %v4772_v57, -inf }
 0x3c9   : > { %1357 = vmax.xlane.f32.xlu1 %v1356_v48  ;;  %v1353_v62 = vsel %vm1340_vm3, %v4774_v39, -inf }
 0x3ca   : > { %1348 = vmax.xlane.f32.xlu0 %v1347_v58 }
 0x3cb   : > { %v4780_v60 = vpop.f32.mrb[6].mxu1 }
 0x3cc   : > { %v4782_v61 = vpop.f32.mrb[7].mxu1  ;;  %v1362_v49 = vsel %vm1340_vm3, %v4780_v60, -inf }
 0x3cd   : > { %1363 = vmax.xlane.f32.xlu1 %v1362_v49  ;;  %v1359_v0 = vsel %vm1340_vm3, %v4782_v61, -inf  ;;  %v4882_v49 = vpop.permute.xlu0 %4060 }
 0x3ce   : > { %1354 = vmax.xlane.f32.xlu0 %v1353_v62  ;;  %v4884_v62 = vpop.permute.xlu1 %4050 }
 0x3d2   : > { %1360 = vmax.xlane.f32.xlu0 %v1359_v0  ;;  %v4886_v0 = vpop.permute.xlu0 %4065 }
 0x404   : > { %v4790_v1 = vpop.f32.mrb[8].mxu0 }
 0x405   : > { %v4792_v4 = vpop.f32.mrb[9].mxu0  ;;  %v1368_v5 = vsel %vm1340_vm3, %v4790_v1, -inf }
 0x406   : > { %1369 = vmax.xlane.f32.xlu1 %v1368_v5  ;;  %v1365_v59 = vsel %vm1340_vm3, %v4792_v4, -inf }
 0x407   : > { %1366 = vmax.xlane.f32.xlu0 %v1365_v59 }
 0x408   : > { %v4798_v63 = vpop.f32.mrb[10].mxu0 }
 0x409   : > { %v4800_v13 = vpop.f32.mrb[11].mxu0  ;;  %v1374_v7 = vsel %vm1340_vm3, %v4798_v63, -inf }
 0x40a   : > { %v1371_v11 = vsel %vm1340_vm3, %v4800_v13, -inf }
 0x40c   : > { %v4802_v16 = vpop.f32.mrb[12].mxu0 }
 0x40d   : > { %v4804_v9 = vpop.f32.mrb[13].mxu0  ;;  %v1380_v34 = vsel %vm1340_vm3, %v4802_v16, -inf }
 0x40e   : > { %v1377_v27 = vsel %vm1340_vm3, %v4804_v9, -inf }
 0x410   : > { %v4806_v10 = vpop.f32.mrb[14].mxu0 }
 0x411   : > { %v4808_v17 = vpop.f32.mrb[15].mxu0  ;;  %v1386_v37 = vsel %vm1340_vm3, %v4806_v10, -inf }
 0x412   : > { %v1383_v28 = vsel %vm1340_vm3, %v4808_v17, -inf }
 0x418   : > { %v4810_v18 = vpop.f32.mrb[8].mxu1 }
 0x419   : > { %v4812_v2 = vpop.f32.mrb[9].mxu1  ;;  %v1392_v3 = vsel %vm1340_vm3, %v4810_v18, -inf }
 0x41a   : > { %1393 = vmax.xlane.f32.xlu1 %v1392_v3  ;;  %v1389_v6 = vsel %vm1340_vm3, %v4812_v2, -inf }
 0x41b   : > { %1390 = vmax.xlane.f32.xlu0 %v1389_v6 }
 0x41c   : > { %v4818_v22 = vpop.f32.mrb[10].mxu1 }
 0x41d   : > { %v4820_v23 = vpop.f32.mrb[11].mxu1  ;;  %v1398_v8 = vsel %vm1340_vm3, %v4818_v22, -inf }
 0x41e   : > { %1375 = vmax.xlane.f32.xlu1 %v1374_v7  ;;  %v1395_v15 = vsel %vm1340_vm3, %v4820_v23, -inf }
 0x41f   : > { %1372 = vmax.xlane.f32.xlu0 %v1371_v11 }
 0x420   : > { %v4826_v25 = vpop.f32.mrb[12].mxu1 }
 0x421   : > { %v4828_v12 = vpop.f32.mrb[13].mxu1  ;;  %v1404_v20 = vsel %vm1340_vm3, %v4826_v25, -inf }
 0x422   : > { %1399 = vmax.xlane.f32.xlu1 %v1398_v8  ;;  %v1401_v41 = vsel %vm1340_vm3, %v4828_v12, -inf }
 0x423   : > { %1396 = vmax.xlane.f32.xlu0 %v1395_v15 }
 0x424   : > { %v4834_v19 = vpop.f32.mrb[14].mxu1  ;;  %v4836_v30 = vpop.f32.mrb[16].mxu0 }
 0x425   : > { %v4838_v24 = vpop.f32.mrb[15].mxu1  ;;  %v4840_v26 = vpop.f32.mrb[17].mxu0  ;;  %v1410_v36 = vsel %vm1340_vm3, %v4834_v19, -inf  ;;  %v1416_v29 = vsel %vm1340_vm3, %v4836_v30, -inf }
 0x426   : > { %1381 = vmax.xlane.f32.xlu1 %v1380_v34  ;;  %v1407_v42 = vsel %vm1340_vm3, %v4838_v24, -inf  ;;  %v1413_v38 = vsel %vm1340_vm3, %v4840_v26, -inf }
 0x427   : > { %1378 = vmax.xlane.f32.xlu0 %v1377_v27 }
 0x428   : > { %v4846_v32 = vpop.f32.mrb[18].mxu0 }
 0x429   : > { %v4848_v35 = vpop.f32.mrb[19].mxu0  ;;  %v1422_v50 = vsel %vm1340_vm3, %v4846_v32, -inf }
 0x42a   : > { %1405 = vmax.xlane.f32.xlu1 %v1404_v20  ;;  %v1419_v56 = vsel %vm1340_vm3, %v4848_v35, -inf }
 0x42b   : > { %1402 = vmax.xlane.f32.xlu0 %v1401_v41 }
 0x42c   : > { %v4854_v55 = vpop.f32.mrb[20].mxu0 }
 0x42d   : > { %v4856_v43 = vpop.f32.mrb[21].mxu0  ;;  %v1428_v48 = vsel %vm1340_vm3, %v4854_v55, -inf }
 0x42e   : > { %1387 = vmax.xlane.f32.xlu1 %v1386_v37  ;;  %v1425_v58 = vsel %vm1340_vm3, %v4856_v43, -inf }
 0x42f   : > { %1384 = vmax.xlane.f32.xlu0 %v1383_v28 }
 0x430   : > { %v4862_v47 = vpop.f32.mrb[22].mxu0 }
 0x431   : > { %v4864_v33 = vpop.f32.mrb[23].mxu0 }
 0x432   : > { %1411 = vmax.xlane.f32.xlu1 %v1410_v36 }
 0x433   : > { %1408 = vmax.xlane.f32.xlu0 %v1407_v42 }
 0x436   : > { %1417 = vmax.xlane.f32.xlu1 %v1416_v29 }
 0x437   : > { %1414 = vmax.xlane.f32.xlu0 %v1413_v38 }
 0x43a   : > { %1423 = vmax.xlane.f32.xlu1 %v1422_v50 }
 0x43b   : > { %1420 = vmax.xlane.f32.xlu0 %v1419_v56 }
 0x43e   : > { %1429 = vmax.xlane.f32.xlu1 %v1428_v48 }
 0x43f   : > { %1426 = vmax.xlane.f32.xlu0 %v1425_v58  ;;  %v1434_v58 = vsel %vm1340_vm3, %v4862_v47, -inf }
 0x44e   : > { %v1346_v5 = vpop.xlane.xlu1 %1345 }
 0x44f   : > { %v1438_v59 = vsub.f32 %v4758_v44, %v1346_v5  ;;  %v1343_v3 = vpop.xlane.xlu0 %1342 }
 0x450   : > { %v1437_v6 = vsub.f32 %v4760_v46, %v1343_v3 }
 0x451   : > { %v1471_v7 = vmul.f32 1.442695, %v1438_v59  ;;  %v1431_v59 = vsel %vm1340_vm3, %v4864_v33, -inf }
 0x452   : > { %v1469_v11 = vmul.f32 1.442695, %v1437_v6 }
 0x453   : > { %4105 = vpow2.f32 %v1471_v7  ;;  %v1352_v8 = vpop.xlane.xlu0 %1351 }
 0x454   : > { %4107 = vpow2.f32 %v1469_v11  ;;  %v1440_v15 = vsub.f32 %v4766_v54, %v1352_v8 }
 0x456   : > { %v1475_v34 = vmul.f32 1.442695, %v1440_v15  ;;  %v1358_v27 = vpop.xlane.xlu1 %1357 }
 0x457   : > { %v1442_v20 = vsub.f32 %v4772_v57, %v1358_v27  ;;  %v1349_v41 = vpop.xlane.xlu0 %1348 }
 0x458   : > { %v1439_v37 = vsub.f32 %v4768_v52, %v1349_v41  ;;  %4109 = vpow2.f32 %v1475_v34 }
 0x459   : > { %v1479_v28 = vmul.f32 1.442695, %v1442_v20 }
 0x45a   : > { %v1473_v44 = vmul.f32 1.442695, %v1439_v37  ;;  %v1364_v36 = vpop.xlane.xlu1 %1363 }
 0x45b   : > { %v1444_v46 = vsub.f32 %v4780_v60, %v1364_v36  ;;  %v1355_v42 = vpop.xlane.xlu0 %1354 }
 0x45c   : > { %4111 = vpow2.f32 %v1473_v44  ;;  %v1441_v29 = vsub.f32 %v4774_v39, %v1355_v42 }
 0x45d   : > { %v4895_v38 = vpop.eup %4105  ;;  %4113 = vpow2.f32 %v1479_v28  ;;  %v1483_v54 = vmul.f32 1.442695, %v1444_v46 }
 0x45e   : > { %v4897_v50 = vpop.eup %4107  ;;  %v1477_v57 = vmul.f32 1.442695, %v1441_v29  ;;  %v1536_v52 = vsel %vm1340_vm3, %v4895_v38, 0.0 }
 0x45f   : > { %v1361_v56 = vpop.xlane.xlu0 %1360  ;;  %1537 = vadd.xlane.f32.xlu1 %v1536_v52  ;;  %v1533_v48 = vsel %vm1340_vm3, %v4897_v50, 0.0 }
 0x460   : > { %4115 = vpow2.f32 %v1477_v57  ;;  %v1443_v60 = vsub.f32 %v4782_v61, %v1361_v56  ;;  %1534 = vadd.xlane.f32.xlu0 %v1533_v48 }
 0x461   : > { %4117 = vpow2.f32 %v1483_v54 }
 0x462   : > { %v1481_v39 = vmul.f32 1.442695, %v1443_v60  ;;  %v4906_v5 = vpop.eup %4109 }
 0x463   : > { %1435 = vmax.xlane.f32.xlu1 %v1434_v58  ;;  %v1542_v6 = vsel %vm1340_vm3, %v4906_v5, 0.0 }
 0x464   : > { %1432 = vmax.xlane.f32.xlu0 %v1431_v59  ;;  %4119 = vpow2.f32 %v1481_v39 }
 0x466   : > { %v4910_v3 = vpop.eup %4111 }
 0x467   : > { %v4914_v61 = vpop.eup %4113  ;;  %1543 = vadd.xlane.f32.xlu1 %v1542_v6  ;;  %v1539_v7 = vsel %vm1340_vm3, %v4910_v3, 0.0 }
 0x468   : > { %1540 = vadd.xlane.f32.xlu0 %v1539_v7  ;;  %v1548_v8 = vsel %vm1340_vm3, %v4914_v61, 0.0 }
 0x46a   : > { %v4918_v11 = vpop.eup %4115 }
 0x46b   : > { %v4922_v15 = vpop.eup %4117  ;;  %1549 = vadd.xlane.f32.xlu1 %v1548_v8  ;;  %v1545_v34 = vsel %vm1340_vm3, %v4918_v11, 0.0 }
 0x46c   : > { %1546 = vadd.xlane.f32.xlu0 %v1545_v34  ;;  %v1554_v27 = vsel %vm1340_vm3, %v4922_v15, 0.0 }
 0x46e   : > { %v4928_v20 = vpop.eup %4119 }
 0x46f   : > { %1555 = vadd.xlane.f32.xlu1 %v1554_v27  ;;  %v1551_v41 = vsel %vm1340_vm3, %v4928_v20, 0.0 }
 0x473   : > { %1552 = vadd.xlane.f32.xlu1 %v1551_v41 }
 0x493   : > { %v1370_v37 = vpop.xlane.xlu1 %1369 }
 0x494   : > { %v1446_v28 = vsub.f32 %v4790_v1, %v1370_v37  ;;  %v1367_v46 = vpop.xlane.xlu0 %1366 }
 0x495   : > { %v1445_v29 = vsub.f32 %v4792_v4, %v1367_v46 }
 0x496   : > { %v1487_v44 = vmul.f32 1.442695, %v1446_v28 }
 0x497   : > { %v1485_v48 = vmul.f32 1.442695, %v1445_v29 }
 0x498   : > { %4121 = vpow2.f32 %v1487_v44 }
 0x4a2   : > { %v4933_v36 = vpop.eup %4121 }
 0x4a3   : > { %v1560_v42 = vsel %vm1340_vm3, %v4933_v36, 0.0 }
 0x4a4   : > { %1561 = vadd.xlane.f32.xlu1 %v1560_v42 }
 0x4a7   : > { %v1394_v54 = vpop.xlane.xlu1 %1393 }
 0x4a8   : > { %v1454_v57 = vsub.f32 %v4810_v18, %v1394_v54  ;;  %v1391_v52 = vpop.xlane.xlu0 %1390 }
 0x4a9   : > { %v1453_v56 = vsub.f32 %v4812_v2, %v1391_v52 }
 0x4aa   : > { %v1503_v60 = vmul.f32 1.442695, %v1454_v57 }
 0x4ab   : > { %v1501_v1 = vmul.f32 1.442695, %v1453_v56  ;;  %v1376_v39 = vpop.xlane.xlu1 %1375 }
 0x4ac   : > { %4123 = vpow2.f32 %v1503_v60  ;;  %v1448_v58 = vsub.f32 %v4798_v63, %v1376_v39  ;;  %v1373_v59 = vpop.xlane.xlu0 %1372 }
 0x4ad   : > { %4125 = vpow2.f32 %v1501_v1  ;;  %v1447_v6 = vsub.f32 %v4800_v13, %v1373_v59 }
 0x4ae   : > { %4127 = vpow2.f32 %v1485_v48  ;;  %v1491_v7 = vmul.f32 1.442695, %v1448_v58 }
 0x4af   : > { %v1489_v4 = vmul.f32 1.442695, %v1447_v6  ;;  %v1400_v8 = vpop.xlane.xlu1 %1399 }
 0x4b0   : > { %4129 = vpow2.f32 %v1491_v7  ;;  %v1456_v18 = vsub.f32 %v4818_v22, %v1400_v8  ;;  %v1397_v34 = vpop.xlane.xlu0 %1396 }
 0x4b1   : > { %v1455_v2 = vsub.f32 %v4820_v23, %v1397_v34  ;;  %4131 = vpow2.f32 %v1489_v4 }
 0x4b2   : > { %v1507_v27 = vmul.f32 1.442695, %v1456_v18 }
 0x4b3   : > { %v1505_v41 = vmul.f32 1.442695, %v1455_v2  ;;  %v1382_v37 = vpop.xlane.xlu1 %1381 }
 0x4b4   : > { %4133 = vpow2.f32 %v1507_v27  ;;  %v1450_v63 = vsub.f32 %v4802_v16, %v1382_v37  ;;  %v1379_v28 = vpop.xlane.xlu0 %1378 }
 0x4b5   : > { %v1449_v13 = vsub.f32 %v4804_v9, %v1379_v28  ;;  %4135 = vpow2.f32 %v1505_v41 }
 0x4b6   : > { %v4945_v44 = vpop.eup %4123  ;;  %v1495_v42 = vmul.f32 1.442695, %v1450_v63 }
 0x4b7   : > { %v4948_v46 = vpop.eup %4125  ;;  %v1406_v22 = vpop.xlane.xlu1 %1405  ;;  %v1584_v23 = vsel %vm1340_vm3, %v4945_v44, 0.0  ;;  %v1493_v56 = vmul.f32 1.442695, %v1449_v13 }
 0x4b8   : > { %v4952_v29 = vpop.eup %4127  ;;  %v1458_v54 = vsub.f32 %v4826_v25, %v1406_v22  ;;  %v1403_v57 = vpop.xlane.xlu0 %1402  ;;  %1585 = vadd.xlane.f32.xlu0 %v1584_v23  ;;  %v1581_v16 = vsel %vm1340_vm3, %v4948_v46, 0.0  ;;  %4137 = vpow2.f32 %v1495_v42 }
 0x4b9   : > { %v1457_v52 = vsub.f32 %v4828_v12, %v1403_v57  ;;  %1582 = vadd.xlane.f32.xlu1 %v1581_v16  ;;  %v1557_v39 = vsel %vm1340_vm3, %v4952_v29, 0.0 }
 0x4ba   : > { %v4958_v9 = vpop.eup %4129  ;;  %v1511_v48 = vmul.f32 1.442695, %v1458_v54 }
 0x4bb   : > { %v1509_v60 = vmul.f32 1.442695, %v1457_v52  ;;  %v1388_v1 = vpop.xlane.xlu1 %1387  ;;  %v1566_v25 = vsel %vm1340_vm3, %v4958_v9, 0.0  ;;  %v4965_v12 = vpop.eup %4131 }
 0x4bc   : > { %4139 = vpow2.f32 %v1511_v48  ;;  %v1452_v58 = vsub.f32 %v4806_v10, %v1388_v1  ;;  %v1385_v59 = vpop.xlane.xlu0 %1384  ;;  %1558 = vadd.xlane.f32.xlu0 %v1557_v39  ;;  %v1563_v10 = vsel %vm1340_vm3, %v4965_v12, 0.0 }
 0x4bd   : > { %1567 = vadd.xlane.f32.xlu1 %v1566_v25  ;;  %4141 = vpow2.f32 %v1493_v56  ;;  %v1451_v41 = vsub.f32 %v4808_v17, %v1385_v59 }
 0x4be   : > { %v4967_v6 = vpop.eup %4133  ;;  %4143 = vpow2.f32 %v1509_v60  ;;  %v1499_v7 = vmul.f32 1.442695, %v1452_v58 }
 0x4bf   : > { %v1412_v4 = vpop.xlane.xlu1 %1411  ;;  %v1590_v8 = vsel %vm1340_vm3, %v4967_v6, 0.0  ;;  %v4974_v2 = vpop.eup %4135  ;;  %v1497_v23 = vmul.f32 1.442695, %v1451_v41 }
 0x4c0   : > { %v1460_v18 = vsub.f32 %v4834_v19, %v1412_v4  ;;  %1591 = vadd.xlane.f32.xlu0 %v1590_v8  ;;  %v1409_v34 = vpop.xlane.xlu0 %1408  ;;  %4145 = vpow2.f32 %v1499_v7  ;;  %v1587_v19 = vsel %vm1340_vm3, %v4974_v2, 0.0 }
 0x4c1   : > { %v1459_v27 = vsub.f32 %v4838_v24, %v1409_v34  ;;  %1564 = vadd.xlane.f32.xlu1 %v1563_v10 }
 0x4c2   : > { %v1515_v37 = vmul.f32 1.442695, %v1460_v18  ;;  %v4980_v42 = vpop.eup %4137 }
 0x4c3   : > { %v1513_v63 = vmul.f32 1.442695, %v1459_v27  ;;  %v1418_v28 = vpop.xlane.xlu1 %1417  ;;  %v1572_v56 = vsel %vm1340_vm3, %v4980_v42, 0.0 }
 0x4c4   : > { %v1415_v13 = vpop.xlane.xlu0 %1414  ;;  %v1462_v24 = vsub.f32 %v4836_v30, %v1418_v28 }
 0x4c5   : > { %4147 = vpow2.f32 %v1513_v63  ;;  %1588 = vadd.xlane.f32.xlu1 %v1587_v19  ;;  %v1461_v39 = vsub.f32 %v4840_v26, %v1415_v13 }
 0x4c6   : > { %v4982_v22 = vpop.eup %4139  ;;  %4149 = vpow2.f32 %v1515_v37  ;;  %v1519_v1 = vmul.f32 1.442695, %v1462_v24 }
 0x4c7   : > { %v1424_v54 = vpop.xlane.xlu1 %1423  ;;  %v1596_v17 = vsel %vm1340_vm3, %v4982_v22, 0.0  ;;  %v4987_v57 = vpop.eup %4141  ;;  %4151 = vpow2.f32 %v1497_v23  ;;  %v1517_v4 = vmul.f32 1.442695, %v1461_v39 }
 0x4c8   : > { %v1464_v16 = vsub.f32 %v4846_v32, %v1424_v54  ;;  %1597 = vadd.xlane.f32.xlu0 %v1596_v17  ;;  %v1421_v52 = vpop.xlane.xlu0 %1420  ;;  %v4992_v48 = vpop.eup %4143  ;;  %v1569_v58 = vsel %vm1340_vm3, %v4987_v57, 0.0 }
 0x4c9   : > { %v1463_v60 = vsub.f32 %v4848_v35, %v1421_v52  ;;  %1573 = vadd.xlane.f32.xlu1 %v1572_v56  ;;  %v1593_v59 = vsel %vm1340_vm3, %v4992_v48, 0.0 }
 0x4ca   : > { %v1523_v30 = vmul.f32 1.442695, %v1464_v16  ;;  %v5000_v7 = vpop.eup %4145 }
 0x4cb   : > { %v1521_v25 = vmul.f32 1.442695, %v1463_v60  ;;  %v1430_v32 = vpop.xlane.xlu1 %1429  ;;  %v1578_v18 = vsel %vm1340_vm3, %v5000_v7, 0.0 }
 0x4cc   : > { %4153 = vpow2.f32 %v1523_v30  ;;  %1570 = vadd.xlane.f32.xlu0 %v1569_v58  ;;  %v1466_v26 = vsub.f32 %v4854_v55, %v1430_v32  ;;  %v1427_v8 = vpop.xlane.xlu0 %1426 }
 0x4cd   : > { %1594 = vadd.xlane.f32.xlu1 %v1593_v59  ;;  %4155 = vpow2.f32 %v1521_v25  ;;  %v1465_v41 = vsub.f32 %v4856_v43, %v1427_v8  ;;  %v4038_v8 = vunpack.i.h.bf16 %v4727_v14 }
 0x4ce   : > { %4157 = vpow2.f32 %v1519_v1  ;;  %v1527_v27 = vmul.f32 1.442695, %v1466_v26 }
 0x4cf   : > { %v5002_v35 = vpop.eup %4147  ;;  %4159 = vpow2.f32 %v1517_v4  ;;  %v1525_v28 = vmul.f32 1.442695, %v1465_v41 }
 0x4d0   : > { %v1599_v34 = vsel %vm1340_vm3, %v5002_v35, 0.0  ;;  %v5009_v10 = vpop.eup %4149  ;;  %4161 = vpow2.f32 %v1527_v27 }
 0x4d1   : > { %1579 = vadd.xlane.f32.xlu1 %v1578_v18  ;;  %1600 = vadd.xlane.f32.xlu0 %v1599_v34  ;;  %v5012_v37 = vpop.eup %4151  ;;  %v1602_v55 = vsel %vm1340_vm3, %v5009_v10, 0.0  ;;  %4163 = vpow2.f32 %v1525_v28  ;;  %v4037_v18 = vunpack.i.l.bf16 %v4727_v14 }
 0x4d2   : > { %v1575_v23 = vsel %vm1340_vm3, %v5012_v37, 0.0 }
 0x4d3   : > { %v3821_v14 = vpack.c.bf16 %v4038_v8, %v4037_v18 }
 0x4d5   : > { %1603 = vadd.xlane.f32.xlu1 %v1602_v55 }
 0x4d6   : > { %v5016_v63 = vpop.eup %4153 }
 0x4d7   : > { %v1614_v13 = vsel %vm1340_vm3, %v5016_v63, 0.0  ;;  %v5020_v19 = vpop.eup %4155 }
 0x4d8   : > { %1615 = vadd.xlane.f32.xlu0 %v1614_v13  ;;  %v5024_v43 = vpop.eup %4157  ;;  %v1611_v24 = vsel %vm1340_vm3, %v5020_v19, 0.0 }
 0x4d9   : > { %1576 = vadd.xlane.f32.xlu1 %v1575_v23  ;;  %v1608_v54 = vsel %vm1340_vm3, %v5024_v43, 0.0  ;;  %v5030_v17 = vpop.eup %4159 }
 0x4da   : > { %v1605_v16 = vsel %vm1340_vm3, %v5030_v17, 0.0  ;;  %v5034_v52 = vpop.eup %4161 }
 0x4db   : > { %v1620_v56 = vsel %vm1340_vm3, %v5034_v52, 0.0  ;;  %v5038_v60 = vpop.eup %4163 }
 0x4dc   : > { %1612 = vadd.xlane.f32.xlu0 %v1611_v24  ;;  %v1617_v30 = vsel %vm1340_vm3, %v5038_v60, 0.0 }
 0x4dd   : > { %1609 = vadd.xlane.f32.xlu1 %v1608_v54 }
 0x4e1   : > { %1606 = vadd.xlane.f32.xlu1 %v1605_v16 }
 0x4e5   : > { %1621 = vadd.xlane.f32.xlu1 %v1620_v56 }
 0x4e9   : > { %1618 = vadd.xlane.f32.xlu1 %v1617_v30  ;;  %v4052_v30 = vunpack.i.l.bf16 %v4884_v62 }
 0x4ec   : > { %v1538_v1 = vpop.xlane.xlu1 %1537 }
 0x4ed   : > { %4165 = vrcp.f32 %v1538_v1  ;;  %v1535_v39 = vpop.xlane.xlu0 %1534 }
 0x4ee   : > { %4167 = vrcp.f32 %v1535_v39 }
 0x4f0   : > { %v1436_v25 = vpop.xlane.xlu1 %1435 }
 0x4f1   : > { %v1433_v58 = vpop.xlane.xlu0 %1432 }
 0x4f2   : > { %4075 = vrot.lane.b32.xlu0 %v4581_v21, %s4269_s26  ;;  %v4043_v21 = vunpack.i.h.bf16 %v4725_v31  ;;  %v1467_v16 = vsub.f32 %v4864_v33, %v1433_v58 }
 0x4f4   : > { %v1544_v32 = vpop.xlane.xlu1 %1543  ;;  %v1529_v33 = vmul.f32 1.442695, %v1467_v16 }
 0x4f5   : > { %v1541_v59 = vpop.xlane.xlu0 %1540  ;;  %4169 = vrcp.f32 %v1544_v32 }
 0x4f6   : > { %4080 = vrot.lane.b32.xlu0 %v4591_v51, %s4269_s26  ;;  %4171 = vrcp.f32 %v1541_v59  ;;  %v4042_v51 = vunpack.i.l.bf16 %v4725_v31 }
 0x4f7   : > { %v4166_v4 = vpop.eup %4165 }
 0x4f8   : > { %v4168_v26 = vpop.eup %4167  ;;  %v1550_v34 = vpop.xlane.xlu1 %1549  ;;  %v1662_v55 = vmul.f32 %v4166_v4, %v4895_v38  ;;  %v1468_v38 = vsub.f32 %v4862_v47, %v1436_v25  ;;  %v3825_v23 = vpack.c.bf16 %v4043_v21, %v4042_v51  ;;  %v4053_v47 = vunpack.i.h.bf16 %v4884_v62 }
 0x4f9   : > { %v1547_v27 = vpop.xlane.xlu0 %1546  ;;  %v1661_v41 = vmul.f32 %v4168_v26, %v4897_v50  ;;  %v4068_v50 = vunpack.i.h.bf16 %v4886_v0 }
 0x4fa   : > { %4173 = vrcp.f32 %v1547_v27  ;;  %4070 = vrot.lane.b32.xlu1 %v4571_v45, %s4269_s26  ;;  %v4067_v45 = vunpack.i.l.bf16 %v4886_v0  ;;  %v1531_v54 = vmul.f32 1.442695, %v1468_v38  ;;  %v3849_v58 = vpack.c.bf16 %v4053_v47, %v4052_v30 }
 0x4fb   : > { %4175 = vrcp.f32 %v1550_v34  ;;  %3517 = vmatprep.mubr.msk.f32.mxu0 %vm1340_vm3, %v1661_v41  ;;  %v4062_v38 = vunpack.i.l.bf16 %v4882_v49 }
 0x4fc   : > { %v1556_v28 = vpop.xlane.xlu1 %1555  ;;  %3518 = vmatmul.mubr.msk.f32.vlgmr.msra.gmra.mrb[24].mxu0 %vm1340_vm3, %v1662_v55  ;;  %v3829_v1 = vpack.c.bf16 %v4068_v50, %v4067_v45 }
 0x4fd   : > { %3820 = vmatpush3.bf16.msra.mxu0 %v4755_v40  ;;  %4177 = vrcp.f32 %v1556_v28 }
 0x4fe   : > { %3822 = vmatprep.subr.bf16.mxu0 %v3821_v14 }
 0x4ff   : > { %v4170_v24 = vpop.eup %4169 }
 0x500   : > { %v1553_v13 = vpop.xlane.xlu1 %1552  ;;  %v4172_v31 = vpop.eup %4171  ;;  %v1664_v0 = vmul.f32 %v4170_v24, %v4906_v5 }
 0x501   : > { %4179 = vrcp.f32 %v1553_v13  ;;  %3824 = vmatpush3.bf16.msra.mxu0 %v3821_v14  ;;  %v1663_v40 = vmul.f32 %v4172_v31, %v4910_v3  ;;  %v4063_v14 = vunpack.i.h.bf16 %v4882_v49 }
 0x502   : > { %3826 = vmatprep.subr.bf16.mxu0 %v3825_v23  ;;  %4181 = vpow2.f32 %v1531_v54 }
 0x503   : > { %3520 = vmatprep.mubr.msk.f32.mxu0 %vm1340_vm3, %v1663_v40  ;;  %4183 = vpow2.f32 %v1529_v33 }
 0x504   : > { %v4174_v56 = vpop.eup %4173  ;;  %3521 = vmatmul.mubr.msk.f32.gmra.mrb[26].mxu0 %vm1340_vm3, %v1664_v0 }
 0x505   : > { %v4176_v39 = vpop.eup %4175  ;;  %3828 = vmatpush3.bf16.msra.mxu0 %v3825_v23  ;;  %v1665_v25 = vmul.f32 %v4174_v56, %v4918_v11 }
 0x506   : > { %3830 = vmatprep.subr.bf16.mxu0 %v3829_v1  ;;  %v1666_v3 = vmul.f32 %v4176_v39, %v4914_v61 }
 0x507   : > { %3523 = vmatprep.mubr.msk.f32.mxu0 %vm1340_vm3, %v1665_v25  ;;  %v4178_v62 = vpop.eup %4177 }
 0x508   : > { %3524 = vmatmul.mubr.msk.f32.gmra.mrb[28].mxu0 %vm1340_vm3, %v1666_v3  ;;  %v1668_v11 = vmul.f32 %v4178_v62, %v4922_v15 }
 0x509   : > { %3832 = vmatpush3.bf16.msra.mxu0 %v3829_v1 }
 0x50a   : > { %3850 = vmatprep.subr.bf16.mxu0 %v3849_v58 }
 0x50b   : > { %v4180_v5 = vpop.eup %4179 }
 0x50c   : > { %v1667_v32 = vmul.f32 %v4180_v5, %v4928_v20  ;;  %v5075_v59 = vpop.eup %4181 }
 0x50d   : > { %v1626_v61 = vsel %vm1340_vm3, %v5075_v59, 0.0  ;;  %v5079_v4 = vpop.eup %4183 }
 0x50e   : > { %3526 = vmatprep.mubr.msk.f32.mxu0 %vm1340_vm3, %v1667_v32  ;;  %v1623_v26 = vsel %vm1340_vm3, %v5079_v4, 0.0 }
 0x50f   : > { %3527 = vmatmul.mubr.msk.f32.gmra.mrb[30].mxu0 %vm1340_vm3, %v1668_v11 }
 0x515   : > { %1627 = vadd.xlane.f32.xlu0 %v1626_v61 }
 0x519   : > { %1624 = vadd.xlane.f32.xlu0 %v1623_v26 }
 0x52f   : > { %4085 = vrot.lane.b32.xlu0 %v4599_v53, %s4269_s26 }
 0x531   : > { %v1562_v15 = vpop.xlane.xlu1 %1561 }
 0x545   : > { %v5085_v20 = vpop.xlane.xlu0 %1585 }
 0x546   : > { %v1583_v8 = vpop.xlane.xlu1 %1582 }
 0x547   : > { %4185 = vrcp.f32 %v1583_v8 }
 0x548   : > { %4187 = vrcp.f32 %v1562_v15 }
 0x549   : > { %v1559_v18 = vpop.xlane.xlu0 %1558 }
 0x54a   : > { %4189 = vrcp.f32 %v1559_v18  ;;  %v1568_v34 = vpop.xlane.xlu1 %1567 }
 0x54b   : > { %4191 = vrcp.f32 %v1568_v34 }
 0x54d   : > { %v5087_v55 = vpop.xlane.xlu0 %1591 }
 0x54e   : > { %v1565_v27 = vpop.xlane.xlu1 %1564 }
 0x54f   : > { %4193 = vrcp.f32 %v1565_v27 }
 0x551   : > { %v4186_v41 = vpop.eup %4185 }
 0x552   : > { %v1589_v21 = vpop.xlane.xlu1 %1588  ;;  %v1677_v51 = vmul.f32 %v4186_v41, %v4948_v46  ;;  %v4188_v28 = vpop.eup %4187  ;;  %v3853_v46 = vpack.c.bf16 %v4063_v14, %v4062_v38 }
 0x553   : > { %v1670_v13 = vmul.f32 %v4188_v28, %v4933_v36 }
 0x554   : > { %v4190_v53 = vpop.eup %4189  ;;  %3573 = vmatprep.mubr.msk.f32.mxu1 %vm1340_vm3, %v1677_v51 }
 0x555   : > { %v5093_v50 = vpop.xlane.xlu0 %1597  ;;  %v1669_v45 = vmul.f32 %v4190_v53, %v4952_v29  ;;  %v4192_v24 = vpop.eup %4191 }
 0x556   : > { %v1574_v23 = vpop.xlane.xlu1 %1573  ;;  %v1672_v36 = vmul.f32 %v4192_v24, %v4958_v9 }
 0x557   : > { %3545 = vmatprep.mubr.msk.f32.mxu0 %vm1340_vm3, %v1669_v45  ;;  %4195 = vrcp.f32 %v1574_v23 }
 0x558   : > { %3546 = vmatmul.mubr.msk.f32.vlgmr.msra.gmra.mrb[32].mxu0 %vm1340_vm3, %v1670_v13 }
 0x559   : > { %v4194_v31 = vpop.eup %4193  ;;  %3852 = vmatpush3.bf16.msra.mxu0 %v3849_v58  ;;  %v1571_v54 = vpop.xlane.xlu0 %1570 }
 0x55a   : > { %3854 = vmatprep.subr.bf16.mxu0 %v3853_v46  ;;  %4197 = vrcp.f32 %v1571_v54  ;;  %v1595_v49 = vpop.xlane.xlu1 %1594  ;;  %v1671_v16 = vmul.f32 %v4194_v31, %v4965_v12 }
 0x55c   : > { %3548 = vmatprep.mubr.msk.f32.mxu0 %vm1340_vm3, %v1671_v16 }
 0x55d   : > { %3856 = vmatpush3.bf16.msra.mxu0 %v3853_v46 }
 0x55e   : > { %3549 = vmatmul.mubr.msk.f32.gmra.mrb[34].mxu0 %vm1340_vm3, %v1672_v36  ;;  %v1580_v29 = vpop.xlane.xlu1 %1579  ;;  %v1601_v40 = vpop.xlane.xlu0 %1600 }
 0x55f   : > { %4199 = vrcp.f32 %v1580_v29 }
 0x561   : > { %v4196_v47 = vpop.eup %4195 }
 0x562   : > { %v1604_v56 = vpop.xlane.xlu1 %1603  ;;  %v1674_v12 = vmul.f32 %v4196_v47, %v4980_v42 }
 0x564   : > { %v4198_v30 = vpop.eup %4197 }
 0x565   : > { %v5103_v0 = vpop.xlane.xlu0 %1615  ;;  %v1673_v1 = vmul.f32 %v4198_v30, %v4987_v57 }
 0x566   : > { %v1577_v39 = vpop.xlane.xlu1 %1576 }
 0x567   : > { %4201 = vrcp.f32 %v1577_v39  ;;  %3551 = vmatprep.mubr.msk.f32.mxu0 %vm1340_vm3, %v1673_v1 }
 0x568   : > { %3552 = vmatmul.mubr.msk.f32.gmra.mrb[36].mxu0 %vm1340_vm3, %v1674_v12 }
 0x569   : > { %v1613_v9 = vpop.xlane.xlu0 %1612  ;;  %v4200_v5 = vpop.eup %4199 }
 0x56a   : > { %v1610_v25 = vpop.xlane.xlu1 %1609  ;;  %v1676_v42 = vmul.f32 %v4200_v5, %v5000_v7 }
 0x56d   : > { %v4076_v33 = vpop.permute.xlu0 %4075 }
 0x56e   : > { %v4078_v3 = vunpack.i.h.bf16 %v4076_v33  ;;  %v4077_v58 = vunpack.i.l.bf16 %v4076_v33  ;;  %v1607_v62 = vpop.xlane.xlu1 %1606 }
 0x56f   : > { %4203 = vrcp.f32 %v1607_v62 }
 0x570   : > { %v3857_v32 = vpack.c.bf16 %v4078_v3, %v4077_v58  ;;  %4205 = vrcp.f32 %v5085_v20 }
 0x571   : > { %v4202_v11 = vpop.eup %4201  ;;  %v4081_v15 = vpop.permute.xlu0 %4080  ;;  %4207 = vrcp.f32 %v1589_v21 }
 0x572   : > { %v1622_v57 = vpop.xlane.xlu1 %1621  ;;  %3858 = vmatprep.subr.bf16.mxu0 %v3857_v32  ;;  %v1675_v61 = vmul.f32 %v4202_v11, %v5012_v37  ;;  %v4083_v27 = vunpack.i.h.bf16 %v4081_v15  ;;  %v4082_v41 = vunpack.i.l.bf16 %v4081_v15  ;;  %4209 = vrcp.f32 %v5087_v55 }
 0x573   : > { %3860 = vmatpush3.bf16.msra.mxu0 %v3857_v32  ;;  %4211 = vrcp.f32 %v1595_v49 }
 0x574   : > { %3554 = vmatprep.mubr.msk.f32.mxu0 %vm1340_vm3, %v1675_v61  ;;  %v3845_v28 = vpack.c.bf16 %v4083_v27, %v4082_v41  ;;  %4213 = vrcp.f32 %v5093_v50  ;;  %v2427_v27 = vld [vmem:[%s5433_s5] sm:$0xff]  ;;  %v2428_v41 = vld [vmem:[%s5433_s5 + $0x8] sm:$0xff] }
 0x575   : > { %3555 = vmatmul.mubr.msk.f32.gmra.mrb[38].mxu0 %vm1340_vm3, %v1676_v42  ;;  %4215 = vrcp.f32 %v1601_v40 }
 0x576   : > { %v1619_v26 = vpop.xlane.xlu1 %1618  ;;  %4217 = vrcp.f32 %v1604_v56 }
 0x577   : > { %4219 = vrcp.f32 %v1610_v25 }
 0x578   : > { %4221 = vrcp.f32 %v1613_v9 }
 0x579   : > { %v4204_v8 = vpop.eup %4203  ;;  %4223 = vrcp.f32 %v5103_v0 }
 0x57a   : > { %v4071_v18 = vpop.permute.xlu1 %4070  ;;  %v1685_v34 = vmul.f32 %v4204_v8, %v5030_v17  ;;  %v4206_v20 = vpop.eup %4205  ;;  %4225 = vrcp.f32 %v1619_v26 }
 0x57b   : > { %v4073_v51 = vunpack.i.h.bf16 %v4071_v18  ;;  %v4072_v37 = vunpack.i.l.bf16 %v4071_v18  ;;  %v4208_v21 = vpop.eup %4207  ;;  %v1678_v17 = vmul.f32 %v4206_v20, %v4945_v44  ;;  %4227 = vrcp.f32 %v1622_v57 }
 0x57c   : > { %3601 = vmatprep.mubr.msk.f32.mxu0 %vm1340_vm3, %v1685_v34  ;;  %v4210_v53 = vpop.eup %4209  ;;  %v1679_v55 = vmul.f32 %v4208_v21, %v4974_v2 }
 0x57d   : > { %v3841_v7 = vpack.c.bf16 %v4073_v51, %v4072_v37  ;;  %v4212_v14 = vpop.eup %4211  ;;  %v1680_v38 = vmul.f32 %v4210_v53, %v4967_v6  ;;  %v2429_v51 = vld [vmem:[%s5433_s5 + $0x10] sm:$0xff]  ;;  %v3865_v37 = vpack.c.bf16 %v2428_v41, %v2427_v27 }
 0x57e   : > { %v4214_v50 = vpop.eup %4213  ;;  %v1681_v45 = vmul.f32 %v4212_v14, %v4992_v48 }
 0x57f   : > { %3842 = vmatprep.subr.bf16.mxu1 %v3841_v7  ;;  %v4216_v13 = vpop.eup %4215  ;;  %v1682_v44 = vmul.f32 %v4214_v50, %v4982_v22 }
 0x580   : > { %3844 = vmatpush3.bf16.msra.mxu1 %v3841_v7  ;;  %v4218_v23 = vpop.eup %4217  ;;  %v1683_v2 = vmul.f32 %v4216_v13, %v5002_v35  ;;  %v2430_v7 = vld [vmem:[%s5433_s5 + $0x18] sm:$0xff] }
 0x581   : > { %3846 = vmatprep.subr.bf16.mxu1 %v3845_v28  ;;  %v1684_v24 = vmul.f32 %v4218_v23, %v5009_v10  ;;  %v4220_v54 = vpop.eup %4219 }
 0x582   : > { %v4222_v49 = vpop.eup %4221  ;;  %v1686_v10 = vmul.f32 %v4220_v54, %v5024_v43 }
 0x583   : > { %v4224_v16 = vpop.eup %4223  ;;  %v1687_v36 = vmul.f32 %v4222_v49, %v5020_v19 }
 0x584   : > { %3848 = vmatpush3.bf16.msra.mxu1 %v3845_v28  ;;  %v4226_v29 = vpop.eup %4225  ;;  %v1688_v40 = vmul.f32 %v4224_v16, %v5016_v63  ;;  %v3869_v28 = vpack.c.bf16 %v2430_v7, %v2429_v51 }
 0x585   : > { %v4228_v56 = vpop.eup %4227  ;;  %v1689_v47 = vmul.f32 %v4226_v29, %v5038_v60  ;;  %3866 = vmatprep.subr.bf16.mxu1 %v3865_v37 }
 0x586   : > { %v1690_v43 = vmul.f32 %v4228_v56, %v5034_v52 }
 0x587   : > { %3574 = vmatmul.mubr.msk.f32.vlgmr.msra.gmra.mrb[16].mxu1 %vm1340_vm3, %v1678_v17 }
 0x588   : > { %3576 = vmatprep.mubr.msk.f32.mxu1 %vm1340_vm3, %v1679_v55  ;;  %3868 = vmatpush3.bf16.msra.mxu1 %v3865_v37  ;;  %v4249_v37 = vld [vmem:[%s4349_s22 + $0x8] sm:$0xff] }
 0x589   : > { %3870 = vmatprep.subr.bf16.mxu1 %v3869_v28 }
 0x58b   : > { %3577 = vmatmul.mubr.msk.f32.gmra.mrb[18].mxu1 %vm1340_vm3, %v1680_v38 }
 0x58c   : > { %3579 = vmatprep.mubr.msk.f32.mxu1 %vm1340_vm3, %v1681_v45  ;;  %3872 = vmatpush3.bf16.msra.mxu1 %v3869_v28  ;;  %v4250_v28 = vld [vmem:[%s4349_s22] sm:$0xff] }
 0x58f   : > { %3580 = vmatmul.mubr.msk.f32.gmra.mrb[20].mxu1 %vm1340_vm3, %v1682_v44 }
 0x590   : > { %3582 = vmatprep.mubr.msk.f32.mxu1 %vm1340_vm3, %v1683_v2 }
 0x593   : > { %3583 = vmatmul.mubr.msk.f32.gmra.mrb[22].mxu1 %vm1340_vm3, %v1684_v24 }
 0x5a2   : > { %v1628_v6 = vpop.xlane.xlu0 %1627 }
 0x5a6   : > { %v1625_v48 = vpop.xlane.xlu0 %1624 }
 0x5a7   : > { %4229 = vrcp.f32 %v1625_v48 }
 0x5a8   : > { %4231 = vrcp.f32 %v1628_v6 }
 0x5aa   : > { %v4086_v46 = vpop.permute.xlu0 %4085 }
 0x5ab   : > { %v4088_v22 = vunpack.i.h.bf16 %v4086_v46  ;;  %v4087_v31 = vunpack.i.l.bf16 %v4086_v46 }
 0x5ad   : > { %v3861_v35 = vpack.c.bf16 %v4088_v22, %v4087_v31 }
 0x5af   : > { %3862 = vmatprep.subr.bf16.mxu0 %v3861_v35 }
 0x5b0   : > { %3864 = vmatpush3.bf16.msra.mxu0 %v3861_v35 }
 0x5b1   : > { %v4230_v30 = vpop.eup %4229 }
 0x5b2   : > { %v4232_v0 = vpop.eup %4231  ;;  %v1691_v19 = vmul.f32 %v4230_v30, %v5079_v4 }
 0x5b3   : > { %3602 = vmatmul.mubr.msk.f32.vlgmr.msra.gmra.mrb[40].mxu0 %vm1340_vm3, %v1686_v10  ;;  %v1692_v1 = vmul.f32 %v4232_v0, %v5075_v59 }
 0x5b4   : > { %3604 = vmatprep.mubr.msk.f32.mxu0 %vm1340_vm3, %v1687_v36 }
 0x5b7   : > { %3605 = vmatmul.mubr.msk.f32.gmra.mrb[42].mxu0 %vm1340_vm3, %v1688_v40 }
 0x5b8   : > { %3607 = vmatprep.mubr.msk.f32.mxu0 %vm1340_vm3, %v1689_v47 }
 0x5bb   : > { %3608 = vmatmul.mubr.msk.f32.gmra.mrb[44].mxu0 %vm1340_vm3, %v1690_v43 }
 0x5bc   : > { %3610 = vmatprep.mubr.msk.f32.mxu0 %vm1340_vm3, %v1691_v19 }
 0x5bf   : > { %3611 = vmatmul.mubr.msk.f32.gmra.mrb[46].mxu0 %vm1340_vm3, %v1692_v1 }
 0x5cf   : > { %v5147_v63 = vpop.f32.mrb[24].mxu0 }
 0x5d0   : > { %v5149_v60 = vpop.f32.mrb[25].mxu0 }
 0x5d7   : > { %v5151_v39 = vpop.f32.mrb[26].mxu0 }
 0x5d8   : > { %v5153_v12 = vpop.f32.mrb[27].mxu0 }
 0x5db   : > { %v5155_v52 = vpop.f32.mrb[28].mxu0 }
 0x5dc   : > { %v5157_v9 = vpop.f32.mrb[29].mxu0 }
 0x5e2   : > { %v5159_v4 = vpop.f32.mrb[30].mxu0 }
 0x5e3   : > { %v5161_v25 = vpop.f32.mrb[31].mxu0 }
 0x62b   : > { %v3547_v33 = vpop.f32.mrb[32].mxu0 }
 0x62c   : > { %2315 = vrot.lane.b32.xlu1 %v3547_v33, %s4270_s27  ;;  %v1960_v59 = vpop.f32.mrb[33].mxu0 }
 0x62d   : > { %2313 = vrot.lane.b32.xlu0 %v1960_v59, %s4270_s27 }
 0x631   : > { %v3550_v3 = vpop.f32.mrb[34].mxu0 }
 0x632   : > { %v1970_v58 = vpop.f32.mrb[35].mxu0 }
 0x63b   : > { %v3553_v62 = vpop.f32.mrb[36].mxu0 }
 0x63c   : > { %v1980_v5 = vpop.f32.mrb[37].mxu0 }
 0x648   : > { %v3556_v32 = vpop.f32.mrb[38].mxu0 }
 0x649   : > { %v1990_v11 = vpop.f32.mrb[39].mxu0 }
 0x65a   : > { %v3575_v57 = vpop.f32.mrb[16].mxu1 }
 0x65b   : > { %2347 = vrot.lane.b32.xlu1 %v3575_v57, %s4271_s28  ;;  %v2113_v61 = vpop.f32.mrb[17].mxu1 }
 0x65c   : > { %2345 = vrot.lane.b32.xlu0 %v2113_v61, %s4271_s28 }
 0x65e   : > { %v3578_v42 = vpop.f32.mrb[18].mxu1 }
 0x65f   : > { %2319 = vrot.lane.b32.xlu1 %v3550_v3, %s4270_s27  ;;  %v2123_v26 = vpop.f32.mrb[19].mxu1 }
 0x660   : > { %2317 = vrot.lane.b32.xlu0 %v1970_v58, %s4270_s27 }
 0x662   : > { %v3581_v15 = vpop.f32.mrb[20].mxu1 }
 0x663   : > { %2351 = vrot.lane.b32.xlu1 %v3578_v42, %s4271_s28  ;;  %v2133_v8 = vpop.f32.mrb[21].mxu1 }
 0x664   : > { %2349 = vrot.lane.b32.xlu0 %v2123_v26, %s4271_s28 }
 0x666   : > { %v3584_v18 = vpop.f32.mrb[22].mxu1 }
 0x667   : > { %2323 = vrot.lane.b32.xlu1 %v3553_v62, %s4270_s27  ;;  %v2143_v34 = vpop.f32.mrb[23].mxu1 }
 0x668   : > { %2321 = vrot.lane.b32.xlu0 %v1980_v5, %s4270_s27 }
 0x66b   : > { %2355 = vrot.lane.b32.xlu1 %v3581_v15, %s4271_s28 }
 0x66c   : > { %2353 = vrot.lane.b32.xlu0 %v2133_v8, %s4271_s28 }
 0x66f   : > { %2327 = vrot.lane.b32.xlu1 %v3556_v32, %s4270_s27 }
 0x670   : > { %2325 = vrot.lane.b32.xlu0 %v1990_v11, %s4270_s27 }
 0x673   : > { %2359 = vrot.lane.b32.xlu1 %v3584_v18, %s4271_s28 }
 0x674   : > { %2357 = vrot.lane.b32.xlu0 %v2143_v34, %s4271_s28 }
 0x686   : > { %v3603_v20 = vpop.f32.mrb[40].mxu0 }
 0x687   : > { %2379 = vrot.lane.b32.xlu1 %v3603_v20, %s4272_s21  ;;  %v2266_v21 = vpop.f32.mrb[41].mxu0 }
 0x688   : > { %2377 = vrot.lane.b32.xlu0 %v2266_v21, %s4272_s21 }
 0x68a   : > { %v3606_v17 = vpop.f32.mrb[42].mxu0 }
 0x68b   : > { %2383 = vrot.lane.b32.xlu1 %v3606_v17, %s4272_s21  ;;  %v2276_v53 = vpop.f32.mrb[43].mxu0 }
 0x68c   : > { %2381 = vrot.lane.b32.xlu0 %v2276_v53, %s4272_s21 }
 0x68e   : > { %v3609_v55 = vpop.f32.mrb[44].mxu0 }
 0x68f   : > { %2387 = vrot.lane.b32.xlu1 %v3609_v55, %s4272_s21  ;;  %v2286_v14 = vpop.f32.mrb[45].mxu0 }
 0x690   : > { %2385 = vrot.lane.b32.xlu0 %v2286_v14, %s4272_s21 }
 0x692   : > { %v3612_v38 = vpop.f32.mrb[46].mxu0 }
 0x693   : > { %2391 = vrot.lane.b32.xlu1 %v3612_v38, %s4272_s21  ;;  %v2296_v50 = vpop.f32.mrb[47].mxu0 }
 0x694   : > { %2389 = vrot.lane.b32.xlu0 %v2296_v50, %s4272_s21  ;;  %v4251_v50 = vld [vmem:[%s4349_s22 + $0x18] sm:$0xff] }
 0x69e   : > { %v2316_v45 = vpop.permute.xlu1 %2315 }
 0x69f   : > { %v2314_v13 = vpop.permute.xlu0 %2313  ;;  %v2402_v40 = vsel %vm743_vm1, %v5147_v63, %v2316_v45 }
 0x6a0   : > { %v2401_v36 = vsel %vm743_vm1, %v5149_v60, %v2314_v13 }
 0x6cd   : > { %v2348_v44 = vpop.permute.xlu1 %2347 }
 0x6ce   : > { %v2346_v23 = vpop.permute.xlu0 %2345  ;;  %v2411_v30 = vsel %vm2409_vm4, %v2402_v40, %v2348_v44  ;;  %v4255_v40 = vld [vmem:[%s4349_s22 + $0x38] sm:$0xff] }
 0x6cf   : > { %v2410_v56 = vsel %vm2409_vm4, %v2401_v36, %v2346_v23 }
 0x6d1   : > { %v2320_v2 = vpop.permute.xlu1 %2319 }
 0x6d2   : > { %v2318_v24 = vpop.permute.xlu0 %2317  ;;  %v2404_v63 = vsel %vm743_vm1, %v5151_v39, %v2320_v2 }
 0x6d3   : > { %v2403_v19 = vsel %vm743_vm1, %v5153_v12, %v2318_v24  ;;  %v4252_v24 = vld [vmem:[%s4349_s22 + $0x10] sm:$0xff] }
 0x6d5   : > { %v2352_v6 = vpop.permute.xlu1 %2351 }
 0x6d6   : > { %v2350_v48 = vpop.permute.xlu0 %2349  ;;  %v2413_v59 = vsel %vm2409_vm4, %v2404_v63, %v2352_v6 }
 0x6d7   : > { %v2412_v60 = vsel %vm2409_vm4, %v2403_v19, %v2350_v48 }
 0x6d9   : > { %v2324_v46 = vpop.permute.xlu1 %2323 }
 0x6da   : > { %v2322_v22 = vpop.permute.xlu0 %2321  ;;  %v2406_v39 = vsel %vm743_vm1, %v5155_v52, %v2324_v46  ;;  %v4253_v46 = vld [vmem:[%s4349_s22 + $0x28] sm:$0xff] }
 0x6db   : > { %v2405_v12 = vsel %vm743_vm1, %v5157_v9, %v2322_v22 }
 0x6dd   : > { %v2356_v31 = vpop.permute.xlu1 %2355 }
 0x6de   : > { %v2354_v35 = vpop.permute.xlu0 %2353  ;;  %v2415_v11 = vsel %vm2409_vm4, %v2406_v39, %v2356_v31 }
 0x6df   : > { %v2414_v5 = vsel %vm2409_vm4, %v2405_v12, %v2354_v35 }
 0x6e1   : > { %v2328_v54 = vpop.permute.xlu1 %2327 }
 0x6e2   : > { %v2326_v49 = vpop.permute.xlu0 %2325  ;;  %v2408_v52 = vsel %vm743_vm1, %v5159_v4, %v2328_v54 }
 0x6e3   : > { %v2407_v9 = vsel %vm743_vm1, %v5161_v25, %v2326_v49  ;;  %v3158_v25 = vld [vmem:[%s5434_s6] ss:$0 sm:$0xff] }
 0x6e5   : > { %v2360_v10 = vpop.permute.xlu1 %2359 }
 0x6e6   : > { %v2358_v16 = vpop.permute.xlu0 %2357  ;;  %v2417_v8 = vsel %vm2409_vm4, %v2408_v52, %v2360_v10  ;;  %v4254_v10 = vld [vmem:[%s4349_s22 + $0x20] sm:$0xff] }
 0x6e7   : > { %v2416_v26 = vsel %vm2409_vm4, %v2407_v9, %v2358_v16 }
 0x6f9   : > { %v2380_v29 = vpop.permute.xlu1 %2379 }
 0x6fa   : > { %v2378_v47 = vpop.permute.xlu0 %2377  ;;  %v2420_v0 = vsel %vm2418_vm5, %v2411_v30, %v2380_v29  ;;  %v4256_v30 = vld [vmem:[%s4349_s22 + $0x30] sm:$0xff] }
 0x6fb   : > { %v2419_v43 = vsel %vm2418_vm5, %v2410_v56, %v2378_v47 }
 0x6fc   : > { %3621 = vmatprep.mubr.msk.f32.mxu1 %vm395_vm0, %v2419_v43 }
 0x6fd   : > { %3622 = vmatmul.mubr.msk.f32.vlgmr.msra.gmra.mrb[24].mxu1 %vm395_vm0, %v2420_v0  ;;  %v2384_v1 = vpop.permute.xlu1 %2383 }
 0x6fe   : > { %v2382_v33 = vpop.permute.xlu0 %2381  ;;  %v2422_v58 = vsel %vm2418_vm5, %v2413_v59, %v2384_v1 }
 0x6ff   : > { %v2421_v3 = vsel %vm2418_vm5, %v2412_v60, %v2382_v33 }
 0x700   : > { %3624 = vmatprep.mubr.msk.f32.mxu1 %vm395_vm0, %v2421_v3 }
 0x701   : > { %3625 = vmatmul.mubr.msk.f32.gmra.mrb[26].mxu1 %vm395_vm0, %v2422_v58  ;;  %v2388_v62 = vpop.permute.xlu1 %2387 }
 0x702   : > { %v2386_v32 = vpop.permute.xlu0 %2385  ;;  %v2424_v61 = vsel %vm2418_vm5, %v2415_v11, %v2388_v62 }
 0x703   : > { %v2423_v57 = vsel %vm2418_vm5, %v2414_v5, %v2386_v32 }
 0x704   : > { %3627 = vmatprep.mubr.msk.f32.mxu1 %vm395_vm0, %v2423_v57 }
 0x705   : > { %3628 = vmatmul.mubr.msk.f32.gmra.mrb[28].mxu1 %vm395_vm0, %v2424_v61  ;;  %v2392_v42 = vpop.permute.xlu1 %2391 }
 0x706   : > { %v2390_v15 = vpop.permute.xlu0 %2389  ;;  %v2426_v34 = vsel %vm2418_vm5, %v2417_v8, %v2392_v42 }
 0x707   : > { %v2425_v18 = vsel %vm2418_vm5, %v2416_v26, %v2390_v15 }
 0x708   : > { %3630 = vmatprep.mubr.msk.f32.mxu1 %vm395_vm0, %v2425_v18 }
 0x709   : > { %3631 = vmatmul.mubr.msk.f32.gmra.mrb[30].mxu1 %vm395_vm0, %v2426_v34 }
 0x7d0   : > { %v3623_v27 = vpop.f32.mrb[24].mxu1 }
 0x7d1   : > { %v2534_v4 = vadd.f32 %v3623_v27, %v3158_v25  ;;  %v2528_v41 = vpop.f32.mrb[25].mxu1 }
 0x7d2   : > { %v2529_v51 = vadd.f32 %v3158_v25, %v2528_v41 }
 0x7d3   : > { %v5235_v7 = vadd.f32 %v4249_v37, %v2534_v4 }
 0x7d4   : > { %v5238_v20 = vadd.f32 %v4250_v28, %v2529_v51  ;;  %v3626_v21 = vpop.f32.mrb[26].mxu1 }
 0x7d5   : > { %v2544_v17 = vadd.f32 %v3626_v21, %v3158_v25  ;;  %v2538_v53 = vpop.f32.mrb[27].mxu1  ;;  %v2578_v55 = vsel %vm395_vm0, %v5235_v7, 0.0 }
 0x7d6   : > { %v2539_v14 = vadd.f32 %v3158_v25, %v2538_v53  ;;  %2579 = vadd.xlane.f32.xlu1 %v2578_v55  ;;  %v2575_v38 = vsel %vm395_vm0, %v5238_v20, 0.0 }
 0x7d7   : > { %v5245_v45 = vadd.f32 %v4251_v50, %v2544_v17  ;;  %2576 = vadd.xlane.f32.xlu0 %v2575_v38 }
 0x7d8   : > { %v3629_v13 = vpop.f32.mrb[28].mxu1  ;;  %v5250_v6 = vadd.f32 %v4252_v24, %v2539_v14  ;;  %v2710_v24 = vld [vmem:[%s5437_s9 + $0x8] sm:$0xff] }
 0x7d9   : > { %v2554_v44 = vadd.f32 %v3629_v13, %v3158_v25  ;;  %v2548_v23 = vpop.f32.mrb[29].mxu1  ;;  %v2584_v2 = vsel %vm395_vm0, %v5245_v45, 0.0 }
 0x7da   : > { %v2549_v48 = vadd.f32 %v3158_v25, %v2548_v23  ;;  %v2581_v29 = vsel %vm395_vm0, %v5250_v6, 0.0 }
 0x7db   : > { %v5253_v22 = vadd.f32 %v4253_v46, %v2554_v44  ;;  %2585 = vadd.xlane.f32.xlu0 %v2584_v2  ;;  %v2709_v2 = vld [vmem:[%s5437_s9] sm:$0xff]  ;;  %v2711_v46 = vld [vmem:[%s5437_s9 + $0x10] sm:$0xff] }
 0x7dc   : > { %v3632_v31 = vpop.f32.mrb[30].mxu1  ;;  %v5258_v16 = vadd.f32 %v4254_v10, %v2549_v48  ;;  %v3873_v48 = vpack.c.bf16 %v2710_v24, %v2709_v2  ;;  %v2852_v10 = vld [vmem:[%s5438_s10 + $0x10] sm:$0xff] }
 0x7dd   : > { %v2564_v35 = vadd.f32 %v3632_v31, %v3158_v25  ;;  %v2558_v54 = vpop.f32.mrb[31].mxu1  ;;  %v2590_v49 = vsel %vm395_vm0, %v5253_v22, 0.0  ;;  %v2712_v31 = vld [vmem:[%s5437_s9 + $0x18] sm:$0xff] }
 0x7de   : > { %v2559_v36 = vadd.f32 %v3158_v25, %v2558_v54  ;;  %2591 = vadd.xlane.f32.xlu1 %v2590_v49  ;;  %v2587_v0 = vsel %vm395_vm0, %v5258_v16, 0.0  ;;  %3874 = vmatprep.subr.bf16.mxu0 %v3873_v48  ;;  %v2850_v54 = vld [vmem:[%s5438_s10] sm:$0xff]  ;;  %v2851_v49 = vld [vmem:[%s5438_s10 + $0x8] sm:$0xff] }
 0x7df   : > { %v5263_v56 = vadd.f32 %v4255_v40, %v2564_v35  ;;  %2582 = vadd.xlane.f32.xlu0 %v2581_v29  ;;  %3876 = vmatpush3.bf16.msra.mxu0 %v3873_v48  ;;  %v3877_v35 = vpack.c.bf16 %v2712_v31, %v2711_v46  ;;  %v2853_v29 = vld [vmem:[%s5438_s10 + $0x18] sm:$0xff] }
 0x7e0   : > { %v5268_v43 = vadd.f32 %v4256_v30, %v2559_v36  ;;  %v3881_v36 = vpack.c.bf16 %v2851_v49, %v2850_v54  ;;  %v3885_v40 = vpack.c.bf16 %v2853_v29, %v2852_v10  ;;  %v2855_v30 = vld [vmem:[%s5438_s10 + $0x28] sm:$0xff]  ;;  %v3168_v54 = vld [vmem:[%s5436_s8] ss:$0 sm:$0xff] }
 0x7e1   : > { %v2596_v47 = vsel %vm395_vm0, %v5263_v56, 0.0  ;;  %3878 = vmatprep.subr.bf16.mxu0 %v3877_v35 }
 0x7e2   : > { %2597 = vadd.xlane.f32.xlu1 %v2596_v47  ;;  %v2593_v19 = vsel %vm395_vm0, %v5268_v43, 0.0  ;;  %v2854_v47 = vld [vmem:[%s5438_s10 + $0x20] sm:$0xff]  ;;  %3882 = vmatprep.subr.bf16.mxu1 %v3881_v36 }
 0x7e3   : > { %2588 = vadd.xlane.f32.xlu0 %v2587_v0  ;;  %3880 = vmatpush3.bf16.msra.mxu0 %v3877_v35  ;;  %v3889_v0 = vpack.c.bf16 %v2855_v30, %v2854_v47 }
 0x7e4   : > { %3884 = vmatpush3.bf16.msra.mxu1 %v3881_v36 }
 0x7e5   : > { %3886 = vmatprep.subr.bf16.mxu1 %v3885_v40 }
 0x7e7   : > { %2594 = vadd.xlane.f32.xlu0 %v2593_v19  ;;  %v2856_v19 = vld [vmem:[%s5438_s10 + $0x30] sm:$0xff] }
 0x7e8   : > { %3888 = vmatpush3.bf16.msra.mxu1 %v3885_v40 }
 0x7e9   : > { %3890 = vmatprep.subr.bf16.mxu1 %v3889_v0 }
 0x7ec   : > { %3892 = vmatpush3.bf16.msra.mxu1 %v3889_v0 }
 0x863   : > { %v2580_v1 = vpop.xlane.xlu1 %2579 }
 0x864   : > { %v2600_v63 = vmul.f32 0.03125, %v2580_v1  ;;  %v2577_v60 = vpop.xlane.xlu0 %2576  ;;  %v2857_v1 = vld [vmem:[%s5438_s10 + $0x38] sm:$0xff] }
 0x865   : > { %v2599_v33 = vmul.f32 0.03125, %v2577_v60  ;;  %v2858_v60 = vld [vmem:[%s5438_s10 + $0x40] sm:$0xff] }
 0x866   : > { %v5275_v59 = vsub.f32 %v5235_v7, %v2600_v63  ;;  %v3893_v63 = vpack.c.bf16 %v2857_v1, %v2856_v19 }
 0x867   : > { %v5278_v3 = vsub.f32 %v5238_v20, %v2599_v33  ;;  %v2859_v33 = vld [vmem:[%s5438_s10 + $0x48] sm:$0xff] }
 0x868   : > { %v2586_v58 = vpop.xlane.xlu0 %2585  ;;  %v2616_v12 = vmul.f32 %v5275_v59, %v5275_v59  ;;  %3894 = vmatprep.subr.bf16.mxu1 %v3893_v63 }
 0x869   : > { %v2602_v62 = vmul.f32 0.03125, %v2586_v58  ;;  %v2615_v39 = vmul.f32 %v5278_v3, %v5278_v3  ;;  %v3897_v58 = vpack.c.bf16 %v2859_v33, %v2858_v60  ;;  %3896 = vmatpush3.bf16.msra.mxu1 %v3893_v63 }
 0x86a   : > { %v2626_v5 = vsel %vm395_vm0, %v2616_v12, 0.0  ;;  %v2860_v12 = vld [vmem:[%s5438_s10 + $0x50] sm:$0xff] }
 0x86b   : > { %v5286_v32 = vsub.f32 %v5245_v45, %v2602_v62  ;;  %v2592_v11 = vpop.xlane.xlu1 %2591  ;;  %2627 = vadd.xlane.f32.xlu1 %v2626_v5  ;;  %v2623_v57 = vsel %vm395_vm0, %v2615_v39, 0.0  ;;  %v2861_v62 = vld [vmem:[%s5438_s10 + $0x58] sm:$0xff]  ;;  %3898 = vmatprep.subr.bf16.mxu1 %v3897_v58  ;;  %v2862_v5 = vld [vmem:[%s5438_s10 + $0x60] sm:$0xff] }
 0x86c   : > { %v2604_v61 = vmul.f32 0.03125, %v2592_v11  ;;  %2624 = vadd.xlane.f32.xlu0 %v2623_v57  ;;  %v2583_v9 = vpop.xlane.xlu0 %2582  ;;  %v3901_v39 = vpack.c.bf16 %v2861_v62, %v2860_v12  ;;  %v2863_v11 = vld [vmem:[%s5438_s10 + $0x68] sm:$0xff] }
 0x86d   : > { %v2601_v42 = vmul.f32 0.03125, %v2583_v9  ;;  %v2618_v52 = vmul.f32 %v5286_v32, %v5286_v32  ;;  %3900 = vmatpush3.bf16.msra.mxu1 %v3897_v58  ;;  %v3905_v57 = vpack.c.bf16 %v2863_v11, %v2862_v5 }
 0x86e   : > { %v5292_v26 = vsub.f32 %v5253_v22, %v2604_v61  ;;  %3902 = vmatprep.subr.bf16.mxu1 %v3901_v39 }
 0x86f   : > { %v5295_v15 = vsub.f32 %v5250_v6, %v2601_v42  ;;  %v2598_v8 = vpop.xlane.xlu1 %2597  ;;  %v2632_v18 = vsel %vm395_vm0, %v2618_v52, 0.0 }
 0x870   : > { %v2606_v34 = vmul.f32 0.03125, %v2598_v8  ;;  %2633 = vadd.xlane.f32.xlu1 %v2632_v18  ;;  %v2589_v25 = vpop.xlane.xlu0 %2588  ;;  %v2620_v27 = vmul.f32 %v5292_v26, %v5292_v26 }
 0x871   : > { %v2603_v4 = vmul.f32 0.03125, %v2589_v25  ;;  %v2617_v41 = vmul.f32 %v5295_v15, %v5295_v15  ;;  %3904 = vmatpush3.bf16.msra.mxu1 %v3901_v39 }
 0x872   : > { %v5303_v51 = vsub.f32 %v5263_v56, %v2606_v34  ;;  %v2638_v37 = vsel %vm395_vm0, %v2620_v27, 0.0  ;;  %3906 = vmatprep.subr.bf16.mxu1 %v3905_v57 }
 0x873   : > { %v5307_v28 = vsub.f32 %v5258_v16, %v2603_v4  ;;  %v2629_v21 = vsel %vm395_vm0, %v2617_v41, 0.0 }
 0x874   : > { %2639 = vadd.xlane.f32.xlu1 %v2638_v37  ;;  %2630 = vadd.xlane.f32.xlu0 %v2629_v21  ;;  %v2595_v17 = vpop.xlane.xlu0 %2594  ;;  %v2622_v53 = vmul.f32 %v5303_v51, %v5303_v51 }
 0x875   : > { %v2605_v55 = vmul.f32 0.03125, %v2595_v17  ;;  %v2619_v14 = vmul.f32 %v5307_v28, %v5307_v28  ;;  %3908 = vmatpush3.bf16.msra.mxu1 %v3905_v57 }
 0x876   : > { %v2644_v38 = vsel %vm395_vm0, %v2622_v53, 0.0 }
 0x877   : > { %v5316_v50 = vsub.f32 %v5268_v43, %v2605_v55  ;;  %v2635_v13 = vsel %vm395_vm0, %v2619_v14, 0.0 }
 0x878   : > { %2645 = vadd.xlane.f32.xlu1 %v2644_v38  ;;  %2636 = vadd.xlane.f32.xlu0 %v2635_v13 }
 0x879   : > { %v2621_v44 = vmul.f32 %v5316_v50, %v5316_v50 }
 0x87b   : > { %v2641_v23 = vsel %vm395_vm0, %v2621_v44, 0.0 }
 0x87c   : > { %2642 = vadd.xlane.f32.xlu0 %v2641_v23  ;;  %v3167_v23 = vld [vmem:[%s5435_s7] ss:$0 sm:$0xff] }
 0x8f8   : > { %v2628_v61 = vpop.xlane.xlu1 %2627 }
 0x8f9   : > { %v2648_v9 = vmul.f32 0.03125, %v2628_v61  ;;  %v2625_v42 = vpop.xlane.xlu0 %2624 }
 0x8fa   : > { %v2647_v52 = vmul.f32 0.03125, %v2625_v42 }
 0x8fb   : > { %v2656_v8 = vadd.f32 1e-05, %v2648_v9 }
 0x8fc   : > { %v2655_v18 = vadd.f32 1e-05, %v2647_v52  ;;  %v2864_v52 = vld [vmem:[%s5438_s10 + $0x70] sm:$0xff] }
 0x8fd   : > { %4233 = vrsqrt.f32 %v2656_v8  ;;  %v2634_v34 = vpop.xlane.xlu1 %2633 }
 0x8fe   : > { %4235 = vrsqrt.f32 %v2655_v18  ;;  %v2650_v25 = vmul.f32 0.03125, %v2634_v34 }
 0x900   : > { %v2658_v27 = vadd.f32 1e-05, %v2650_v25 }
 0x901   : > { %v2640_v4 = vpop.xlane.xlu1 %2639  ;;  %v2631_v41 = vpop.xlane.xlu0 %2630 }
 0x902   : > { %4237 = vrsqrt.f32 %v2658_v27  ;;  %v2652_v37 = vmul.f32 0.03125, %v2640_v4  ;;  %v2649_v21 = vmul.f32 0.03125, %v2631_v41 }
 0x904   : > { %v2660_v17 = vadd.f32 1e-05, %v2652_v37  ;;  %v2657_v53 = vadd.f32 1e-05, %v2649_v21 }
 0x905   : > { %v2646_v55 = vpop.xlane.xlu1 %2645  ;;  %v2637_v14 = vpop.xlane.xlu0 %2636 }
 0x906   : > { %4239 = vrsqrt.f32 %v2660_v17  ;;  %v2654_v38 = vmul.f32 0.03125, %v2646_v55  ;;  %v2651_v13 = vmul.f32 0.03125, %v2637_v14 }
 0x907   : > { %v4234_v44 = vpop.eup %4233  ;;  %4241 = vrsqrt.f32 %v2657_v53 }
 0x908   : > { %v4236_v2 = vpop.eup %4235  ;;  %v2672_v24 = vmul.f32 %v4234_v44, %v5275_v59  ;;  %v2662_v48 = vadd.f32 1e-05, %v2654_v38  ;;  %v2659_v46 = vadd.f32 1e-05, %v2651_v13 }
 0x909   : > { %v2643_v31 = vpop.xlane.xlu0 %2642  ;;  %v2671_v35 = vmul.f32 %v4236_v2, %v5278_v3 }
 0x90a   : > { %v2687_v49 = vmul.f32 %v3167_v23, %v2672_v24  ;;  %4243 = vrsqrt.f32 %v2662_v48  ;;  %v2653_v10 = vmul.f32 0.03125, %v2643_v31 }
 0x90b   : > { %4245 = vrsqrt.f32 %v2659_v46  ;;  %v2686_v36 = vmul.f32 %v3167_v23, %v2671_v35 }
 0x90c   : > { %v4238_v29 = vpop.eup %4237  ;;  %v2661_v40 = vadd.f32 1e-05, %v2653_v10  ;;  %v2702_v30 = vadd.f32 %v3168_v54, %v2687_v49 }
 0x90d   : > { %v2701_v47 = vadd.f32 %v3168_v54, %v2686_v36  ;;  %v2674_v59 = vmul.f32 %v4238_v29, %v5286_v32 }
 0x90e   : > { %4247 = vrsqrt.f32 %v2661_v40 }
 0x90f   : > { %3641 = vmatprep.mubr.msk.f32.mxu0 %vm395_vm0, %v2701_v47  ;;  %v2689_v1 = vmul.f32 %v3167_v23, %v2674_v59 }
 0x910   : > { %v4240_v0 = vpop.eup %4239  ;;  %3642 = vmatmul.mubr.msk.f32.vlgmr.msra.gmra.mrb[48].mxu0 %vm395_vm0, %v2702_v30 }
 0x911   : > { %v4242_v3 = vpop.eup %4241  ;;  %v2676_v63 = vmul.f32 %v4240_v0, %v5292_v26  ;;  %v2704_v39 = vadd.f32 %v3168_v54, %v2689_v1 }
 0x912   : > { %v2673_v19 = vmul.f32 %v4242_v3, %v5295_v15 }
 0x913   : > { %v2691_v5 = vmul.f32 %v3167_v23, %v2676_v63 }
 0x914   : > { %v4244_v60 = vpop.eup %4243  ;;  %v2688_v33 = vmul.f32 %v3167_v23, %v2673_v19 }
 0x915   : > { %v4246_v58 = vpop.eup %4245  ;;  %v2678_v11 = vmul.f32 %v4244_v60, %v5303_v51  ;;  %v2706_v26 = vadd.f32 %v3168_v54, %v2691_v5 }
 0x916   : > { %v2703_v12 = vadd.f32 %v3168_v54, %v2688_v33  ;;  %v2675_v62 = vmul.f32 %v4246_v58, %v5307_v28 }
 0x917   : > { %v2693_v42 = vmul.f32 %v3167_v23, %v2678_v11 }
 0x918   : > { %v4248_v32 = vpop.eup %4247  ;;  %3644 = vmatprep.mubr.msk.f32.mxu0 %vm395_vm0, %v2703_v12  ;;  %v2690_v57 = vmul.f32 %v3167_v23, %v2675_v62 }
 0x919   : > { %3645 = vmatmul.mubr.msk.f32.gmra.mrb[50].mxu0 %vm395_vm0, %v2704_v39  ;;  %v2677_v15 = vmul.f32 %v4248_v32, %v5316_v50  ;;  %v2708_v51 = vadd.f32 %v3168_v54, %v2693_v42  ;;  %v2865_v50 = vld [vmem:[%s5438_s10 + $0x78] sm:$0xff] }
 0x91a   : > { %v2705_v61 = vadd.f32 %v3168_v54, %v2690_v57  ;;  %v3909_v8 = vpack.c.bf16 %v2865_v50, %v2864_v52 }
 0x91b   : > { %v2692_v9 = vmul.f32 %v3167_v23, %v2677_v15 }
 0x91c   : > { %3647 = vmatprep.mubr.msk.f32.mxu0 %vm395_vm0, %v2705_v61  ;;  %3910 = vmatprep.subr.bf16.mxu1 %v3909_v8 }
 0x91d   : > { %3648 = vmatmul.mubr.msk.f32.gmra.mrb[52].mxu0 %vm395_vm0, %v2706_v26  ;;  %v2707_v28 = vadd.f32 %v3168_v54, %v2692_v9  ;;  %3912 = vmatpush3.bf16.msra.mxu1 %v3909_v8 }
 0x91f   : > { %3650 = vmatprep.mubr.msk.f32.mxu0 %vm395_vm0, %v2707_v28 }
 0x921   : > { %3651 = vmatmul.mubr.msk.f32.gmra.mrb[54].mxu0 %vm395_vm0, %v2708_v51 }
 0x9e3   : > { %v3643_v18 = vpop.f32.mrb[48].mxu0 }
 0x9e4   : > { %v2803_v34 = vpop.f32.mrb[49].mxu0  ;;  %v2843_v27 = vmax.f32 %v3643_v18, 0.0 }
 0x9e5   : > { %v2842_v25 = vmax.f32 %v2803_v34, 0.0 }
 0x9e7   : > { %3685 = vmatprep.mubr.f32.mxu1 %v2842_v25 }
 0x9e8   : > { %3686 = vmatmul.mubr.f32.vlgmr.msra.gmra.mrb[32].mxu1 %v2843_v27 }
 0x9ec   : > { %v3646_v4 = vpop.f32.mrb[50].mxu0 }
 0x9ed   : > { %v2813_v41 = vpop.f32.mrb[51].mxu0  ;;  %v2845_v21 = vmax.f32 %v3646_v4, 0.0 }
 0x9ee   : > { %v2844_v37 = vmax.f32 %v2813_v41, 0.0 }
 0x9f0   : > { %v3649_v17 = vpop.f32.mrb[52].mxu0  ;;  %3688 = vmatprep.mubr.f32.mxu1 %v2844_v37 }
 0x9f1   : > { %v2823_v53 = vpop.f32.mrb[53].mxu0  ;;  %3689 = vmatmul.mubr.f32.gmra.mrb[34].mxu1 %v2845_v21  ;;  %v2847_v14 = vmax.f32 %v3649_v17, 0.0 }
 0x9f2   : > { %v2846_v55 = vmax.f32 %v2823_v53, 0.0 }
 0x9f4   : > { %v3652_v38 = vpop.f32.mrb[54].mxu0  ;;  %3691 = vmatprep.mubr.f32.mxu1 %v2846_v55 }
 0x9f5   : > { %v2833_v13 = vpop.f32.mrb[55].mxu0  ;;  %3692 = vmatmul.mubr.f32.gmra.mrb[36].mxu1 %v2847_v14  ;;  %v2849_v23 = vmax.f32 %v3652_v38, 0.0 }
 0x9f6   : > { %v2848_v44 = vmax.f32 %v2833_v13, 0.0 }
 0x9f8   : > { %3694 = vmatprep.mubr.f32.mxu1 %v2848_v44 }
 0x9f9   : > { %3695 = vmatmul.mubr.f32.gmra.mrb[38].mxu1 %v2849_v23 }
 0xabb   : > { %v3687_v2 = vpop.f32.mrb[32].mxu1 }
 0xabc   : > { %v2972_v24 = vadd.f32 %v3687_v2, %v5235_v7  ;;  %v2932_v48 = vpop.f32.mrb[33].mxu1 }
 0xabd   : > { %v2971_v46 = vadd.f32 %v2932_v48, %v5238_v20 }
 0xabe   : > { %2980 = vst.msk [vmem:[%s386_s23 + $0x8] sm:$0xff] %vm395_vm0, %v2972_v24 }
 0xabf   : > { %2979 = vst.msk [vmem:[%s386_s23] sm:$0xff] %vm395_vm0, %v2971_v46 }
 0xac4   : > { %v3690_v31 = vpop.f32.mrb[34].mxu1 }
 0xac5   : > { %v2974_v35 = vadd.f32 %v3690_v31, %v5245_v45  ;;  %v2942_v54 = vpop.f32.mrb[35].mxu1 }
 0xac6   : > { %v2973_v49 = vadd.f32 %v2942_v54, %v5250_v6 }
 0xac7   : > { %2982 = vst.msk [vmem:[%s386_s23 + $0x18] sm:$0xff] %vm395_vm0, %v2974_v35 }
 0xac8   : > { %2981 = vst.msk [vmem:[%s386_s23 + $0x10] sm:$0xff] %vm395_vm0, %v2973_v49  ;;  %v3693_v10 = vpop.f32.mrb[36].mxu1 }
 0xac9   : > { %v2976_v7 = vadd.f32 %v3693_v10, %v5253_v22  ;;  %v2952_v36 = vpop.f32.mrb[37].mxu1 }
 0xaca   : > { %v2975_v20 = vadd.f32 %v2952_v36, %v5258_v16 }
 0xacb   : > { %2984 = vst.msk [vmem:[%s386_s23 + $0x28] sm:$0xff] %vm395_vm0, %v2976_v7 }
 0xacc   : > { %2983 = vst.msk [vmem:[%s386_s23 + $0x20] sm:$0xff] %vm395_vm0, %v2975_v20  ;;  %v3696_v29 = vpop.f32.mrb[38].mxu1 }
 0xacd   : > { %v2978_v45 = vadd.f32 %v3696_v29, %v5263_v56  ;;  %v2962_v40 = vpop.f32.mrb[39].mxu1 }
 0xace   : > { %v2977_v6 = vadd.f32 %v2962_v40, %v5268_v43 }
 0xacf   : > { %2986 = vst.msk [vmem:[%s386_s23 + $0x38] sm:$0xff] %vm395_vm0, %v2978_v45 }
 0xad0   : > { %2985 = vst.msk [vmem:[%s386_s23 + $0x30] sm:$0xff] %vm395_vm0, %v2977_v6 }
 0xad1 PF: > { %s21_s17 = sadd.s32 1, %s4263_s17  }
 0xad2   : > { %p18_p4 = scmp.ge.s32.totalorder %s21_s17, 4  }
 0xad4   :  { %20 = sbr.rel (!%p18_p4) target bundleno = 1 (0x1), region = 94 }

// kernel: transformer_block_forward.5
= control target key start
LH: loop header
LB: loop body
LE: loop exit
PB: predicated region body
PF: predicated region fallthrough
CT: control target
= control target key end

     0   :  { %s4362_s17 = smov 0   ;;  %s5450_s0 = inlined_call_operand.vmem [shape: f32[2,64,32], index: 0, kind: input, shape index: {}]   ;;  %s5451_s1 = inlined_call_operand.vmem [shape: f32[1,32], index: 1, kind: input, shape index: {}]   ;;  %s5452_s2 = inlined_call_operand.vmem [shape: f32[1,32], index: 2, kind: input, shape index: {}]   ;;  %s5453_s3 = inlined_call_operand.vmem [shape: f32[32,96], index: 3, kind: input, shape index: {}]   ;;  %s5454_s4 = inlined_call_operand.vmem [shape: f32[1,96], index: 4, kind: input, shape index: {}]   ;;  %s5455_s5 = inlined_call_operand.vmem [shape: f32[32,32], index: 5, kind: input, shape index: {}]   ;;  %s5456_s6 = inlined_call_operand.vmem [shape: f32[1,32], index: 6, kind: input, shape index: {}]   ;;  %s5457_s7 = inlined_call_operand.vmem [shape: f32[1,32], index: 7, kind: input, shape index: {}]   ;;  %s5458_s8 = inlined_call_operand.vmem [shape: f32[1,32], index: 8, kind: input, shape index: {}]   ;;  %s5459_s9 = inlined_call_operand.vmem [shape: f32[32,128], index: 9, kind: input, shape index: {}]   ;;  %s5460_s10 = inlined_call_operand.vmem [shape: f32[128,32], index: 10, kind: input, shape index: {}]   ;;  %s5461_s11 = inlined_call_operand.vmem [shape: f32[2,32,64], index: 11, kind: output, shape index: {}]  }
   0x1 LB: > { %s3070_s18 = sadd.s32 4294967295, %s4292_s17   ;;  %p3074_p0 = scmp.ge.s32.totalorder %s4292_s17, 1  ;;  %s4292_s17 = sphi %s4362_s17, %s21_s17  }
   0x2   : > { %p337_p1 = scmp.lt.s32.totalorder %s4292_s17, 3 }
   0x4   : > { %p338_p2 = pnand %p3074_p0, %p337_p1 }
   0x5   : > { %p377_p3 = scmp.lt.s32.totalorder (!%p338_p2), %s3070_s18, 1  ;;  %vm395_vm0 = vcmask (!%p338_p2), 261120   ;;  %v531_v56 = vld [vmem:[%s5453_s3] sm:$0xff] (!%p338_p2)  ;;  %v532_v57 = vld [vmem:[%s5453_s3 + $0x8] sm:$0xff] (!%p338_p2)  ;;  %v533_v59 = vld [vmem:[%s5453_s3 + $0x10] sm:$0xff] (!%p338_p2)  ;;  %vm743_vm1 = vcmask (!%p338_p2), 64512  }
   0x6   : > { %341 = sbr.rel (%p338_p2) target bundleno = 2894 (0xb4e), region = 64  ;;  %v3725_v58 = vpack.c.bf16 (!%p338_p2), %v532_v57, %v531_v56  ;;  %v534_v60 = vld [vmem:[%s5453_s3 + $0x18] sm:$0xff] (!%p338_p2)  ;;  %s4294_s20 = smov (!%p338_p2), 120   ;;  %vm4630_vm2 = vmpackc.low (!%p338_p2), %vm743_vm1, %vm743_vm1  ;;  %vm1340_vm3 = vcmask (!%p338_p2), 523264   ;;  %vm2409_vm4 = vcmask (!%p338_p2), 130048   ;;  %vm2418_vm5 = vcmask (!%p338_p2), 195584  }
   0x7   : > { %v3729_v61 = vpack.c.bf16 (!%p338_p2), %v534_v60, %v533_v59  ;;  %s4295_s21 = smov (!%p338_p2), 112   ;;  %s4296_s23 = smov (!%p338_p2), 104  }
   0x8   : > { %3726 = vmatprep.subr.bf16.mxu0 (!%p338_p2), %v3725_v58  ;;  %s4297_s24 = smov (!%p338_p2), 96   ;;  %s4298_s25 = smov (!%p338_p2), 64  }
   0x9   : > { %3728 = vmatpush3.bf16.msra.mxu0 (!%p338_p2), %v3725_v58  ;;  %s4299_s26 = smov (!%p338_p2), 8   ;;  %s4300_s27 = smov (!%p338_p2), 16  }
   0xa   : > { %3730 = vmatprep.subr.bf16.mxu0 (!%p338_p2), %v3729_v61 }
   0xd   : > { %s5465_s18 = smov (!%p377_p3, %s3070_s18), 1  ;;  %3732 = vmatpush3.bf16.msra.mxu0 %v3729_v61 }
   0xe   : > { %s3207_s19 = sshll.u32 %s5465_s18, 6  ;;  %s3208_s13 = sshll.u32 %s5465_s18, 5 }
   0xf   : > { %s4376_s22 = scalar_lea.vmem %s5450_s0, %s3207_s19  ;;  %s4301_s19 = smov 24  }
  0x10   : > { %v387_v0 = vld [vmem:[%s4376_s22] sm:$0xff]  ;;  %v389_v1 = vld [vmem:[%s4376_s22 + $0x10] sm:$0xff]  ;;  %v388_v2 = vld [vmem:[%s4376_s22 + $0x8] sm:$0xff]  ;;  %s386_s16 = scalar_lea.vmem %s5461_s11, %s3208_s13 }
  0x11   : > { %v396_v3 = vsel %vm395_vm0, %v387_v0, 0.0  ;;  %v402_v4 = vsel %vm395_vm0, %v389_v1, 0.0  ;;  %v390_v5 = vld [vmem:[%s4376_s22 + $0x18] sm:$0xff]  ;;  %v399_v6 = vsel %vm395_vm0, %v388_v2, 0.0  ;;  %v391_v8 = vld [vmem:[%s4376_s22 + $0x20] sm:$0xff]  ;;  %v392_v9 = vld [vmem:[%s4376_s22 + $0x28] sm:$0xff] }
  0x12   : > { %397 = vadd.xlane.f32.xlu0 %v396_v3  ;;  %403 = vadd.xlane.f32.xlu1 %v402_v4  ;;  %v405_v7 = vsel %vm395_vm0, %v390_v5, 0.0  ;;  %v408_v10 = vsel %vm395_vm0, %v391_v8, 0.0  ;;  %v411_v11 = vsel %vm395_vm0, %v392_v9, 0.0  ;;  %v393_v12 = vld [vmem:[%s4376_s22 + $0x30] sm:$0xff]  ;;  %v394_v13 = vld [vmem:[%s4376_s22 + $0x38] sm:$0xff] }
  0x13   : > { %v414_v14 = vsel %vm395_vm0, %v393_v12, 0.0  ;;  %v417_v15 = vsel %vm395_vm0, %v394_v13, 0.0 }
  0x16   : > { %400 = vadd.xlane.f32.xlu0 %v399_v6  ;;  %406 = vadd.xlane.f32.xlu1 %v405_v7 }
  0x1a   : > { %409 = vadd.xlane.f32.xlu0 %v408_v10  ;;  %412 = vadd.xlane.f32.xlu1 %v411_v11 }
  0x1e   : > { %415 = vadd.xlane.f32.xlu0 %v414_v14  ;;  %418 = vadd.xlane.f32.xlu1 %v417_v15 }
  0x9f   : > { %v398_v16 = vpop.xlane.xlu0 %397  ;;  %v404_v17 = vpop.xlane.xlu1 %403 }
  0xa0   : > { %v421_v18 = vmul.f32 0.03125, %v398_v16  ;;  %v423_v19 = vmul.f32 0.03125, %v404_v17 }
  0xa2   : > { %v4394_v20 = vsub.f32 %v387_v0, %v421_v18  ;;  %v4396_v21 = vsub.f32 %v389_v1, %v423_v19 }
  0xa3   : > { %v401_v22 = vpop.xlane.xlu0 %400  ;;  %v407_v23 = vpop.xlane.xlu1 %406 }
  0xa4   : > { %v422_v24 = vmul.f32 0.03125, %v401_v22  ;;  %v424_v25 = vmul.f32 0.03125, %v407_v23  ;;  %v437_v26 = vmul.f32 %v4394_v20, %v4394_v20  ;;  %v439_v27 = vmul.f32 %v4396_v21, %v4396_v21  ;;  %v3079_v22 = vld [vmem:[%s5451_s1] ss:$0 sm:$0xff] }
  0xa6   : > { %v4402_v28 = vsub.f32 %v388_v2, %v422_v24  ;;  %v4404_v29 = vsub.f32 %v390_v5, %v424_v25  ;;  %v445_v30 = vsel %vm395_vm0, %v437_v26, 0.0  ;;  %v451_v33 = vsel %vm395_vm0, %v439_v27, 0.0  ;;  %v3080_v26 = vld [vmem:[%s5452_s2] ss:$0 sm:$0xff] }
  0xa7   : > { %446 = vadd.xlane.f32.xlu0 %v445_v30  ;;  %v410_v31 = vpop.xlane.xlu0 %409  ;;  %v413_v32 = vpop.xlane.xlu1 %412 }
  0xa8   : > { %v425_v34 = vmul.f32 0.03125, %v410_v31  ;;  %v426_v35 = vmul.f32 0.03125, %v413_v32  ;;  %v438_v36 = vmul.f32 %v4402_v28, %v4402_v28  ;;  %v440_v37 = vmul.f32 %v4404_v29, %v4404_v29 }
  0xaa   : > { %v4412_v38 = vsub.f32 %v391_v8, %v425_v34  ;;  %v4414_v39 = vsub.f32 %v392_v9, %v426_v35  ;;  %v448_v40 = vsel %vm395_vm0, %v438_v36, 0.0  ;;  %v454_v43 = vsel %vm395_vm0, %v440_v37, 0.0 }
  0xab   : > { %452 = vadd.xlane.f32.xlu0 %v451_v33  ;;  %449 = vadd.xlane.f32.xlu1 %v448_v40  ;;  %v416_v41 = vpop.xlane.xlu0 %415  ;;  %v419_v42 = vpop.xlane.xlu1 %418 }
  0xac   : > { %v427_v44 = vmul.f32 0.03125, %v416_v41  ;;  %v428_v45 = vmul.f32 0.03125, %v419_v42  ;;  %v441_v46 = vmul.f32 %v4412_v38, %v4412_v38  ;;  %v442_v47 = vmul.f32 %v4414_v39, %v4414_v39 }
  0xae   : > { %v4422_v48 = vsub.f32 %v393_v12, %v427_v44  ;;  %v4424_v49 = vsub.f32 %v394_v13, %v428_v45  ;;  %v457_v50 = vsel %vm395_vm0, %v441_v46, 0.0  ;;  %v460_v51 = vsel %vm395_vm0, %v442_v47, 0.0 }
  0xaf   : > { %455 = vadd.xlane.f32.xlu1 %v454_v43  ;;  %458 = vadd.xlane.f32.xlu0 %v457_v50 }
  0xb0   : > { %v443_v52 = vmul.f32 %v4422_v48, %v4422_v48  ;;  %v444_v53 = vmul.f32 %v4424_v49, %v4424_v49 }
  0xb2   : > { %v463_v54 = vsel %vm395_vm0, %v443_v52, 0.0  ;;  %v466_v55 = vsel %vm395_vm0, %v444_v53, 0.0 }
  0xb3   : > { %461 = vadd.xlane.f32.xlu1 %v460_v51  ;;  %464 = vadd.xlane.f32.xlu0 %v463_v54 }
  0xb7   : > { %467 = vadd.xlane.f32.xlu1 %v466_v55 }
 0x134   : > { %v447_v62 = vpop.xlane.xlu0 %446 }
 0x135   : > { %v469_v63 = vmul.f32 0.03125, %v447_v62 }
 0x137   : > { %v477_v0 = vadd.f32 1e-05, %v469_v63 }
 0x138   : > { %v450_v1 = vpop.xlane.xlu1 %449  ;;  %v453_v2 = vpop.xlane.xlu0 %452 }
 0x139   : > { %4118 = vrsqrt.f32 %v477_v0  ;;  %v470_v3 = vmul.f32 0.03125, %v450_v1  ;;  %v471_v4 = vmul.f32 0.03125, %v453_v2 }
 0x13b   : > { %v478_v5 = vadd.f32 1e-05, %v470_v3  ;;  %v479_v6 = vadd.f32 1e-05, %v471_v4 }
 0x13c   : > { %v456_v7 = vpop.xlane.xlu1 %455  ;;  %v459_v8 = vpop.xlane.xlu0 %458 }
 0x13d   : > { %4120 = vrsqrt.f32 %v478_v5  ;;  %v472_v9 = vmul.f32 0.03125, %v456_v7  ;;  %v473_v10 = vmul.f32 0.03125, %v459_v8 }
 0x13e   : > { %4122 = vrsqrt.f32 %v479_v6 }
 0x13f   : > { %v480_v11 = vadd.f32 1e-05, %v472_v9  ;;  %v481_v12 = vadd.f32 1e-05, %v473_v10 }
 0x140   : > { %v462_v13 = vpop.xlane.xlu1 %461  ;;  %v465_v14 = vpop.xlane.xlu0 %464 }
 0x141   : > { %4124 = vrsqrt.f32 %v480_v11  ;;  %v474_v15 = vmul.f32 0.03125, %v462_v13  ;;  %v475_v16 = vmul.f32 0.03125, %v465_v14 }
 0x142   : > { %4126 = vrsqrt.f32 %v481_v12 }
 0x143   : > { %v4119_v17 = vpop.eup %4118  ;;  %v482_v18 = vadd.f32 1e-05, %v474_v15  ;;  %v483_v19 = vadd.f32 1e-05, %v475_v16 }
 0x144   : > { %v468_v23 = vpop.xlane.xlu1 %467  ;;  %v493_v24 = vmul.f32 %v4119_v17, %v4394_v20 }
 0x145   : > { %4128 = vrsqrt.f32 %v482_v18  ;;  %v476_v25 = vmul.f32 0.03125, %v468_v23 }
 0x146   : > { %4130 = vrsqrt.f32 %v483_v19  ;;  %v508_v27 = vmul.f32 %v3079_v22, %v493_v24 }
 0x147   : > { %v4121_v30 = vpop.eup %4120  ;;  %v484_v31 = vadd.f32 1e-05, %v476_v25 }
 0x148   : > { %v4123_v32 = vpop.eup %4122  ;;  %v523_v33 = vadd.f32 %v3080_v26, %v508_v27  ;;  %v494_v34 = vmul.f32 %v4121_v30, %v4402_v28 }
 0x149   : > { %4132 = vrsqrt.f32 %v484_v31  ;;  %v495_v35 = vmul.f32 %v4123_v32, %v4396_v21 }
 0x14a   : > { %3405 = vmatprep.mubr.msk.f32.mxu0 %vm395_vm0, %v523_v33  ;;  %v509_v20 = vmul.f32 %v3079_v22, %v494_v34 }
 0x14b   : > { %v4125_v36 = vpop.eup %4124  ;;  %v510_v37 = vmul.f32 %v3079_v22, %v495_v35 }
 0x14c   : > { %v4127_v40 = vpop.eup %4126  ;;  %v524_v41 = vadd.f32 %v3080_v26, %v509_v20  ;;  %v496_v42 = vmul.f32 %v4125_v36, %v4404_v29 }
 0x14d   : > { %v525_v43 = vadd.f32 %v3080_v26, %v510_v37  ;;  %v497_v44 = vmul.f32 %v4127_v40, %v4412_v38 }
 0x14e   : > { %3406 = vmatmul.mubr.msk.f32.vlgmr.msra.gmra.mrb[0].mxu0 %vm395_vm0, %v524_v41  ;;  %v511_v45 = vmul.f32 %v3079_v22, %v496_v42 }
 0x14f   : > { %v4129_v46 = vpop.eup %4128  ;;  %3408 = vmatprep.mubr.msk.f32.mxu0 %vm395_vm0, %v525_v43  ;;  %v512_v28 = vmul.f32 %v3079_v22, %v497_v44 }
 0x150   : > { %v4131_v21 = vpop.eup %4130  ;;  %v526_v47 = vadd.f32 %v3080_v26, %v511_v45  ;;  %v498_v50 = vmul.f32 %v4129_v46, %v4414_v39 }
 0x151   : > { %v527_v51 = vadd.f32 %v3080_v26, %v512_v28  ;;  %v499_v52 = vmul.f32 %v4131_v21, %v4422_v48  ;;  %v3081_v48 = vld [vmem:[%s5454_s4] ss:$0 sm:$0xff] }
 0x152   : > { %3409 = vmatmul.mubr.msk.f32.gmra.mrb[2].mxu0 %vm395_vm0, %v526_v47  ;;  %v513_v29 = vmul.f32 %v3079_v22, %v498_v50 }
 0x153   : > { %v4133_v53 = vpop.eup %4132  ;;  %3411 = vmatprep.mubr.msk.f32.mxu0 %vm395_vm0, %v527_v51  ;;  %v514_v38 = vmul.f32 %v3079_v22, %v499_v52 }
 0x154   : > { %v528_v54 = vadd.f32 %v3080_v26, %v513_v29  ;;  %v500_v55 = vmul.f32 %v4133_v53, %v4424_v49 }
 0x155   : > { %v529_v56 = vadd.f32 %v3080_v26, %v514_v38 }
 0x156   : > { %3412 = vmatmul.mubr.msk.f32.gmra.mrb[4].mxu0 %vm395_vm0, %v528_v54  ;;  %v515_v57 = vmul.f32 %v3079_v22, %v500_v55 }
 0x157   : > { %3414 = vmatprep.mubr.msk.f32.mxu0 %vm395_vm0, %v529_v56 }
 0x158   : > { %v530_v39 = vadd.f32 %v3080_v26, %v515_v57 }
 0x15a   : > { %3415 = vmatmul.mubr.msk.f32.gmra.mrb[6].mxu0 %vm395_vm0, %v530_v39 }
 0x221   : > { %v3407_v58 = vpop.f32.mrb[0].mxu0 }
 0x222   : > { %v4471_v59 = vadd.f32 %v3407_v58, %v3081_v48  ;;  %v632_v60 = vpop.f32.mrb[1].mxu0 }
 0x223   : > { %v633_v61 = vadd.f32 %v3081_v48, %v632_v60 }
 0x224   : > { %681 = vrot.lane.b32.xlu1 %v4471_v59, %s4294_s20 }
 0x225   : > { %679 = vrot.lane.b32.xlu0 %v633_v61, %s4294_s20  ;;  %v3410_v49 = vpop.f32.mrb[2].mxu0  ;;  %3433 = vmatprep.mubr.msk.f32.mxu1 %vm743_vm1, %v633_v61  ;;  %v3958_v9 = vpack.i.bf16 %v4471_v59, %v633_v61 }
 0x226   : > { %v642_v62 = vpop.f32.mrb[3].mxu0  ;;  %v4478_v2 = vadd.f32 %v3410_v49, %v3081_v48 }
 0x227   : > { %v4475_v63 = vadd.f32 %v3081_v48, %v642_v62 }
 0x229   : > { %683 = vrot.lane.b32.xlu1 %v4475_v63, %s4294_s20  ;;  %v3413_v0 = vpop.f32.mrb[4].mxu0  ;;  %v4511_v10 = vpack.i.bf16 %v4478_v2, %v4475_v63 }
 0x22a   : > { %v652_v1 = vpop.f32.mrb[5].mxu0  ;;  %v4484_v6 = vadd.f32 %v3413_v0, %v3081_v48 }
 0x22b   : > { %v4480_v3 = vadd.f32 %v3081_v48, %v652_v1 }
 0x22d   : > { %685 = vrot.lane.b32.xlu1 %v4478_v2, %s4294_s20  ;;  %687 = vrot.lane.b32.xlu0 %v4480_v3, %s4294_s20  ;;  %v3416_v4 = vpop.f32.mrb[6].mxu0  ;;  %v4517_v11 = vpack.i.bf16 %v4484_v6, %v4480_v3 }
 0x22e   : > { %v662_v5 = vpop.f32.mrb[7].mxu0  ;;  %v4490_v8 = vadd.f32 %v3416_v4, %v3081_v48 }
 0x22f   : > { %v4486_v7 = vadd.f32 %v3081_v48, %v662_v5 }
 0x231   : > { %689 = vrot.lane.b32.xlu1 %v4484_v6, %s4294_s20  ;;  %691 = vrot.lane.b32.xlu0 %v4486_v7, %s4294_s20  ;;  %v4523_v12 = vpack.i.bf16 %v4490_v8, %v4486_v7 }
 0x235   : > { %693 = vrot.lane.b32.xlu1 %v4490_v8, %s4294_s20  ;;  %695 = vrot.lane.b32.xlu0 %v633_v61, %s4295_s21 }
 0x239   : > { %697 = vrot.lane.b32.xlu1 %v4471_v59, %s4295_s21  ;;  %711 = vrot.lane.b32.xlu0 %v633_v61, %s4296_s23 }
 0x23d   : > { %713 = vrot.lane.b32.xlu1 %v4471_v59, %s4296_s23  ;;  %699 = vrot.lane.b32.xlu0 %v4475_v63, %s4295_s21 }
 0x241   : > { %701 = vrot.lane.b32.xlu1 %v4478_v2, %s4295_s21  ;;  %715 = vrot.lane.b32.xlu0 %v4475_v63, %s4296_s23 }
 0x245   : > { %717 = vrot.lane.b32.xlu1 %v4478_v2, %s4296_s23  ;;  %703 = vrot.lane.b32.xlu0 %v4480_v3, %s4295_s21 }
 0x249   : > { %705 = vrot.lane.b32.xlu1 %v4484_v6, %s4295_s21  ;;  %719 = vrot.lane.b32.xlu0 %v4480_v3, %s4296_s23 }
 0x24d   : > { %721 = vrot.lane.b32.xlu1 %v4484_v6, %s4296_s23  ;;  %707 = vrot.lane.b32.xlu0 %v4486_v7, %s4295_s21 }
 0x251   : > { %709 = vrot.lane.b32.xlu1 %v4490_v8, %s4295_s21  ;;  %723 = vrot.lane.b32.xlu0 %v4486_v7, %s4296_s23 }
 0x255   : > { %725 = vrot.lane.b32.xlu1 %v4490_v8, %s4296_s23  ;;  %3959 = vrot.lane.b32.xlu0 %v3958_v9, %s4297_s24 }
 0x259   : > { %3969 = vrot.lane.b32.xlu0 %v4511_v10, %s4297_s24 }
 0x25d   : > { %3979 = vrot.lane.b32.xlu0 %v4517_v11, %s4297_s24 }
 0x261   : > { %3989 = vrot.lane.b32.xlu0 %v4523_v12, %s4297_s24 }
 0x296   : > { %v4527_v13 = vpop.permute.xlu1 %681 }
 0x297   : > { %v680_v14 = vpop.permute.xlu0 %679 }
 0x298   : > { %3461 = vmatprep.mubr.msk.f32.mxu0 %vm743_vm1, %v680_v14  ;;  %v4531_v15 = vpack.i.bf16 %v4527_v13, %v680_v14 }
 0x29a   : > { %3964 = vrot.lane.b32.xlu1 %v4531_v15, %s4297_s24 }
 0x29b   : > { %v4535_v16 = vpop.permute.xlu1 %683 }
 0x29f   : > { %v4537_v17 = vpop.permute.xlu1 %685  ;;  %v4539_v18 = vpop.permute.xlu0 %687 }
 0x2a0   : > { %v4543_v19 = vpack.i.bf16 %v4537_v17, %v4535_v16 }
 0x2a2   : > { %3974 = vrot.lane.b32.xlu1 %v4543_v19, %s4297_s24 }
 0x2a3   : > { %v4547_v22 = vpop.permute.xlu1 %689  ;;  %v4549_v23 = vpop.permute.xlu0 %691 }
 0x2a4   : > { %v3983_v24 = vpack.i.bf16 %v4547_v22, %v4539_v18 }
 0x2a6   : > { %3984 = vrot.lane.b32.xlu1 %v3983_v24, %s4297_s24 }
 0x2a7   : > { %v4554_v25 = vpop.permute.xlu1 %693  ;;  %v4556_v26 = vpop.permute.xlu0 %695 }
 0x2a8   : > { %v4560_v27 = vpack.i.bf16 %v4554_v25, %v4549_v23 }
 0x2aa   : > { %3994 = vrot.lane.b32.xlu1 %v4560_v27, %s4297_s24 }
 0x2ab   : > { %v4564_v30 = vpop.permute.xlu1 %697  ;;  %v4566_v31 = vpop.permute.xlu0 %711 }
 0x2ac   : > { %v3998_v32 = vpack.i.bf16 %v4564_v30, %v4556_v26 }
 0x2ae   : > { %3999 = vrot.lane.b32.xlu0 %v3998_v32, %s4297_s24 }
 0x2af   : > { %v4571_v33 = vpop.permute.xlu1 %713  ;;  %v4573_v34 = vpop.permute.xlu0 %699 }
 0x2b0   : > { %v4003_v35 = vpack.i.bf16 %v4571_v33, %v4566_v31 }
 0x2b2   : > { %4004 = vrot.lane.b32.xlu1 %v4003_v35, %s4297_s24 }
 0x2b3   : > { %v4578_v20 = vpop.permute.xlu1 %701  ;;  %v4580_v36 = vpop.permute.xlu0 %715 }
 0x2b4   : > { %v4008_v37 = vpack.i.bf16 %v4578_v20, %v4573_v34 }
 0x2b6   : > { %4009 = vrot.lane.b32.xlu0 %v4008_v37, %s4297_s24 }
 0x2b7   : > { %v4585_v40 = vpop.permute.xlu1 %717  ;;  %v4587_v41 = vpop.permute.xlu0 %703 }
 0x2b8   : > { %v4013_v42 = vpack.i.bf16 %v4585_v40, %v4580_v36 }
 0x2ba   : > { %4014 = vrot.lane.b32.xlu1 %v4013_v42, %s4297_s24 }
 0x2bb   : > { %v4592_v43 = vpop.permute.xlu1 %705  ;;  %v4594_v44 = vpop.permute.xlu0 %719 }
 0x2bc   : > { %v4598_v45 = vpack.i.bf16 %v4592_v43, %v4587_v41 }
 0x2be   : > { %4019 = vrot.lane.b32.xlu0 %v4598_v45, %s4297_s24 }
 0x2bf   : > { %v4602_v46 = vpop.permute.xlu1 %721  ;;  %v4604_v28 = vpop.permute.xlu0 %707 }
 0x2c0   : > { %v4608_v21 = vpack.i.bf16 %v4602_v46, %v4594_v44 }
 0x2c2   : > { %4024 = vrot.lane.b32.xlu1 %v4608_v21, %s4297_s24 }
 0x2c3   : > { %v4612_v47 = vpop.permute.xlu1 %709  ;;  %v4614_v50 = vpop.permute.xlu0 %723 }
 0x2c4   : > { %v4618_v51 = vpack.i.bf16 %v4612_v47, %v4604_v28 }
 0x2c6   : > { %4029 = vrot.lane.b32.xlu0 %v4618_v51, %s4297_s24 }
 0x2c7   : > { %v4622_v52 = vpop.permute.xlu1 %725  ;;  %v3960_v29 = vpop.permute.xlu0 %3959 }
 0x2c8   : > { %v4626_v53 = vpack.i.bf16 %v4622_v52, %v4614_v50  ;;  %v3962_v38 = vunpack.i.h.bf16 %v3960_v29  ;;  %v3961_v54 = vunpack.i.l.bf16 %v3960_v29 }
 0x2ca   : > { %4039 = vrot.lane.b32.xlu0 %v3958_v9, %s4298_s25  ;;  %4034 = vrot.lane.b32.xlu1 %v4626_v53, %s4297_s24  ;;  %v3733_v56 = vpack.c.bf16 %v3962_v38, %v3961_v54 }
 0x2cb   : > { %v3970_v57 = vpop.permute.xlu0 %3969 }
 0x2cc   : > { %v3972_v39 = vunpack.i.h.bf16 %v3970_v57  ;;  %v3971_v48 = vunpack.i.l.bf16 %v3970_v57  ;;  %3735 = vmatprep.subr.msk.bf16.mxu1 %vm4630_vm2, %v3733_v56 }
 0x2cd   : > { %3738 = vmatpush3.bf16.xpose.msk.msra.mxu1 %vm4630_vm2, %v3733_v56 }
 0x2ce   : > { %v3739_v58 = vpack.c.bf16 %v3972_v39, %v3971_v48  ;;  %4049 = vrot.lane.b32.xlu0 %v4517_v11, %s4298_s25  ;;  %4044 = vrot.lane.b32.xlu1 %v4511_v10, %s4298_s25 }
 0x2cf   : > { %v3980_v60 = vpop.permute.xlu0 %3979 }
 0x2d0   : > { %3741 = vmatprep.subr.msk.bf16.mxu1 %vm4630_vm2, %v3739_v58  ;;  %v3982_v61 = vunpack.i.h.bf16 %v3980_v60  ;;  %v3981_v49 = vunpack.i.l.bf16 %v3980_v60 }
 0x2d2   : > { %4059 = vrot.lane.b32.xlu0 %v4531_v15, %s4298_s25  ;;  %4054 = vrot.lane.b32.xlu1 %v4523_v12, %s4298_s25  ;;  %v3745_v62 = vpack.c.bf16 %v3982_v61, %v3981_v49 }
 0x2d3   : > { %v3990_v0 = vpop.permute.xlu0 %3989 }
 0x2d4   : > { %v3992_v1 = vunpack.i.h.bf16 %v3990_v0  ;;  %v3991_v4 = vunpack.i.l.bf16 %v3990_v0 }
 0x2d5   : > { %3744 = vmatpush3.bf16.xpose.msk.msra.mxu1 %vm4630_vm2, %v3739_v58 }
 0x2d6   : > { %4064 = vrot.lane.b32.xlu0 %v4543_v19, %s4298_s25  ;;  %4069 = vrot.lane.b32.xlu1 %v3983_v24, %s4298_s25  ;;  %v3751_v5 = vpack.c.bf16 %v3992_v1, %v3991_v4 }
 0x2d7   : > { %3747 = vmatprep.subr.msk.bf16.mxu1 %vm4630_vm2, %v3745_v62 }
 0x2da   : > { %4084 = vrot.lane.b32.xlu0 %v4008_v37, %s4298_s25  ;;  %4074 = vrot.lane.b32.xlu1 %v3998_v32, %s4298_s25 }
 0x2dd   : > { %3750 = vmatpush3.bf16.xpose.msk.msra.mxu1 %vm4630_vm2, %v3745_v62 }
 0x2de   : > { %4089 = vrot.lane.b32.xlu0 %v4013_v42, %s4298_s25  ;;  %4079 = vrot.lane.b32.xlu1 %v4003_v35, %s4298_s25 }
 0x2df   : > { %3753 = vmatprep.subr.msk.bf16.mxu1 %vm4630_vm2, %v3751_v5 }
 0x2e2   : > { %4094 = vrot.lane.b32.xlu0 %v4560_v27, %s4298_s25 }
 0x2e5   : > { %3756 = vmatpush3.bf16.xpose.msk.msra.mxu1 %vm4630_vm2, %v3751_v5 }
 0x2ec   : > { %3434 = vmatmul.mubr.msk.f32.vlgmr.msra.gmra.mrb[0].mxu1 %vm743_vm1, %v4471_v59 }
 0x2ed   : > { %3436 = vmatprep.mubr.msk.f32.mxu1 %vm743_vm1, %v4475_v63 }
 0x2f0   : > { %3437 = vmatmul.mubr.msk.f32.gmra.mrb[2].mxu1 %vm743_vm1, %v4478_v2 }
 0x2f1   : > { %3439 = vmatprep.mubr.msk.f32.mxu1 %vm743_vm1, %v4480_v3 }
 0x2f4   : > { %3440 = vmatmul.mubr.msk.f32.gmra.mrb[4].mxu1 %vm743_vm1, %v4484_v6 }
 0x2f5   : > { %3442 = vmatprep.mubr.msk.f32.mxu1 %vm743_vm1, %v4486_v7 }
 0x2f8   : > { %3443 = vmatmul.mubr.msk.f32.gmra.mrb[6].mxu1 %vm743_vm1, %v4490_v8 }
 0x2f9   : > { %3489 = vmatprep.mubr.msk.f32.mxu1 %vm743_vm1, %v4556_v26 }
 0x30c   : > { %v3965_v59 = vpop.permute.xlu1 %3964 }
 0x30d   : > { %v3967_v63 = vunpack.i.h.bf16 %v3965_v59  ;;  %v3966_v9 = vunpack.i.l.bf16 %v3965_v59 }
 0x30f   : > { %v3757_v10 = vpack.c.bf16 %v3967_v63, %v3966_v9 }
 0x311   : > { %3759 = vmatprep.subr.msk.bf16.mxu0 %vm4630_vm2, %v3757_v10 }
 0x312   : > { %3762 = vmatpush3.bf16.xpose.msk.msra.mxu0 %vm4630_vm2, %v3757_v10 }
 0x314   : > { %v3975_v2 = vpop.permute.xlu1 %3974 }
 0x315   : > { %v3977_v3 = vunpack.i.h.bf16 %v3975_v2  ;;  %v3976_v6 = vunpack.i.l.bf16 %v3975_v2 }
 0x317   : > { %v3763_v7 = vpack.c.bf16 %v3977_v3, %v3976_v6 }
 0x318   : > { %v3985_v11 = vpop.permute.xlu1 %3984 }
 0x319   : > { %v3987_v12 = vunpack.i.h.bf16 %v3985_v11  ;;  %v3986_v8 = vunpack.i.l.bf16 %v3985_v11  ;;  %3765 = vmatprep.subr.msk.bf16.mxu0 %vm4630_vm2, %v3763_v7 }
 0x31a   : > { %3768 = vmatpush3.bf16.xpose.msk.msra.mxu0 %vm4630_vm2, %v3763_v7 }
 0x31b   : > { %v3769_v14 = vpack.c.bf16 %v3987_v12, %v3986_v8 }
 0x31c   : > { %v3995_v15 = vpop.permute.xlu1 %3994 }
 0x31d   : > { %v3997_v19 = vunpack.i.h.bf16 %v3995_v15  ;;  %v3996_v24 = vunpack.i.l.bf16 %v3995_v15  ;;  %3771 = vmatprep.subr.msk.bf16.mxu0 %vm4630_vm2, %v3769_v14 }
 0x31f   : > { %v3775_v27 = vpack.c.bf16 %v3997_v19, %v3996_v24 }
 0x320   : > { %v4000_v26 = vpop.permute.xlu0 %3999 }
 0x321   : > { %v4002_v32 = vunpack.i.h.bf16 %v4000_v26  ;;  %v4001_v35 = vunpack.i.l.bf16 %v4000_v26 }
 0x322   : > { %3774 = vmatpush3.bf16.xpose.msk.msra.mxu0 %vm4630_vm2, %v3769_v14 }
 0x323   : > { %v3781_v37 = vpack.c.bf16 %v4002_v32, %v4001_v35  ;;  %3777 = vmatprep.subr.msk.bf16.mxu0 %vm4630_vm2, %v3775_v27 }
 0x324   : > { %v4005_v42 = vpop.permute.xlu1 %4004 }
 0x325   : > { %v4007_v29 = vunpack.i.h.bf16 %v4005_v42  ;;  %v4006_v38 = vunpack.i.l.bf16 %v4005_v42  ;;  %3783 = vmatprep.subr.msk.bf16.mxu1 %vm4630_vm2, %v3781_v37 }
 0x326   : > { %3786 = vmatpush3.bf16.xpose.msk.msra.mxu1 %vm4630_vm2, %v3781_v37 }
 0x327   : > { %v3805_v56 = vpack.c.bf16 %v4007_v29, %v4006_v38 }
 0x328   : > { %v4010_v54 = vpop.permute.xlu0 %4009 }
 0x329   : > { %v4012_v57 = vunpack.i.h.bf16 %v4010_v54  ;;  %v4011_v39 = vunpack.i.l.bf16 %v4010_v54 }
 0x32a   : > { %3780 = vmatpush3.bf16.xpose.msk.msra.mxu0 %vm4630_vm2, %v3775_v27 }
 0x32b   : > { %v3787_v48 = vpack.c.bf16 %v4012_v57, %v4011_v39  ;;  %3807 = vmatprep.subr.msk.bf16.mxu0 %vm4630_vm2, %v3805_v56 }
 0x32c   : > { %v4015_v58 = vpop.permute.xlu1 %4014 }
 0x32d   : > { %v4017_v60 = vunpack.i.h.bf16 %v4015_v58  ;;  %v4016_v61 = vunpack.i.l.bf16 %v4015_v58  ;;  %3789 = vmatprep.subr.msk.bf16.mxu1 %vm4630_vm2, %v3787_v48 }
 0x32e   : > { %3792 = vmatpush3.bf16.xpose.msk.msra.mxu1 %vm4630_vm2, %v3787_v48 }
 0x32f   : > { %v3811_v62 = vpack.c.bf16 %v4017_v60, %v4016_v61 }
 0x330   : > { %v4020_v49 = vpop.permute.xlu0 %4019 }
 0x331   : > { %v4022_v0 = vunpack.i.h.bf16 %v4020_v49  ;;  %v4021_v1 = vunpack.i.l.bf16 %v4020_v49  ;;  %3462 = vmatmul.mubr.msk.f32.vlgmr.msra.gmra.mrb[8].mxu0 %vm743_vm1, %v4527_v13 }
 0x332   : > { %3464 = vmatprep.mubr.msk.f32.mxu0 %vm743_vm1, %v4535_v16  ;;  %3810 = vmatpush3.bf16.xpose.msk.msra.mxu0 %vm4630_vm2, %v3805_v56 }
 0x333   : > { %v3793_v4 = vpack.c.bf16 %v4022_v0, %v4021_v1  ;;  %3813 = vmatprep.subr.msk.bf16.mxu0 %vm4630_vm2, %v3811_v62 }
 0x334   : > { %v4025_v5 = vpop.permute.xlu1 %4024 }
 0x335   : > { %v4027_v59 = vunpack.i.h.bf16 %v4025_v5  ;;  %v4026_v63 = vunpack.i.l.bf16 %v4025_v5  ;;  %3465 = vmatmul.mubr.msk.f32.gmra.mrb[10].mxu0 %vm743_vm1, %v4537_v17  ;;  %3795 = vmatprep.subr.msk.bf16.mxu1 %vm4630_vm2, %v3793_v4 }
 0x336   : > { %3467 = vmatprep.mubr.msk.f32.mxu0 %vm743_vm1, %v4539_v18  ;;  %3798 = vmatpush3.bf16.xpose.msk.msra.mxu1 %vm4630_vm2, %v3793_v4 }
 0x337   : > { %v3817_v16 = vpack.c.bf16 %v4027_v59, %v4026_v63 }
 0x338   : > { %v4030_v13 = vpop.permute.xlu0 %4029 }
 0x339   : > { %v4032_v9 = vunpack.i.h.bf16 %v4030_v13  ;;  %v4031_v10 = vunpack.i.l.bf16 %v4030_v13  ;;  %3468 = vmatmul.mubr.msk.f32.gmra.mrb[12].mxu0 %vm743_vm1, %v4547_v22 }
 0x33a   : > { %3470 = vmatprep.mubr.msk.f32.mxu0 %vm743_vm1, %v4549_v23  ;;  %3816 = vmatpush3.bf16.xpose.msk.msra.mxu0 %vm4630_vm2, %v3811_v62 }
 0x33b   : > { %v3799_v17 = vpack.c.bf16 %v4032_v9, %v4031_v10  ;;  %3819 = vmatprep.subr.msk.bf16.mxu0 %vm4630_vm2, %v3817_v16 }
 0x33c   : > { %v4035_v18 = vpop.permute.xlu1 %4034  ;;  %v4040_v2 = vpop.permute.xlu0 %4039 }
 0x33d   : > { %v4037_v3 = vunpack.i.h.bf16 %v4035_v18  ;;  %v4036_v6 = vunpack.i.l.bf16 %v4035_v18  ;;  %3471 = vmatmul.mubr.msk.f32.gmra.mrb[14].mxu0 %vm743_vm1, %v4554_v25  ;;  %3801 = vmatprep.subr.msk.bf16.mxu1 %vm4630_vm2, %v3799_v17  ;;  %v4042_v12 = vunpack.i.h.bf16 %v4040_v2  ;;  %v4041_v8 = vunpack.i.l.bf16 %v4040_v2 }
 0x33e   : > { %3804 = vmatpush3.bf16.xpose.msk.msra.mxu1 %vm4630_vm2, %v3799_v17  ;;  %3517 = vmatprep.mubr.msk.f32.mxu0 %vm743_vm1, %v4566_v31 }
 0x33f   : > { %v3823_v7 = vpack.c.bf16 %v4037_v3, %v4036_v6  ;;  %v3829_v15 = vpack.c.bf16 %v4042_v12, %v4041_v8 }
 0x340   : > { %v4045_v22 = vpop.permute.xlu1 %4044  ;;  %v4050_v23 = vpop.permute.xlu0 %4049 }
 0x341   : > { %v4046_v27 = vunpack.i.l.bf16 %v4045_v22  ;;  %v4051_v55 = vunpack.i.l.bf16 %v4050_v23 }
 0x342   : > { %3822 = vmatpush3.bf16.xpose.msk.msra.mxu0 %vm4630_vm2, %v3817_v16 }
 0x343   : > { %3825 = vmatprep.subr.msk.bf16.mxu0 %vm4630_vm2, %v3823_v7 }
 0x344   : > { %v4055_v11 = vpop.permute.xlu1 %4054  ;;  %v4060_v25 = vpop.permute.xlu0 %4059 }
 0x345   : > { %3490 = vmatmul.mubr.msk.f32.vlgmr.msra.gmra.mrb[8].mxu1 %vm743_vm1, %v4564_v30  ;;  %v4061_v42 = vunpack.i.l.bf16 %v4060_v25 }
 0x346   : > { %3492 = vmatprep.mubr.msk.f32.mxu1 %vm743_vm1, %v4573_v34  ;;  %v4047_v34 = vunpack.i.h.bf16 %v4045_v22 }
 0x348   : > { %v4752_v31 = vpop.permute.xlu1 %4069  ;;  %v4754_v14 = vpop.permute.xlu0 %4064 }
 0x349   : > { %3493 = vmatmul.mubr.msk.f32.gmra.mrb[10].mxu1 %vm743_vm1, %v4578_v20 }
 0x34a   : > { %3495 = vmatprep.mubr.msk.f32.mxu1 %vm743_vm1, %v4587_v41  ;;  %3828 = vmatpush3.bf16.xpose.msk.msra.mxu0 %vm4630_vm2, %v3823_v7  ;;  %v4052_v41 = vunpack.i.h.bf16 %v4050_v23 }
 0x34b   : > { %3830 = vmatprep.subr.bf16.mxu0 %v3829_v15 }
 0x34c   : > { %v4075_v19 = vpop.permute.xlu1 %4074  ;;  %v4085_v30 = vpop.permute.xlu0 %4084 }
 0x34d   : > { %v4077_v24 = vunpack.i.h.bf16 %v4075_v19  ;;  %v4076_v26 = vunpack.i.l.bf16 %v4075_v19  ;;  %3496 = vmatmul.mubr.msk.f32.gmra.mrb[12].mxu1 %vm743_vm1, %v4592_v43  ;;  %v4087_v32 = vunpack.i.h.bf16 %v4085_v30  ;;  %v4086_v35 = vunpack.i.l.bf16 %v4085_v30 }
 0x34e   : > { %3498 = vmatprep.mubr.msk.f32.mxu1 %vm743_vm1, %v4604_v28  ;;  %v3833_v43 = vpack.c.bf16 %v4047_v34, %v4046_v27  ;;  %v4057_v28 = vunpack.i.h.bf16 %v4055_v11 }
 0x34f   : > { %v3861_v20 = vpack.c.bf16 %v4077_v24, %v4076_v26  ;;  %v3865_v37 = vpack.c.bf16 %v4087_v32, %v4086_v35 }
 0x351   : > { %3499 = vmatmul.mubr.msk.f32.gmra.mrb[14].mxu1 %vm743_vm1, %v4612_v47  ;;  %3518 = vmatmul.mubr.msk.f32.vlgmr.msra.gmra.mrb[16].mxu0 %vm743_vm1, %v4571_v33  ;;  %v4056_v47 = vunpack.i.l.bf16 %v4055_v11  ;;  %v3837_v33 = vpack.c.bf16 %v4052_v41, %v4051_v55 }
 0x352   : > { %3862 = vmatprep.subr.bf16.mxu1 %v3861_v20  ;;  %3520 = vmatprep.mubr.msk.f32.mxu0 %vm743_vm1, %v4580_v36  ;;  %v4062_v36 = vunpack.i.h.bf16 %v4060_v25 }
 0x353   : > { %3832 = vmatpush3.bf16.msra.mxu0 %v3829_v15  ;;  %3864 = vmatpush3.bf16.msra.mxu1 %v3861_v20  ;;  %v3841_v29 = vpack.c.bf16 %v4057_v28, %v4056_v47 }
 0x354   : > { %3834 = vmatprep.subr.bf16.mxu0 %v3833_v43  ;;  %3866 = vmatprep.subr.bf16.mxu1 %v3865_v37 }
 0x355   : > { %3521 = vmatmul.mubr.msk.f32.gmra.mrb[18].mxu0 %vm743_vm1, %v4585_v40  ;;  %v4782_v40 = vpack.c.bf16 %v4062_v36, %v4061_v42 }
 0x356   : > { %3523 = vmatprep.mubr.msk.f32.mxu0 %vm743_vm1, %v4594_v44 }
 0x357   : > { %3836 = vmatpush3.bf16.msra.mxu0 %v3833_v43  ;;  %3868 = vmatpush3.bf16.msra.mxu1 %v3865_v37 }
 0x358   : > { %3838 = vmatprep.subr.bf16.mxu0 %v3837_v33 }
 0x359   : > { %3524 = vmatmul.mubr.msk.f32.gmra.mrb[20].mxu0 %vm743_vm1, %v4602_v46 }
 0x35a   : > { %3526 = vmatprep.mubr.msk.f32.mxu0 %vm743_vm1, %v4614_v50 }
 0x35b   : > { %3840 = vmatpush3.bf16.msra.mxu0 %v3837_v33 }
 0x35c   : > { %3842 = vmatprep.subr.bf16.mxu0 %v3841_v29 }
 0x35d   : > { %3527 = vmatmul.mubr.msk.f32.gmra.mrb[22].mxu0 %vm743_vm1, %v4622_v52 }
 0x35f   : > { %3844 = vmatpush3.bf16.msra.mxu0 %v3841_v29 }
 0x360   : > { %3846 = vmatprep.subr.bf16.mxu0 %v4782_v40 }
 0x3bf   : > { %v4785_v44 = vpop.f32.mrb[0].mxu1 }
 0x3c0   : > { %v4787_v46 = vpop.f32.mrb[1].mxu1  ;;  %v1344_v38 = vsel %vm1340_vm3, %v4785_v44, -inf }
 0x3c1   : > { %1345 = vmax.xlane.f32.xlu1 %v1344_v38  ;;  %v1341_v50 = vsel %vm1340_vm3, %v4787_v46, -inf }
 0x3c2   : > { %1342 = vmax.xlane.f32.xlu0 %v1341_v50 }
 0x3c3   : > { %v4793_v54 = vpop.f32.mrb[2].mxu1 }
 0x3c4   : > { %v4795_v52 = vpop.f32.mrb[3].mxu1  ;;  %v1350_v56 = vsel %vm1340_vm3, %v4793_v54, -inf }
 0x3c5   : > { %v1347_v58 = vsel %vm1340_vm3, %v4795_v52, -inf }
 0x3c6   : > { %1351 = vmax.xlane.f32.xlu0 %v1350_v56 }
 0x3c7   : > { %v4799_v57 = vpop.f32.mrb[4].mxu1 }
 0x3c8   : > { %v4801_v39 = vpop.f32.mrb[5].mxu1  ;;  %v1356_v48 = vsel %vm1340_vm3, %v4799_v57, -inf }
 0x3c9   : > { %1357 = vmax.xlane.f32.xlu1 %v1356_v48  ;;  %v1353_v62 = vsel %vm1340_vm3, %v4801_v39, -inf }
 0x3ca   : > { %1348 = vmax.xlane.f32.xlu0 %v1347_v58 }
 0x3cb   : > { %v4807_v60 = vpop.f32.mrb[6].mxu1 }
 0x3cc   : > { %v4809_v61 = vpop.f32.mrb[7].mxu1  ;;  %v1362_v49 = vsel %vm1340_vm3, %v4807_v60, -inf }
 0x3cd   : > { %1363 = vmax.xlane.f32.xlu1 %v1362_v49  ;;  %v1359_v0 = vsel %vm1340_vm3, %v4809_v61, -inf  ;;  %v4909_v49 = vpop.permute.xlu0 %4089 }
 0x3ce   : > { %1354 = vmax.xlane.f32.xlu0 %v1353_v62  ;;  %v4911_v62 = vpop.permute.xlu1 %4079 }
 0x3d2   : > { %1360 = vmax.xlane.f32.xlu0 %v1359_v0  ;;  %v4913_v0 = vpop.permute.xlu0 %4094 }
 0x404   : > { %v4817_v1 = vpop.f32.mrb[8].mxu0 }
 0x405   : > { %v4819_v4 = vpop.f32.mrb[9].mxu0  ;;  %v1368_v5 = vsel %vm1340_vm3, %v4817_v1, -inf }
 0x406   : > { %1369 = vmax.xlane.f32.xlu1 %v1368_v5  ;;  %v1365_v59 = vsel %vm1340_vm3, %v4819_v4, -inf }
 0x407   : > { %1366 = vmax.xlane.f32.xlu0 %v1365_v59 }
 0x408   : > { %v4825_v63 = vpop.f32.mrb[10].mxu0 }
 0x409   : > { %v4827_v13 = vpop.f32.mrb[11].mxu0  ;;  %v1374_v7 = vsel %vm1340_vm3, %v4825_v63, -inf }
 0x40a   : > { %v1371_v11 = vsel %vm1340_vm3, %v4827_v13, -inf }
 0x40c   : > { %v4829_v16 = vpop.f32.mrb[12].mxu0 }
 0x40d   : > { %v4831_v9 = vpop.f32.mrb[13].mxu0  ;;  %v1380_v34 = vsel %vm1340_vm3, %v4829_v16, -inf }
 0x40e   : > { %v1377_v27 = vsel %vm1340_vm3, %v4831_v9, -inf }
 0x410   : > { %v4833_v10 = vpop.f32.mrb[14].mxu0 }
 0x411   : > { %v4835_v17 = vpop.f32.mrb[15].mxu0  ;;  %v1386_v37 = vsel %vm1340_vm3, %v4833_v10, -inf }
 0x412   : > { %v1383_v28 = vsel %vm1340_vm3, %v4835_v17, -inf }
 0x418   : > { %v4837_v18 = vpop.f32.mrb[8].mxu1 }
 0x419   : > { %v4839_v2 = vpop.f32.mrb[9].mxu1  ;;  %v1392_v3 = vsel %vm1340_vm3, %v4837_v18, -inf }
 0x41a   : > { %1393 = vmax.xlane.f32.xlu1 %v1392_v3  ;;  %v1389_v6 = vsel %vm1340_vm3, %v4839_v2, -inf }
 0x41b   : > { %1390 = vmax.xlane.f32.xlu0 %v1389_v6 }
 0x41c   : > { %v4845_v22 = vpop.f32.mrb[10].mxu1 }
 0x41d   : > { %v4847_v23 = vpop.f32.mrb[11].mxu1  ;;  %v1398_v8 = vsel %vm1340_vm3, %v4845_v22, -inf }
 0x41e   : > { %1375 = vmax.xlane.f32.xlu1 %v1374_v7  ;;  %v1395_v15 = vsel %vm1340_vm3, %v4847_v23, -inf }
 0x41f   : > { %1372 = vmax.xlane.f32.xlu0 %v1371_v11 }
 0x420   : > { %v4853_v25 = vpop.f32.mrb[12].mxu1 }
 0x421   : > { %v4855_v12 = vpop.f32.mrb[13].mxu1  ;;  %v1404_v20 = vsel %vm1340_vm3, %v4853_v25, -inf }
 0x422   : > { %1399 = vmax.xlane.f32.xlu1 %v1398_v8  ;;  %v1401_v41 = vsel %vm1340_vm3, %v4855_v12, -inf }
 0x423   : > { %1396 = vmax.xlane.f32.xlu0 %v1395_v15 }
 0x424   : > { %v4861_v19 = vpop.f32.mrb[14].mxu1  ;;  %v4863_v30 = vpop.f32.mrb[16].mxu0 }
 0x425   : > { %v4865_v24 = vpop.f32.mrb[15].mxu1  ;;  %v4867_v26 = vpop.f32.mrb[17].mxu0  ;;  %v1410_v36 = vsel %vm1340_vm3, %v4861_v19, -inf  ;;  %v1416_v29 = vsel %vm1340_vm3, %v4863_v30, -inf }
 0x426   : > { %1381 = vmax.xlane.f32.xlu1 %v1380_v34  ;;  %v1407_v42 = vsel %vm1340_vm3, %v4865_v24, -inf  ;;  %v1413_v38 = vsel %vm1340_vm3, %v4867_v26, -inf }
 0x427   : > { %1378 = vmax.xlane.f32.xlu0 %v1377_v27 }
 0x428   : > { %v4873_v32 = vpop.f32.mrb[18].mxu0 }
 0x429   : > { %v4875_v35 = vpop.f32.mrb[19].mxu0  ;;  %v1422_v50 = vsel %vm1340_vm3, %v4873_v32, -inf }
 0x42a   : > { %1405 = vmax.xlane.f32.xlu1 %v1404_v20  ;;  %v1419_v56 = vsel %vm1340_vm3, %v4875_v35, -inf }
 0x42b   : > { %1402 = vmax.xlane.f32.xlu0 %v1401_v41 }
 0x42c   : > { %v4881_v55 = vpop.f32.mrb[20].mxu0 }
 0x42d   : > { %v4883_v43 = vpop.f32.mrb[21].mxu0  ;;  %v1428_v48 = vsel %vm1340_vm3, %v4881_v55, -inf }
 0x42e   : > { %1387 = vmax.xlane.f32.xlu1 %v1386_v37  ;;  %v1425_v58 = vsel %vm1340_vm3, %v4883_v43, -inf }
 0x42f   : > { %1384 = vmax.xlane.f32.xlu0 %v1383_v28 }
 0x430   : > { %v4889_v47 = vpop.f32.mrb[22].mxu0 }
 0x431   : > { %v4891_v33 = vpop.f32.mrb[23].mxu0 }
 0x432   : > { %1411 = vmax.xlane.f32.xlu1 %v1410_v36 }
 0x433   : > { %1408 = vmax.xlane.f32.xlu0 %v1407_v42 }
 0x436   : > { %1417 = vmax.xlane.f32.xlu1 %v1416_v29 }
 0x437   : > { %1414 = vmax.xlane.f32.xlu0 %v1413_v38 }
 0x43a   : > { %1423 = vmax.xlane.f32.xlu1 %v1422_v50 }
 0x43b   : > { %1420 = vmax.xlane.f32.xlu0 %v1419_v56 }
 0x43e   : > { %1429 = vmax.xlane.f32.xlu1 %v1428_v48 }
 0x43f   : > { %1426 = vmax.xlane.f32.xlu0 %v1425_v58  ;;  %v1434_v58 = vsel %vm1340_vm3, %v4889_v47, -inf }
 0x44e   : > { %v1346_v5 = vpop.xlane.xlu1 %1345 }
 0x44f   : > { %v1438_v59 = vsub.f32 %v4785_v44, %v1346_v5  ;;  %v1343_v3 = vpop.xlane.xlu0 %1342 }
 0x450   : > { %v1437_v6 = vsub.f32 %v4787_v46, %v1343_v3 }
 0x451   : > { %v1471_v7 = vmul.f32 1.442695, %v1438_v59  ;;  %v1431_v59 = vsel %vm1340_vm3, %v4891_v33, -inf }
 0x452   : > { %v1469_v11 = vmul.f32 1.442695, %v1437_v6 }
 0x453   : > { %4134 = vpow2.f32 %v1471_v7  ;;  %v1352_v8 = vpop.xlane.xlu0 %1351 }
 0x454   : > { %4136 = vpow2.f32 %v1469_v11  ;;  %v1440_v15 = vsub.f32 %v4793_v54, %v1352_v8 }
 0x456   : > { %v1475_v34 = vmul.f32 1.442695, %v1440_v15  ;;  %v1358_v27 = vpop.xlane.xlu1 %1357 }
 0x457   : > { %v1442_v20 = vsub.f32 %v4799_v57, %v1358_v27  ;;  %v1349_v41 = vpop.xlane.xlu0 %1348 }
 0x458   : > { %v1439_v37 = vsub.f32 %v4795_v52, %v1349_v41  ;;  %4138 = vpow2.f32 %v1475_v34 }
 0x459   : > { %v1479_v28 = vmul.f32 1.442695, %v1442_v20 }
 0x45a   : > { %v1473_v44 = vmul.f32 1.442695, %v1439_v37  ;;  %v1364_v36 = vpop.xlane.xlu1 %1363 }
 0x45b   : > { %v1444_v46 = vsub.f32 %v4807_v60, %v1364_v36  ;;  %v1355_v42 = vpop.xlane.xlu0 %1354 }
 0x45c   : > { %4140 = vpow2.f32 %v1473_v44  ;;  %v1441_v29 = vsub.f32 %v4801_v39, %v1355_v42 }
 0x45d   : > { %v4922_v38 = vpop.eup %4134  ;;  %4142 = vpow2.f32 %v1479_v28  ;;  %v1483_v54 = vmul.f32 1.442695, %v1444_v46 }
 0x45e   : > { %v4924_v50 = vpop.eup %4136  ;;  %v1477_v57 = vmul.f32 1.442695, %v1441_v29  ;;  %v1536_v52 = vsel %vm1340_vm3, %v4922_v38, 0.0 }
 0x45f   : > { %v1361_v56 = vpop.xlane.xlu0 %1360  ;;  %1537 = vadd.xlane.f32.xlu1 %v1536_v52  ;;  %v1533_v48 = vsel %vm1340_vm3, %v4924_v50, 0.0 }
 0x460   : > { %4144 = vpow2.f32 %v1477_v57  ;;  %v1443_v60 = vsub.f32 %v4809_v61, %v1361_v56  ;;  %1534 = vadd.xlane.f32.xlu0 %v1533_v48 }
 0x461   : > { %4146 = vpow2.f32 %v1483_v54 }
 0x462   : > { %v1481_v39 = vmul.f32 1.442695, %v1443_v60  ;;  %v4933_v5 = vpop.eup %4138 }
 0x463   : > { %1435 = vmax.xlane.f32.xlu1 %v1434_v58  ;;  %v1542_v6 = vsel %vm1340_vm3, %v4933_v5, 0.0 }
 0x464   : > { %1432 = vmax.xlane.f32.xlu0 %v1431_v59  ;;  %4148 = vpow2.f32 %v1481_v39 }
 0x466   : > { %v4937_v3 = vpop.eup %4140 }
 0x467   : > { %v4941_v61 = vpop.eup %4142  ;;  %1543 = vadd.xlane.f32.xlu1 %v1542_v6  ;;  %v1539_v7 = vsel %vm1340_vm3, %v4937_v3, 0.0 }
 0x468   : > { %1540 = vadd.xlane.f32.xlu0 %v1539_v7  ;;  %v1548_v8 = vsel %vm1340_vm3, %v4941_v61, 0.0 }
 0x46a   : > { %v4945_v11 = vpop.eup %4144 }
 0x46b   : > { %v4949_v15 = vpop.eup %4146  ;;  %1549 = vadd.xlane.f32.xlu1 %v1548_v8  ;;  %v1545_v34 = vsel %vm1340_vm3, %v4945_v11, 0.0 }
 0x46c   : > { %1546 = vadd.xlane.f32.xlu0 %v1545_v34  ;;  %v1554_v27 = vsel %vm1340_vm3, %v4949_v15, 0.0 }
 0x46e   : > { %v4955_v20 = vpop.eup %4148 }
 0x46f   : > { %1555 = vadd.xlane.f32.xlu1 %v1554_v27  ;;  %v1551_v41 = vsel %vm1340_vm3, %v4955_v20, 0.0 }
 0x473   : > { %1552 = vadd.xlane.f32.xlu1 %v1551_v41 }
 0x493   : > { %v1370_v37 = vpop.xlane.xlu1 %1369 }
 0x494   : > { %v1446_v28 = vsub.f32 %v4817_v1, %v1370_v37  ;;  %v1367_v46 = vpop.xlane.xlu0 %1366 }
 0x495   : > { %v1445_v29 = vsub.f32 %v4819_v4, %v1367_v46 }
 0x496   : > { %v1487_v44 = vmul.f32 1.442695, %v1446_v28 }
 0x497   : > { %v1485_v48 = vmul.f32 1.442695, %v1445_v29 }
 0x498   : > { %4150 = vpow2.f32 %v1487_v44 }
 0x4a2   : > { %v4960_v36 = vpop.eup %4150 }
 0x4a3   : > { %v1560_v42 = vsel %vm1340_vm3, %v4960_v36, 0.0 }
 0x4a4   : > { %1561 = vadd.xlane.f32.xlu1 %v1560_v42 }
 0x4a7   : > { %v1394_v54 = vpop.xlane.xlu1 %1393 }
 0x4a8   : > { %v1454_v57 = vsub.f32 %v4837_v18, %v1394_v54  ;;  %v1391_v52 = vpop.xlane.xlu0 %1390 }
 0x4a9   : > { %v1453_v56 = vsub.f32 %v4839_v2, %v1391_v52 }
 0x4aa   : > { %v1503_v60 = vmul.f32 1.442695, %v1454_v57 }
 0x4ab   : > { %v1501_v1 = vmul.f32 1.442695, %v1453_v56  ;;  %v1376_v39 = vpop.xlane.xlu1 %1375 }
 0x4ac   : > { %4152 = vpow2.f32 %v1503_v60  ;;  %v1448_v58 = vsub.f32 %v4825_v63, %v1376_v39  ;;  %v1373_v59 = vpop.xlane.xlu0 %1372 }
 0x4ad   : > { %4154 = vpow2.f32 %v1501_v1  ;;  %v1447_v6 = vsub.f32 %v4827_v13, %v1373_v59 }
 0x4ae   : > { %4156 = vpow2.f32 %v1485_v48  ;;  %v1491_v7 = vmul.f32 1.442695, %v1448_v58 }
 0x4af   : > { %v1489_v4 = vmul.f32 1.442695, %v1447_v6  ;;  %v1400_v8 = vpop.xlane.xlu1 %1399 }
 0x4b0   : > { %4158 = vpow2.f32 %v1491_v7  ;;  %v1456_v18 = vsub.f32 %v4845_v22, %v1400_v8  ;;  %v1397_v34 = vpop.xlane.xlu0 %1396 }
 0x4b1   : > { %v1455_v2 = vsub.f32 %v4847_v23, %v1397_v34  ;;  %4160 = vpow2.f32 %v1489_v4 }
 0x4b2   : > { %v1507_v27 = vmul.f32 1.442695, %v1456_v18 }
 0x4b3   : > { %v1505_v41 = vmul.f32 1.442695, %v1455_v2  ;;  %v1382_v37 = vpop.xlane.xlu1 %1381 }
 0x4b4   : > { %4162 = vpow2.f32 %v1507_v27  ;;  %v1450_v63 = vsub.f32 %v4829_v16, %v1382_v37  ;;  %v1379_v28 = vpop.xlane.xlu0 %1378 }
 0x4b5   : > { %v1449_v13 = vsub.f32 %v4831_v9, %v1379_v28  ;;  %4164 = vpow2.f32 %v1505_v41 }
 0x4b6   : > { %v4972_v44 = vpop.eup %4152  ;;  %v1495_v42 = vmul.f32 1.442695, %v1450_v63 }
 0x4b7   : > { %v4975_v46 = vpop.eup %4154  ;;  %v1406_v22 = vpop.xlane.xlu1 %1405  ;;  %v1584_v23 = vsel %vm1340_vm3, %v4972_v44, 0.0  ;;  %v1493_v56 = vmul.f32 1.442695, %v1449_v13 }
 0x4b8   : > { %v4979_v29 = vpop.eup %4156  ;;  %v1458_v54 = vsub.f32 %v4853_v25, %v1406_v22  ;;  %v1403_v57 = vpop.xlane.xlu0 %1402  ;;  %1585 = vadd.xlane.f32.xlu0 %v1584_v23  ;;  %v1581_v16 = vsel %vm1340_vm3, %v4975_v46, 0.0  ;;  %4166 = vpow2.f32 %v1495_v42 }
 0x4b9   : > { %v1457_v52 = vsub.f32 %v4855_v12, %v1403_v57  ;;  %1582 = vadd.xlane.f32.xlu1 %v1581_v16  ;;  %v1557_v39 = vsel %vm1340_vm3, %v4979_v29, 0.0 }
 0x4ba   : > { %v4985_v9 = vpop.eup %4158  ;;  %v1511_v48 = vmul.f32 1.442695, %v1458_v54 }
 0x4bb   : > { %v1509_v60 = vmul.f32 1.442695, %v1457_v52  ;;  %v1388_v1 = vpop.xlane.xlu1 %1387  ;;  %v1566_v25 = vsel %vm1340_vm3, %v4985_v9, 0.0  ;;  %v4992_v12 = vpop.eup %4160 }
 0x4bc   : > { %4168 = vpow2.f32 %v1511_v48  ;;  %v1452_v58 = vsub.f32 %v4833_v10, %v1388_v1  ;;  %v1385_v59 = vpop.xlane.xlu0 %1384  ;;  %1558 = vadd.xlane.f32.xlu0 %v1557_v39  ;;  %v1563_v10 = vsel %vm1340_vm3, %v4992_v12, 0.0 }
 0x4bd   : > { %1567 = vadd.xlane.f32.xlu1 %v1566_v25  ;;  %4170 = vpow2.f32 %v1493_v56  ;;  %v1451_v41 = vsub.f32 %v4835_v17, %v1385_v59 }
 0x4be   : > { %v4994_v6 = vpop.eup %4162  ;;  %4172 = vpow2.f32 %v1509_v60  ;;  %v1499_v7 = vmul.f32 1.442695, %v1452_v58 }
 0x4bf   : > { %v1412_v4 = vpop.xlane.xlu1 %1411  ;;  %v1590_v8 = vsel %vm1340_vm3, %v4994_v6, 0.0  ;;  %v5001_v2 = vpop.eup %4164  ;;  %v1497_v23 = vmul.f32 1.442695, %v1451_v41 }
 0x4c0   : > { %v1460_v18 = vsub.f32 %v4861_v19, %v1412_v4  ;;  %1591 = vadd.xlane.f32.xlu0 %v1590_v8  ;;  %v1409_v34 = vpop.xlane.xlu0 %1408  ;;  %4174 = vpow2.f32 %v1499_v7  ;;  %v1587_v19 = vsel %vm1340_vm3, %v5001_v2, 0.0 }
 0x4c1   : > { %v1459_v27 = vsub.f32 %v4865_v24, %v1409_v34  ;;  %1564 = vadd.xlane.f32.xlu1 %v1563_v10 }
 0x4c2   : > { %v1515_v37 = vmul.f32 1.442695, %v1460_v18  ;;  %v5007_v42 = vpop.eup %4166 }
 0x4c3   : > { %v1513_v63 = vmul.f32 1.442695, %v1459_v27  ;;  %v1418_v28 = vpop.xlane.xlu1 %1417  ;;  %v1572_v56 = vsel %vm1340_vm3, %v5007_v42, 0.0 }
 0x4c4   : > { %v1415_v13 = vpop.xlane.xlu0 %1414  ;;  %v1462_v24 = vsub.f32 %v4863_v30, %v1418_v28 }
 0x4c5   : > { %4176 = vpow2.f32 %v1513_v63  ;;  %1588 = vadd.xlane.f32.xlu1 %v1587_v19  ;;  %v1461_v39 = vsub.f32 %v4867_v26, %v1415_v13 }
 0x4c6   : > { %v5009_v22 = vpop.eup %4168  ;;  %4178 = vpow2.f32 %v1515_v37  ;;  %v1519_v1 = vmul.f32 1.442695, %v1462_v24 }
 0x4c7   : > { %v1424_v54 = vpop.xlane.xlu1 %1423  ;;  %v1596_v17 = vsel %vm1340_vm3, %v5009_v22, 0.0  ;;  %v5014_v57 = vpop.eup %4170  ;;  %4180 = vpow2.f32 %v1497_v23  ;;  %v1517_v4 = vmul.f32 1.442695, %v1461_v39 }
 0x4c8   : > { %v1464_v16 = vsub.f32 %v4873_v32, %v1424_v54  ;;  %1597 = vadd.xlane.f32.xlu0 %v1596_v17  ;;  %v1421_v52 = vpop.xlane.xlu0 %1420  ;;  %v5019_v48 = vpop.eup %4172  ;;  %v1569_v58 = vsel %vm1340_vm3, %v5014_v57, 0.0 }
 0x4c9   : > { %v1463_v60 = vsub.f32 %v4875_v35, %v1421_v52  ;;  %1573 = vadd.xlane.f32.xlu1 %v1572_v56  ;;  %v1593_v59 = vsel %vm1340_vm3, %v5019_v48, 0.0 }
 0x4ca   : > { %v1523_v30 = vmul.f32 1.442695, %v1464_v16  ;;  %v5027_v7 = vpop.eup %4174 }
 0x4cb   : > { %v1521_v25 = vmul.f32 1.442695, %v1463_v60  ;;  %v1430_v32 = vpop.xlane.xlu1 %1429  ;;  %v1578_v18 = vsel %vm1340_vm3, %v5027_v7, 0.0 }
 0x4cc   : > { %4182 = vpow2.f32 %v1523_v30  ;;  %1570 = vadd.xlane.f32.xlu0 %v1569_v58  ;;  %v1466_v26 = vsub.f32 %v4881_v55, %v1430_v32  ;;  %v1427_v8 = vpop.xlane.xlu0 %1426 }
 0x4cd   : > { %1594 = vadd.xlane.f32.xlu1 %v1593_v59  ;;  %4184 = vpow2.f32 %v1521_v25  ;;  %v1465_v41 = vsub.f32 %v4883_v43, %v1427_v8  ;;  %v4067_v8 = vunpack.i.h.bf16 %v4754_v14 }
 0x4ce   : > { %4186 = vpow2.f32 %v1519_v1  ;;  %v1527_v27 = vmul.f32 1.442695, %v1466_v26 }
 0x4cf   : > { %v5029_v35 = vpop.eup %4176  ;;  %4188 = vpow2.f32 %v1517_v4  ;;  %v1525_v28 = vmul.f32 1.442695, %v1465_v41 }
 0x4d0   : > { %v1599_v34 = vsel %vm1340_vm3, %v5029_v35, 0.0  ;;  %v5036_v10 = vpop.eup %4178  ;;  %4190 = vpow2.f32 %v1527_v27 }
 0x4d1   : > { %1579 = vadd.xlane.f32.xlu1 %v1578_v18  ;;  %1600 = vadd.xlane.f32.xlu0 %v1599_v34  ;;  %v5039_v37 = vpop.eup %4180  ;;  %v1602_v55 = vsel %vm1340_vm3, %v5036_v10, 0.0  ;;  %4192 = vpow2.f32 %v1525_v28  ;;  %v4066_v18 = vunpack.i.l.bf16 %v4754_v14 }
 0x4d2   : > { %v1575_v23 = vsel %vm1340_vm3, %v5039_v37, 0.0 }
 0x4d3   : > { %v3849_v14 = vpack.c.bf16 %v4067_v8, %v4066_v18 }
 0x4d5   : > { %1603 = vadd.xlane.f32.xlu1 %v1602_v55 }
 0x4d6   : > { %v5043_v63 = vpop.eup %4182 }
 0x4d7   : > { %v1614_v13 = vsel %vm1340_vm3, %v5043_v63, 0.0  ;;  %v5047_v19 = vpop.eup %4184 }
 0x4d8   : > { %1615 = vadd.xlane.f32.xlu0 %v1614_v13  ;;  %v5051_v43 = vpop.eup %4186  ;;  %v1611_v24 = vsel %vm1340_vm3, %v5047_v19, 0.0 }
 0x4d9   : > { %1576 = vadd.xlane.f32.xlu1 %v1575_v23  ;;  %v1608_v54 = vsel %vm1340_vm3, %v5051_v43, 0.0  ;;  %v5057_v17 = vpop.eup %4188 }
 0x4da   : > { %v1605_v16 = vsel %vm1340_vm3, %v5057_v17, 0.0  ;;  %v5061_v52 = vpop.eup %4190 }
 0x4db   : > { %v1620_v56 = vsel %vm1340_vm3, %v5061_v52, 0.0  ;;  %v5065_v60 = vpop.eup %4192 }
 0x4dc   : > { %1612 = vadd.xlane.f32.xlu0 %v1611_v24  ;;  %v1617_v30 = vsel %vm1340_vm3, %v5065_v60, 0.0 }
 0x4dd   : > { %1609 = vadd.xlane.f32.xlu1 %v1608_v54 }
 0x4e1   : > { %1606 = vadd.xlane.f32.xlu1 %v1605_v16 }
 0x4e5   : > { %1621 = vadd.xlane.f32.xlu1 %v1620_v56 }
 0x4e9   : > { %1618 = vadd.xlane.f32.xlu1 %v1617_v30  ;;  %v4081_v30 = vunpack.i.l.bf16 %v4911_v62 }
 0x4ec   : > { %v1538_v1 = vpop.xlane.xlu1 %1537 }
 0x4ed   : > { %4194 = vrcp.f32 %v1538_v1  ;;  %v1535_v39 = vpop.xlane.xlu0 %1534 }
 0x4ee   : > { %4196 = vrcp.f32 %v1535_v39 }
 0x4f0   : > { %v1436_v25 = vpop.xlane.xlu1 %1435 }
 0x4f1   : > { %v1433_v58 = vpop.xlane.xlu0 %1432 }
 0x4f2   : > { %4104 = vrot.lane.b32.xlu0 %v4608_v21, %s4298_s25  ;;  %v4072_v21 = vunpack.i.h.bf16 %v4752_v31  ;;  %v1467_v16 = vsub.f32 %v4891_v33, %v1433_v58 }
 0x4f4   : > { %v1544_v32 = vpop.xlane.xlu1 %1543  ;;  %v1529_v33 = vmul.f32 1.442695, %v1467_v16 }
 0x4f5   : > { %v1541_v59 = vpop.xlane.xlu0 %1540  ;;  %4198 = vrcp.f32 %v1544_v32 }
 0x4f6   : > { %4109 = vrot.lane.b32.xlu0 %v4618_v51, %s4298_s25  ;;  %4200 = vrcp.f32 %v1541_v59  ;;  %v4071_v51 = vunpack.i.l.bf16 %v4752_v31 }
 0x4f7   : > { %v4195_v4 = vpop.eup %4194 }
 0x4f8   : > { %v4197_v26 = vpop.eup %4196  ;;  %v1550_v34 = vpop.xlane.xlu1 %1549  ;;  %v1662_v55 = vmul.f32 %v4195_v4, %v4922_v38  ;;  %v1468_v38 = vsub.f32 %v4889_v47, %v1436_v25  ;;  %v3853_v23 = vpack.c.bf16 %v4072_v21, %v4071_v51  ;;  %v4082_v47 = vunpack.i.h.bf16 %v4911_v62 }
 0x4f9   : > { %v1547_v27 = vpop.xlane.xlu0 %1546  ;;  %v1661_v41 = vmul.f32 %v4197_v26, %v4924_v50  ;;  %v4097_v50 = vunpack.i.h.bf16 %v4913_v0 }
 0x4fa   : > { %4202 = vrcp.f32 %v1547_v27  ;;  %4099 = vrot.lane.b32.xlu1 %v4598_v45, %s4298_s25  ;;  %v4096_v45 = vunpack.i.l.bf16 %v4913_v0  ;;  %v1531_v54 = vmul.f32 1.442695, %v1468_v38  ;;  %v3877_v58 = vpack.c.bf16 %v4082_v47, %v4081_v30 }
 0x4fb   : > { %4204 = vrcp.f32 %v1550_v34  ;;  %3545 = vmatprep.mubr.msk.f32.mxu0 %vm1340_vm3, %v1661_v41  ;;  %v4091_v38 = vunpack.i.l.bf16 %v4909_v49 }
 0x4fc   : > { %v1556_v28 = vpop.xlane.xlu1 %1555  ;;  %3546 = vmatmul.mubr.msk.f32.vlgmr.msra.gmra.mrb[24].mxu0 %vm1340_vm3, %v1662_v55  ;;  %v3857_v1 = vpack.c.bf16 %v4097_v50, %v4096_v45 }
 0x4fd   : > { %3848 = vmatpush3.bf16.msra.mxu0 %v4782_v40  ;;  %4206 = vrcp.f32 %v1556_v28 }
 0x4fe   : > { %3850 = vmatprep.subr.bf16.mxu0 %v3849_v14 }
 0x4ff   : > { %v4199_v24 = vpop.eup %4198 }
 0x500   : > { %v1553_v13 = vpop.xlane.xlu1 %1552  ;;  %v4201_v31 = vpop.eup %4200  ;;  %v1664_v0 = vmul.f32 %v4199_v24, %v4933_v5 }
 0x501   : > { %4208 = vrcp.f32 %v1553_v13  ;;  %3852 = vmatpush3.bf16.msra.mxu0 %v3849_v14  ;;  %v1663_v40 = vmul.f32 %v4201_v31, %v4937_v3  ;;  %v4092_v14 = vunpack.i.h.bf16 %v4909_v49 }
 0x502   : > { %3854 = vmatprep.subr.bf16.mxu0 %v3853_v23  ;;  %4210 = vpow2.f32 %v1531_v54 }
 0x503   : > { %3548 = vmatprep.mubr.msk.f32.mxu0 %vm1340_vm3, %v1663_v40  ;;  %4212 = vpow2.f32 %v1529_v33 }
 0x504   : > { %v4203_v56 = vpop.eup %4202  ;;  %3549 = vmatmul.mubr.msk.f32.gmra.mrb[26].mxu0 %vm1340_vm3, %v1664_v0 }
 0x505   : > { %v4205_v39 = vpop.eup %4204  ;;  %3856 = vmatpush3.bf16.msra.mxu0 %v3853_v23  ;;  %v1665_v25 = vmul.f32 %v4203_v56, %v4945_v11 }
 0x506   : > { %3858 = vmatprep.subr.bf16.mxu0 %v3857_v1  ;;  %v1666_v3 = vmul.f32 %v4205_v39, %v4941_v61 }
 0x507   : > { %3551 = vmatprep.mubr.msk.f32.mxu0 %vm1340_vm3, %v1665_v25  ;;  %v4207_v62 = vpop.eup %4206 }
 0x508   : > { %3552 = vmatmul.mubr.msk.f32.gmra.mrb[28].mxu0 %vm1340_vm3, %v1666_v3  ;;  %v1668_v11 = vmul.f32 %v4207_v62, %v4949_v15 }
 0x509   : > { %3860 = vmatpush3.bf16.msra.mxu0 %v3857_v1 }
 0x50a   : > { %3878 = vmatprep.subr.bf16.mxu0 %v3877_v58 }
 0x50b   : > { %v4209_v5 = vpop.eup %4208 }
 0x50c   : > { %v1667_v32 = vmul.f32 %v4209_v5, %v4955_v20  ;;  %v5102_v59 = vpop.eup %4210 }
 0x50d   : > { %v1626_v61 = vsel %vm1340_vm3, %v5102_v59, 0.0  ;;  %v5106_v4 = vpop.eup %4212 }
 0x50e   : > { %3554 = vmatprep.mubr.msk.f32.mxu0 %vm1340_vm3, %v1667_v32  ;;  %v1623_v26 = vsel %vm1340_vm3, %v5106_v4, 0.0 }
 0x50f   : > { %3555 = vmatmul.mubr.msk.f32.gmra.mrb[30].mxu0 %vm1340_vm3, %v1668_v11 }
 0x515   : > { %1627 = vadd.xlane.f32.xlu0 %v1626_v61 }
 0x519   : > { %1624 = vadd.xlane.f32.xlu0 %v1623_v26 }
 0x52f   : > { %4114 = vrot.lane.b32.xlu0 %v4626_v53, %s4298_s25 }
 0x531   : > { %v1562_v15 = vpop.xlane.xlu1 %1561 }
 0x545   : > { %v5112_v20 = vpop.xlane.xlu0 %1585 }
 0x546   : > { %v1583_v8 = vpop.xlane.xlu1 %1582 }
 0x547   : > { %4214 = vrcp.f32 %v1583_v8 }
 0x548   : > { %4216 = vrcp.f32 %v1562_v15 }
 0x549   : > { %v1559_v18 = vpop.xlane.xlu0 %1558 }
 0x54a   : > { %4218 = vrcp.f32 %v1559_v18  ;;  %v1568_v34 = vpop.xlane.xlu1 %1567 }
 0x54b   : > { %4220 = vrcp.f32 %v1568_v34 }
 0x54d   : > { %v5114_v55 = vpop.xlane.xlu0 %1591 }
 0x54e   : > { %v1565_v27 = vpop.xlane.xlu1 %1564 }
 0x54f   : > { %4222 = vrcp.f32 %v1565_v27 }
 0x551   : > { %v4215_v41 = vpop.eup %4214 }
 0x552   : > { %v1589_v21 = vpop.xlane.xlu1 %1588  ;;  %v1677_v51 = vmul.f32 %v4215_v41, %v4975_v46  ;;  %v4217_v28 = vpop.eup %4216  ;;  %v3881_v46 = vpack.c.bf16 %v4092_v14, %v4091_v38 }
 0x553   : > { %v1670_v13 = vmul.f32 %v4217_v28, %v4960_v36 }
 0x554   : > { %v4219_v53 = vpop.eup %4218  ;;  %3601 = vmatprep.mubr.msk.f32.mxu1 %vm1340_vm3, %v1677_v51 }
 0x555   : > { %v5120_v50 = vpop.xlane.xlu0 %1597  ;;  %v1669_v45 = vmul.f32 %v4219_v53, %v4979_v29  ;;  %v4221_v24 = vpop.eup %4220 }
 0x556   : > { %v1574_v23 = vpop.xlane.xlu1 %1573  ;;  %v1672_v36 = vmul.f32 %v4221_v24, %v4985_v9 }
 0x557   : > { %3573 = vmatprep.mubr.msk.f32.mxu0 %vm1340_vm3, %v1669_v45  ;;  %4224 = vrcp.f32 %v1574_v23 }
 0x558   : > { %3574 = vmatmul.mubr.msk.f32.vlgmr.msra.gmra.mrb[32].mxu0 %vm1340_vm3, %v1670_v13 }
 0x559   : > { %v4223_v31 = vpop.eup %4222  ;;  %3880 = vmatpush3.bf16.msra.mxu0 %v3877_v58  ;;  %v1571_v54 = vpop.xlane.xlu0 %1570 }
 0x55a   : > { %3882 = vmatprep.subr.bf16.mxu0 %v3881_v46  ;;  %4226 = vrcp.f32 %v1571_v54  ;;  %v1595_v49 = vpop.xlane.xlu1 %1594  ;;  %v1671_v16 = vmul.f32 %v4223_v31, %v4992_v12 }
 0x55c   : > { %3576 = vmatprep.mubr.msk.f32.mxu0 %vm1340_vm3, %v1671_v16 }
 0x55d   : > { %3884 = vmatpush3.bf16.msra.mxu0 %v3881_v46 }
 0x55e   : > { %3577 = vmatmul.mubr.msk.f32.gmra.mrb[34].mxu0 %vm1340_vm3, %v1672_v36  ;;  %v1580_v29 = vpop.xlane.xlu1 %1579  ;;  %v1601_v40 = vpop.xlane.xlu0 %1600 }
 0x55f   : > { %4228 = vrcp.f32 %v1580_v29 }
 0x561   : > { %v4225_v47 = vpop.eup %4224 }
 0x562   : > { %v1604_v56 = vpop.xlane.xlu1 %1603  ;;  %v1674_v12 = vmul.f32 %v4225_v47, %v5007_v42 }
 0x564   : > { %v4227_v30 = vpop.eup %4226 }
 0x565   : > { %v5130_v0 = vpop.xlane.xlu0 %1615  ;;  %v1673_v1 = vmul.f32 %v4227_v30, %v5014_v57 }
 0x566   : > { %v1577_v39 = vpop.xlane.xlu1 %1576 }
 0x567   : > { %4230 = vrcp.f32 %v1577_v39  ;;  %3579 = vmatprep.mubr.msk.f32.mxu0 %vm1340_vm3, %v1673_v1 }
 0x568   : > { %3580 = vmatmul.mubr.msk.f32.gmra.mrb[36].mxu0 %vm1340_vm3, %v1674_v12 }
 0x569   : > { %v1613_v9 = vpop.xlane.xlu0 %1612  ;;  %v4229_v5 = vpop.eup %4228 }
 0x56a   : > { %v1610_v25 = vpop.xlane.xlu1 %1609  ;;  %v1676_v42 = vmul.f32 %v4229_v5, %v5027_v7 }
 0x56d   : > { %v4105_v33 = vpop.permute.xlu0 %4104 }
 0x56e   : > { %v4107_v3 = vunpack.i.h.bf16 %v4105_v33  ;;  %v4106_v58 = vunpack.i.l.bf16 %v4105_v33  ;;  %v1607_v62 = vpop.xlane.xlu1 %1606 }
 0x56f   : > { %4232 = vrcp.f32 %v1607_v62 }
 0x570   : > { %v3885_v32 = vpack.c.bf16 %v4107_v3, %v4106_v58  ;;  %4234 = vrcp.f32 %v5112_v20 }
 0x571   : > { %v4231_v11 = vpop.eup %4230  ;;  %v4110_v15 = vpop.permute.xlu0 %4109  ;;  %4236 = vrcp.f32 %v1589_v21 }
 0x572   : > { %v1622_v57 = vpop.xlane.xlu1 %1621  ;;  %3886 = vmatprep.subr.bf16.mxu0 %v3885_v32  ;;  %v1675_v61 = vmul.f32 %v4231_v11, %v5039_v37  ;;  %v4112_v27 = vunpack.i.h.bf16 %v4110_v15  ;;  %v4111_v41 = vunpack.i.l.bf16 %v4110_v15  ;;  %4238 = vrcp.f32 %v5114_v55 }
 0x573   : > { %3888 = vmatpush3.bf16.msra.mxu0 %v3885_v32  ;;  %4240 = vrcp.f32 %v1595_v49 }
 0x574   : > { %3582 = vmatprep.mubr.msk.f32.mxu0 %vm1340_vm3, %v1675_v61  ;;  %v3873_v28 = vpack.c.bf16 %v4112_v27, %v4111_v41  ;;  %4242 = vrcp.f32 %v5120_v50  ;;  %v2427_v27 = vld [vmem:[%s5455_s5] sm:$0xff]  ;;  %v2428_v41 = vld [vmem:[%s5455_s5 + $0x8] sm:$0xff] }
 0x575   : > { %3583 = vmatmul.mubr.msk.f32.gmra.mrb[38].mxu0 %vm1340_vm3, %v1676_v42  ;;  %4244 = vrcp.f32 %v1601_v40 }
 0x576   : > { %v1619_v26 = vpop.xlane.xlu1 %1618  ;;  %4246 = vrcp.f32 %v1604_v56 }
 0x577   : > { %4248 = vrcp.f32 %v1610_v25 }
 0x578   : > { %4250 = vrcp.f32 %v1613_v9 }
 0x579   : > { %v4233_v8 = vpop.eup %4232  ;;  %4252 = vrcp.f32 %v5130_v0 }
 0x57a   : > { %v4100_v18 = vpop.permute.xlu1 %4099  ;;  %v1685_v34 = vmul.f32 %v4233_v8, %v5057_v17  ;;  %v4235_v20 = vpop.eup %4234  ;;  %4254 = vrcp.f32 %v1619_v26 }
 0x57b   : > { %v4102_v51 = vunpack.i.h.bf16 %v4100_v18  ;;  %v4101_v37 = vunpack.i.l.bf16 %v4100_v18  ;;  %v4237_v21 = vpop.eup %4236  ;;  %v1678_v17 = vmul.f32 %v4235_v20, %v4972_v44  ;;  %4256 = vrcp.f32 %v1622_v57 }
 0x57c   : > { %3629 = vmatprep.mubr.msk.f32.mxu0 %vm1340_vm3, %v1685_v34  ;;  %v4239_v53 = vpop.eup %4238  ;;  %v1679_v55 = vmul.f32 %v4237_v21, %v5001_v2 }
 0x57d   : > { %v3869_v7 = vpack.c.bf16 %v4102_v51, %v4101_v37  ;;  %v4241_v14 = vpop.eup %4240  ;;  %v1680_v38 = vmul.f32 %v4239_v53, %v4994_v6  ;;  %v2429_v51 = vld [vmem:[%s5455_s5 + $0x10] sm:$0xff]  ;;  %v3893_v37 = vpack.c.bf16 %v2428_v41, %v2427_v27 }
 0x57e   : > { %v4243_v50 = vpop.eup %4242  ;;  %v1681_v45 = vmul.f32 %v4241_v14, %v5019_v48 }
 0x57f   : > { %3870 = vmatprep.subr.bf16.mxu1 %v3869_v7  ;;  %v4245_v13 = vpop.eup %4244  ;;  %v1682_v44 = vmul.f32 %v4243_v50, %v5009_v22 }
 0x580   : > { %3872 = vmatpush3.bf16.msra.mxu1 %v3869_v7  ;;  %v4247_v23 = vpop.eup %4246  ;;  %v1683_v2 = vmul.f32 %v4245_v13, %v5029_v35  ;;  %v2430_v7 = vld [vmem:[%s5455_s5 + $0x18] sm:$0xff] }
 0x581   : > { %3874 = vmatprep.subr.bf16.mxu1 %v3873_v28  ;;  %v1684_v24 = vmul.f32 %v4247_v23, %v5036_v10  ;;  %v4249_v54 = vpop.eup %4248 }
 0x582   : > { %v4251_v49 = vpop.eup %4250  ;;  %v1686_v10 = vmul.f32 %v4249_v54, %v5051_v43 }
 0x583   : > { %v4253_v16 = vpop.eup %4252  ;;  %v1687_v36 = vmul.f32 %v4251_v49, %v5047_v19 }
 0x584   : > { %3876 = vmatpush3.bf16.msra.mxu1 %v3873_v28  ;;  %v4255_v29 = vpop.eup %4254  ;;  %v1688_v40 = vmul.f32 %v4253_v16, %v5043_v63  ;;  %v3897_v28 = vpack.c.bf16 %v2430_v7, %v2429_v51 }
 0x585   : > { %v4257_v56 = vpop.eup %4256  ;;  %v1689_v47 = vmul.f32 %v4255_v29, %v5065_v60  ;;  %3894 = vmatprep.subr.bf16.mxu1 %v3893_v37 }
 0x586   : > { %v1690_v43 = vmul.f32 %v4257_v56, %v5061_v52 }
 0x587   : > { %3602 = vmatmul.mubr.msk.f32.vlgmr.msra.gmra.mrb[16].mxu1 %vm1340_vm3, %v1678_v17 }
 0x588   : > { %3604 = vmatprep.mubr.msk.f32.mxu1 %vm1340_vm3, %v1679_v55  ;;  %3896 = vmatpush3.bf16.msra.mxu1 %v3893_v37  ;;  %v4278_v37 = vld [vmem:[%s4376_s22 + $0x8] sm:$0xff] }
 0x589   : > { %3898 = vmatprep.subr.bf16.mxu1 %v3897_v28 }
 0x58b   : > { %3605 = vmatmul.mubr.msk.f32.gmra.mrb[18].mxu1 %vm1340_vm3, %v1680_v38 }
 0x58c   : > { %3607 = vmatprep.mubr.msk.f32.mxu1 %vm1340_vm3, %v1681_v45  ;;  %3900 = vmatpush3.bf16.msra.mxu1 %v3897_v28  ;;  %v4279_v28 = vld [vmem:[%s4376_s22] sm:$0xff] }
 0x58f   : > { %3608 = vmatmul.mubr.msk.f32.gmra.mrb[20].mxu1 %vm1340_vm3, %v1682_v44 }
 0x590   : > { %3610 = vmatprep.mubr.msk.f32.mxu1 %vm1340_vm3, %v1683_v2 }
 0x593   : > { %3611 = vmatmul.mubr.msk.f32.gmra.mrb[22].mxu1 %vm1340_vm3, %v1684_v24 }
 0x5a2   : > { %v1628_v6 = vpop.xlane.xlu0 %1627 }
 0x5a6   : > { %v1625_v48 = vpop.xlane.xlu0 %1624 }
 0x5a7   : > { %4258 = vrcp.f32 %v1625_v48 }
 0x5a8   : > { %4260 = vrcp.f32 %v1628_v6 }
 0x5aa   : > { %v4115_v46 = vpop.permute.xlu0 %4114 }
 0x5ab   : > { %v4117_v22 = vunpack.i.h.bf16 %v4115_v46  ;;  %v4116_v31 = vunpack.i.l.bf16 %v4115_v46 }
 0x5ad   : > { %v3889_v35 = vpack.c.bf16 %v4117_v22, %v4116_v31 }
 0x5af   : > { %3890 = vmatprep.subr.bf16.mxu0 %v3889_v35 }
 0x5b0   : > { %3892 = vmatpush3.bf16.msra.mxu0 %v3889_v35 }
 0x5b1   : > { %v4259_v30 = vpop.eup %4258 }
 0x5b2   : > { %v4261_v0 = vpop.eup %4260  ;;  %v1691_v19 = vmul.f32 %v4259_v30, %v5106_v4 }
 0x5b3   : > { %3630 = vmatmul.mubr.msk.f32.vlgmr.msra.gmra.mrb[40].mxu0 %vm1340_vm3, %v1686_v10  ;;  %v1692_v1 = vmul.f32 %v4261_v0, %v5102_v59 }
 0x5b4   : > { %3632 = vmatprep.mubr.msk.f32.mxu0 %vm1340_vm3, %v1687_v36 }
 0x5b7   : > { %3633 = vmatmul.mubr.msk.f32.gmra.mrb[42].mxu0 %vm1340_vm3, %v1688_v40 }
 0x5b8   : > { %3635 = vmatprep.mubr.msk.f32.mxu0 %vm1340_vm3, %v1689_v47 }
 0x5bb   : > { %3636 = vmatmul.mubr.msk.f32.gmra.mrb[44].mxu0 %vm1340_vm3, %v1690_v43 }
 0x5bc   : > { %3638 = vmatprep.mubr.msk.f32.mxu0 %vm1340_vm3, %v1691_v19 }
 0x5bf   : > { %3639 = vmatmul.mubr.msk.f32.gmra.mrb[46].mxu0 %vm1340_vm3, %v1692_v1 }
 0x5cf   : > { %v5174_v63 = vpop.f32.mrb[24].mxu0 }
 0x5d0   : > { %v5176_v60 = vpop.f32.mrb[25].mxu0 }
 0x5d7   : > { %v5178_v39 = vpop.f32.mrb[26].mxu0 }
 0x5d8   : > { %v5180_v12 = vpop.f32.mrb[27].mxu0 }
 0x5db   : > { %v5182_v52 = vpop.f32.mrb[28].mxu0 }
 0x5dc   : > { %v5184_v9 = vpop.f32.mrb[29].mxu0 }
 0x5e2   : > { %v5186_v4 = vpop.f32.mrb[30].mxu0 }
 0x5e3   : > { %v5188_v25 = vpop.f32.mrb[31].mxu0 }
 0x62b   : > { %v3575_v33 = vpop.f32.mrb[32].mxu0 }
 0x62c   : > { %2315 = vrot.lane.b32.xlu1 %v3575_v33, %s4299_s26  ;;  %v1960_v59 = vpop.f32.mrb[33].mxu0 }
 0x62d   : > { %2313 = vrot.lane.b32.xlu0 %v1960_v59, %s4299_s26 }
 0x631   : > { %v3578_v3 = vpop.f32.mrb[34].mxu0 }
 0x632   : > { %v1970_v58 = vpop.f32.mrb[35].mxu0 }
 0x63b   : > { %v3581_v62 = vpop.f32.mrb[36].mxu0 }
 0x63c   : > { %v1980_v5 = vpop.f32.mrb[37].mxu0 }
 0x648   : > { %v3584_v32 = vpop.f32.mrb[38].mxu0 }
 0x649   : > { %v1990_v11 = vpop.f32.mrb[39].mxu0 }
 0x65a   : > { %v3603_v57 = vpop.f32.mrb[16].mxu1 }
 0x65b   : > { %2347 = vrot.lane.b32.xlu1 %v3603_v57, %s4300_s27  ;;  %v2113_v61 = vpop.f32.mrb[17].mxu1 }
 0x65c   : > { %2345 = vrot.lane.b32.xlu0 %v2113_v61, %s4300_s27 }
 0x65e   : > { %v3606_v42 = vpop.f32.mrb[18].mxu1 }
 0x65f   : > { %2319 = vrot.lane.b32.xlu1 %v3578_v3, %s4299_s26  ;;  %v2123_v26 = vpop.f32.mrb[19].mxu1 }
 0x660   : > { %2317 = vrot.lane.b32.xlu0 %v1970_v58, %s4299_s26 }
 0x662   : > { %v3609_v15 = vpop.f32.mrb[20].mxu1 }
 0x663   : > { %2351 = vrot.lane.b32.xlu1 %v3606_v42, %s4300_s27  ;;  %v2133_v8 = vpop.f32.mrb[21].mxu1 }
 0x664   : > { %2349 = vrot.lane.b32.xlu0 %v2123_v26, %s4300_s27 }
 0x666   : > { %v3612_v18 = vpop.f32.mrb[22].mxu1 }
 0x667   : > { %2323 = vrot.lane.b32.xlu1 %v3581_v62, %s4299_s26  ;;  %v2143_v34 = vpop.f32.mrb[23].mxu1 }
 0x668   : > { %2321 = vrot.lane.b32.xlu0 %v1980_v5, %s4299_s26 }
 0x66b   : > { %2355 = vrot.lane.b32.xlu1 %v3609_v15, %s4300_s27 }
 0x66c   : > { %2353 = vrot.lane.b32.xlu0 %v2133_v8, %s4300_s27 }
 0x66f   : > { %2327 = vrot.lane.b32.xlu1 %v3584_v32, %s4299_s26 }
 0x670   : > { %2325 = vrot.lane.b32.xlu0 %v1990_v11, %s4299_s26 }
 0x673   : > { %2359 = vrot.lane.b32.xlu1 %v3612_v18, %s4300_s27 }
 0x674   : > { %2357 = vrot.lane.b32.xlu0 %v2143_v34, %s4300_s27 }
 0x686   : > { %v3631_v20 = vpop.f32.mrb[40].mxu0 }
 0x687   : > { %2379 = vrot.lane.b32.xlu1 %v3631_v20, %s4301_s19  ;;  %v2266_v21 = vpop.f32.mrb[41].mxu0 }
 0x688   : > { %2377 = vrot.lane.b32.xlu0 %v2266_v21, %s4301_s19 }
 0x68a   : > { %v3634_v17 = vpop.f32.mrb[42].mxu0 }
 0x68b   : > { %2383 = vrot.lane.b32.xlu1 %v3634_v17, %s4301_s19  ;;  %v2276_v53 = vpop.f32.mrb[43].mxu0 }
 0x68c   : > { %2381 = vrot.lane.b32.xlu0 %v2276_v53, %s4301_s19 }
 0x68e   : > { %v3637_v55 = vpop.f32.mrb[44].mxu0 }
 0x68f   : > { %2387 = vrot.lane.b32.xlu1 %v3637_v55, %s4301_s19  ;;  %v2286_v14 = vpop.f32.mrb[45].mxu0 }
 0x690   : > { %2385 = vrot.lane.b32.xlu0 %v2286_v14, %s4301_s19 }
 0x692   : > { %v3640_v38 = vpop.f32.mrb[46].mxu0 }
 0x693   : > { %2391 = vrot.lane.b32.xlu1 %v3640_v38, %s4301_s19  ;;  %v2296_v50 = vpop.f32.mrb[47].mxu0 }
 0x694   : > { %2389 = vrot.lane.b32.xlu0 %v2296_v50, %s4301_s19  ;;  %v4280_v50 = vld [vmem:[%s4376_s22 + $0x18] sm:$0xff] }
 0x69e   : > { %v2316_v45 = vpop.permute.xlu1 %2315 }
 0x69f   : > { %v2314_v13 = vpop.permute.xlu0 %2313  ;;  %v2402_v40 = vsel %vm743_vm1, %v5174_v63, %v2316_v45 }
 0x6a0   : > { %v2401_v36 = vsel %vm743_vm1, %v5176_v60, %v2314_v13 }
 0x6cd   : > { %v2348_v44 = vpop.permute.xlu1 %2347 }
 0x6ce   : > { %v2346_v23 = vpop.permute.xlu0 %2345  ;;  %v2411_v30 = vsel %vm2409_vm4, %v2402_v40, %v2348_v44  ;;  %v4284_v40 = vld [vmem:[%s4376_s22 + $0x38] sm:$0xff] }
 0x6cf   : > { %v2410_v56 = vsel %vm2409_vm4, %v2401_v36, %v2346_v23 }
 0x6d1   : > { %v2320_v2 = vpop.permute.xlu1 %2319 }
 0x6d2   : > { %v2318_v24 = vpop.permute.xlu0 %2317  ;;  %v2404_v63 = vsel %vm743_vm1, %v5178_v39, %v2320_v2 }
 0x6d3   : > { %v2403_v19 = vsel %vm743_vm1, %v5180_v12, %v2318_v24  ;;  %v4281_v24 = vld [vmem:[%s4376_s22 + $0x10] sm:$0xff] }
 0x6d5   : > { %v2352_v6 = vpop.permute.xlu1 %2351 }
 0x6d6   : > { %v2350_v48 = vpop.permute.xlu0 %2349  ;;  %v2413_v59 = vsel %vm2409_vm4, %v2404_v63, %v2352_v6 }
 0x6d7   : > { %v2412_v60 = vsel %vm2409_vm4, %v2403_v19, %v2350_v48 }
 0x6d9   : > { %v2324_v46 = vpop.permute.xlu1 %2323 }
 0x6da   : > { %v2322_v22 = vpop.permute.xlu0 %2321  ;;  %v2406_v39 = vsel %vm743_vm1, %v5182_v52, %v2324_v46  ;;  %v4282_v46 = vld [vmem:[%s4376_s22 + $0x28] sm:$0xff] }
 0x6db   : > { %v2405_v12 = vsel %vm743_vm1, %v5184_v9, %v2322_v22 }
 0x6dd   : > { %v2356_v31 = vpop.permute.xlu1 %2355 }
 0x6de   : > { %v2354_v35 = vpop.permute.xlu0 %2353  ;;  %v2415_v11 = vsel %vm2409_vm4, %v2406_v39, %v2356_v31 }
 0x6df   : > { %v2414_v5 = vsel %vm2409_vm4, %v2405_v12, %v2354_v35 }
 0x6e1   : > { %v2328_v54 = vpop.permute.xlu1 %2327 }
 0x6e2   : > { %v2326_v49 = vpop.permute.xlu0 %2325  ;;  %v2408_v52 = vsel %vm743_vm1, %v5186_v4, %v2328_v54 }
 0x6e3   : > { %v2407_v9 = vsel %vm743_vm1, %v5188_v25, %v2326_v49  ;;  %v3186_v25 = vld [vmem:[%s5456_s6] ss:$0 sm:$0xff] }
 0x6e5   : > { %v2360_v10 = vpop.permute.xlu1 %2359 }
 0x6e6   : > { %v2358_v16 = vpop.permute.xlu0 %2357  ;;  %v2417_v8 = vsel %vm2409_vm4, %v2408_v52, %v2360_v10  ;;  %v4283_v10 = vld [vmem:[%s4376_s22 + $0x20] sm:$0xff] }
 0x6e7   : > { %v2416_v26 = vsel %vm2409_vm4, %v2407_v9, %v2358_v16 }
 0x6f9   : > { %v2380_v29 = vpop.permute.xlu1 %2379 }
 0x6fa   : > { %v2378_v47 = vpop.permute.xlu0 %2377  ;;  %v2420_v0 = vsel %vm2418_vm5, %v2411_v30, %v2380_v29  ;;  %v4285_v30 = vld [vmem:[%s4376_s22 + $0x30] sm:$0xff] }
 0x6fb   : > { %v2419_v43 = vsel %vm2418_vm5, %v2410_v56, %v2378_v47 }
 0x6fc   : > { %3649 = vmatprep.mubr.msk.f32.mxu1 %vm395_vm0, %v2419_v43 }
 0x6fd   : > { %3650 = vmatmul.mubr.msk.f32.vlgmr.msra.gmra.mrb[24].mxu1 %vm395_vm0, %v2420_v0  ;;  %v2384_v1 = vpop.permute.xlu1 %2383 }
 0x6fe   : > { %v2382_v33 = vpop.permute.xlu0 %2381  ;;  %v2422_v58 = vsel %vm2418_vm5, %v2413_v59, %v2384_v1 }
 0x6ff   : > { %v2421_v3 = vsel %vm2418_vm5, %v2412_v60, %v2382_v33 }
 0x700   : > { %3652 = vmatprep.mubr.msk.f32.mxu1 %vm395_vm0, %v2421_v3 }
 0x701   : > { %3653 = vmatmul.mubr.msk.f32.gmra.mrb[26].mxu1 %vm395_vm0, %v2422_v58  ;;  %v2388_v62 = vpop.permute.xlu1 %2387 }
 0x702   : > { %v2386_v32 = vpop.permute.xlu0 %2385  ;;  %v2424_v61 = vsel %vm2418_vm5, %v2415_v11, %v2388_v62 }
 0x703   : > { %v2423_v57 = vsel %vm2418_vm5, %v2414_v5, %v2386_v32 }
 0x704   : > { %3655 = vmatprep.mubr.msk.f32.mxu1 %vm395_vm0, %v2423_v57 }
 0x705   : > { %3656 = vmatmul.mubr.msk.f32.gmra.mrb[28].mxu1 %vm395_vm0, %v2424_v61  ;;  %v2392_v42 = vpop.permute.xlu1 %2391 }
 0x706   : > { %v2390_v15 = vpop.permute.xlu0 %2389  ;;  %v2426_v34 = vsel %vm2418_vm5, %v2417_v8, %v2392_v42 }
 0x707   : > { %v2425_v18 = vsel %vm2418_vm5, %v2416_v26, %v2390_v15 }
 0x708   : > { %3658 = vmatprep.mubr.msk.f32.mxu1 %vm395_vm0, %v2425_v18 }
 0x709   : > { %3659 = vmatmul.mubr.msk.f32.gmra.mrb[30].mxu1 %vm395_vm0, %v2426_v34 }
 0x7d0   : > { %v3651_v27 = vpop.f32.mrb[24].mxu1 }
 0x7d1   : > { %v2534_v4 = vadd.f32 %v3651_v27, %v3186_v25  ;;  %v2528_v41 = vpop.f32.mrb[25].mxu1 }
 0x7d2   : > { %v2529_v51 = vadd.f32 %v3186_v25, %v2528_v41 }
 0x7d3   : > { %v5262_v7 = vadd.f32 %v4278_v37, %v2534_v4 }
 0x7d4   : > { %v5265_v20 = vadd.f32 %v4279_v28, %v2529_v51  ;;  %v3654_v21 = vpop.f32.mrb[26].mxu1 }
 0x7d5   : > { %v2544_v17 = vadd.f32 %v3654_v21, %v3186_v25  ;;  %v2538_v53 = vpop.f32.mrb[27].mxu1  ;;  %v2578_v55 = vsel %vm395_vm0, %v5262_v7, 0.0 }
 0x7d6   : > { %v2539_v14 = vadd.f32 %v3186_v25, %v2538_v53  ;;  %2579 = vadd.xlane.f32.xlu1 %v2578_v55  ;;  %v2575_v38 = vsel %vm395_vm0, %v5265_v20, 0.0 }
 0x7d7   : > { %v5272_v45 = vadd.f32 %v4280_v50, %v2544_v17  ;;  %2576 = vadd.xlane.f32.xlu0 %v2575_v38 }
 0x7d8   : > { %v3657_v13 = vpop.f32.mrb[28].mxu1  ;;  %v5277_v6 = vadd.f32 %v4281_v24, %v2539_v14  ;;  %v2710_v24 = vld [vmem:[%s5459_s9 + $0x8] sm:$0xff] }
 0x7d9   : > { %v2554_v44 = vadd.f32 %v3657_v13, %v3186_v25  ;;  %v2548_v23 = vpop.f32.mrb[29].mxu1  ;;  %v2584_v2 = vsel %vm395_vm0, %v5272_v45, 0.0 }
 0x7da   : > { %v2549_v48 = vadd.f32 %v3186_v25, %v2548_v23  ;;  %v2581_v29 = vsel %vm395_vm0, %v5277_v6, 0.0 }
 0x7db   : > { %v5280_v22 = vadd.f32 %v4282_v46, %v2554_v44  ;;  %2585 = vadd.xlane.f32.xlu0 %v2584_v2  ;;  %v2709_v2 = vld [vmem:[%s5459_s9] sm:$0xff]  ;;  %v2711_v46 = vld [vmem:[%s5459_s9 + $0x10] sm:$0xff] }
 0x7dc   : > { %v3660_v31 = vpop.f32.mrb[30].mxu1  ;;  %v5285_v16 = vadd.f32 %v4283_v10, %v2549_v48  ;;  %v3901_v48 = vpack.c.bf16 %v2710_v24, %v2709_v2  ;;  %v2852_v10 = vld [vmem:[%s5460_s10 + $0x10] sm:$0xff] }
 0x7dd   : > { %v2564_v35 = vadd.f32 %v3660_v31, %v3186_v25  ;;  %v2558_v54 = vpop.f32.mrb[31].mxu1  ;;  %v2590_v49 = vsel %vm395_vm0, %v5280_v22, 0.0  ;;  %v2712_v31 = vld [vmem:[%s5459_s9 + $0x18] sm:$0xff] }
 0x7de   : > { %v2559_v36 = vadd.f32 %v3186_v25, %v2558_v54  ;;  %2591 = vadd.xlane.f32.xlu1 %v2590_v49  ;;  %v2587_v0 = vsel %vm395_vm0, %v5285_v16, 0.0  ;;  %3902 = vmatprep.subr.bf16.mxu0 %v3901_v48  ;;  %v2850_v54 = vld [vmem:[%s5460_s10] sm:$0xff]  ;;  %v2851_v49 = vld [vmem:[%s5460_s10 + $0x8] sm:$0xff] }
 0x7df   : > { %v5290_v56 = vadd.f32 %v4284_v40, %v2564_v35  ;;  %2582 = vadd.xlane.f32.xlu0 %v2581_v29  ;;  %3904 = vmatpush3.bf16.msra.mxu0 %v3901_v48  ;;  %v3905_v35 = vpack.c.bf16 %v2712_v31, %v2711_v46  ;;  %v2853_v29 = vld [vmem:[%s5460_s10 + $0x18] sm:$0xff] }
 0x7e0   : > { %v5295_v43 = vadd.f32 %v4285_v30, %v2559_v36  ;;  %v3909_v36 = vpack.c.bf16 %v2851_v49, %v2850_v54  ;;  %v3913_v40 = vpack.c.bf16 %v2853_v29, %v2852_v10  ;;  %v2855_v30 = vld [vmem:[%s5460_s10 + $0x28] sm:$0xff]  ;;  %v3196_v54 = vld [vmem:[%s5458_s8] ss:$0 sm:$0xff] }
 0x7e1   : > { %v2596_v47 = vsel %vm395_vm0, %v5290_v56, 0.0  ;;  %3906 = vmatprep.subr.bf16.mxu0 %v3905_v35 }
 0x7e2   : > { %2597 = vadd.xlane.f32.xlu1 %v2596_v47  ;;  %v2593_v19 = vsel %vm395_vm0, %v5295_v43, 0.0  ;;  %v2854_v47 = vld [vmem:[%s5460_s10 + $0x20] sm:$0xff]  ;;  %3910 = vmatprep.subr.bf16.mxu1 %v3909_v36 }
 0x7e3   : > { %2588 = vadd.xlane.f32.xlu0 %v2587_v0  ;;  %3908 = vmatpush3.bf16.msra.mxu0 %v3905_v35  ;;  %v3917_v0 = vpack.c.bf16 %v2855_v30, %v2854_v47 }
 0x7e4   : > { %3912 = vmatpush3.bf16.msra.mxu1 %v3909_v36 }
 0x7e5   : > { %3914 = vmatprep.subr.bf16.mxu1 %v3913_v40 }
 0x7e7   : > { %2594 = vadd.xlane.f32.xlu0 %v2593_v19  ;;  %v2856_v19 = vld [vmem:[%s5460_s10 + $0x30] sm:$0xff] }
 0x7e8   : > { %3916 = vmatpush3.bf16.msra.mxu1 %v3913_v40 }
 0x7e9   : > { %3918 = vmatprep.subr.bf16.mxu1 %v3917_v0 }
 0x7ec   : > { %3920 = vmatpush3.bf16.msra.mxu1 %v3917_v0 }
 0x863   : > { %v2580_v1 = vpop.xlane.xlu1 %2579 }
 0x864   : > { %v2600_v63 = vmul.f32 0.03125, %v2580_v1  ;;  %v2577_v60 = vpop.xlane.xlu0 %2576  ;;  %v2857_v1 = vld [vmem:[%s5460_s10 + $0x38] sm:$0xff] }
 0x865   : > { %v2599_v33 = vmul.f32 0.03125, %v2577_v60  ;;  %v2858_v60 = vld [vmem:[%s5460_s10 + $0x40] sm:$0xff] }
 0x866   : > { %v5302_v59 = vsub.f32 %v5262_v7, %v2600_v63  ;;  %v3921_v63 = vpack.c.bf16 %v2857_v1, %v2856_v19 }
 0x867   : > { %v5305_v3 = vsub.f32 %v5265_v20, %v2599_v33  ;;  %v2859_v33 = vld [vmem:[%s5460_s10 + $0x48] sm:$0xff] }
 0x868   : > { %v2586_v58 = vpop.xlane.xlu0 %2585  ;;  %v2616_v12 = vmul.f32 %v5302_v59, %v5302_v59  ;;  %3922 = vmatprep.subr.bf16.mxu1 %v3921_v63 }
 0x869   : > { %v2602_v62 = vmul.f32 0.03125, %v2586_v58  ;;  %v2615_v39 = vmul.f32 %v5305_v3, %v5305_v3  ;;  %v3925_v58 = vpack.c.bf16 %v2859_v33, %v2858_v60  ;;  %3924 = vmatpush3.bf16.msra.mxu1 %v3921_v63 }
 0x86a   : > { %v2626_v5 = vsel %vm395_vm0, %v2616_v12, 0.0  ;;  %v2860_v12 = vld [vmem:[%s5460_s10 + $0x50] sm:$0xff] }
 0x86b   : > { %v5313_v32 = vsub.f32 %v5272_v45, %v2602_v62  ;;  %v2592_v11 = vpop.xlane.xlu1 %2591  ;;  %2627 = vadd.xlane.f32.xlu1 %v2626_v5  ;;  %v2623_v57 = vsel %vm395_vm0, %v2615_v39, 0.0  ;;  %v2861_v62 = vld [vmem:[%s5460_s10 + $0x58] sm:$0xff]  ;;  %3926 = vmatprep.subr.bf16.mxu1 %v3925_v58  ;;  %v2862_v5 = vld [vmem:[%s5460_s10 + $0x60] sm:$0xff] }
 0x86c   : > { %v2604_v61 = vmul.f32 0.03125, %v2592_v11  ;;  %2624 = vadd.xlane.f32.xlu0 %v2623_v57  ;;  %v2583_v9 = vpop.xlane.xlu0 %2582  ;;  %v3929_v39 = vpack.c.bf16 %v2861_v62, %v2860_v12  ;;  %v2863_v11 = vld [vmem:[%s5460_s10 + $0x68] sm:$0xff] }
 0x86d   : > { %v2601_v42 = vmul.f32 0.03125, %v2583_v9  ;;  %v2618_v52 = vmul.f32 %v5313_v32, %v5313_v32  ;;  %3928 = vmatpush3.bf16.msra.mxu1 %v3925_v58  ;;  %v3933_v57 = vpack.c.bf16 %v2863_v11, %v2862_v5 }
 0x86e   : > { %v5319_v26 = vsub.f32 %v5280_v22, %v2604_v61  ;;  %3930 = vmatprep.subr.bf16.mxu1 %v3929_v39 }
 0x86f   : > { %v5322_v15 = vsub.f32 %v5277_v6, %v2601_v42  ;;  %v2598_v8 = vpop.xlane.xlu1 %2597  ;;  %v2632_v18 = vsel %vm395_vm0, %v2618_v52, 0.0 }
 0x870   : > { %v2606_v34 = vmul.f32 0.03125, %v2598_v8  ;;  %2633 = vadd.xlane.f32.xlu1 %v2632_v18  ;;  %v2589_v25 = vpop.xlane.xlu0 %2588  ;;  %v2620_v27 = vmul.f32 %v5319_v26, %v5319_v26 }
 0x871   : > { %v2603_v4 = vmul.f32 0.03125, %v2589_v25  ;;  %v2617_v41 = vmul.f32 %v5322_v15, %v5322_v15  ;;  %3932 = vmatpush3.bf16.msra.mxu1 %v3929_v39 }
 0x872   : > { %v5330_v51 = vsub.f32 %v5290_v56, %v2606_v34  ;;  %v2638_v37 = vsel %vm395_vm0, %v2620_v27, 0.0  ;;  %3934 = vmatprep.subr.bf16.mxu1 %v3933_v57 }
 0x873   : > { %v5334_v28 = vsub.f32 %v5285_v16, %v2603_v4  ;;  %v2629_v21 = vsel %vm395_vm0, %v2617_v41, 0.0 }
 0x874   : > { %2639 = vadd.xlane.f32.xlu1 %v2638_v37  ;;  %2630 = vadd.xlane.f32.xlu0 %v2629_v21  ;;  %v2595_v17 = vpop.xlane.xlu0 %2594  ;;  %v2622_v53 = vmul.f32 %v5330_v51, %v5330_v51 }
 0x875   : > { %v2605_v55 = vmul.f32 0.03125, %v2595_v17  ;;  %v2619_v14 = vmul.f32 %v5334_v28, %v5334_v28  ;;  %3936 = vmatpush3.bf16.msra.mxu1 %v3933_v57 }
 0x876   : > { %v2644_v38 = vsel %vm395_vm0, %v2622_v53, 0.0 }
 0x877   : > { %v5343_v50 = vsub.f32 %v5295_v43, %v2605_v55  ;;  %v2635_v13 = vsel %vm395_vm0, %v2619_v14, 0.0 }
 0x878   : > { %2645 = vadd.xlane.f32.xlu1 %v2644_v38  ;;  %2636 = vadd.xlane.f32.xlu0 %v2635_v13 }
 0x879   : > { %v2621_v44 = vmul.f32 %v5343_v50, %v5343_v50 }
 0x87b   : > { %v2641_v23 = vsel %vm395_vm0, %v2621_v44, 0.0 }
 0x87c   : > { %2642 = vadd.xlane.f32.xlu0 %v2641_v23  ;;  %v3195_v23 = vld [vmem:[%s5457_s7] ss:$0 sm:$0xff] }
 0x8f8   : > { %v2628_v61 = vpop.xlane.xlu1 %2627 }
 0x8f9   : > { %v2648_v9 = vmul.f32 0.03125, %v2628_v61  ;;  %v2625_v42 = vpop.xlane.xlu0 %2624 }
 0x8fa   : > { %v2647_v52 = vmul.f32 0.03125, %v2625_v42 }
 0x8fb   : > { %v2656_v8 = vadd.f32 1e-05, %v2648_v9 }
 0x8fc   : > { %v2655_v18 = vadd.f32 1e-05, %v2647_v52  ;;  %v2864_v52 = vld [vmem:[%s5460_s10 + $0x70] sm:$0xff] }
 0x8fd   : > { %4262 = vrsqrt.f32 %v2656_v8  ;;  %v2634_v34 = vpop.xlane.xlu1 %2633 }
 0x8fe   : > { %4264 = vrsqrt.f32 %v2655_v18  ;;  %v2650_v25 = vmul.f32 0.03125, %v2634_v34 }
 0x900   : > { %v2658_v27 = vadd.f32 1e-05, %v2650_v25 }
 0x901   : > { %v2640_v4 = vpop.xlane.xlu1 %2639  ;;  %v2631_v41 = vpop.xlane.xlu0 %2630 }
 0x902   : > { %4266 = vrsqrt.f32 %v2658_v27  ;;  %v2652_v37 = vmul.f32 0.03125, %v2640_v4  ;;  %v2649_v21 = vmul.f32 0.03125, %v2631_v41 }
 0x904   : > { %v2660_v17 = vadd.f32 1e-05, %v2652_v37  ;;  %v2657_v53 = vadd.f32 1e-05, %v2649_v21 }
 0x905   : > { %v2646_v55 = vpop.xlane.xlu1 %2645  ;;  %v2637_v14 = vpop.xlane.xlu0 %2636 }
 0x906   : > { %4268 = vrsqrt.f32 %v2660_v17  ;;  %v2654_v38 = vmul.f32 0.03125, %v2646_v55  ;;  %v2651_v13 = vmul.f32 0.03125, %v2637_v14 }
 0x907   : > { %v4263_v44 = vpop.eup %4262  ;;  %4270 = vrsqrt.f32 %v2657_v53 }
 0x908   : > { %v4265_v2 = vpop.eup %4264  ;;  %v2672_v24 = vmul.f32 %v4263_v44, %v5302_v59  ;;  %v2662_v48 = vadd.f32 1e-05, %v2654_v38  ;;  %v2659_v46 = vadd.f32 1e-05, %v2651_v13 }
 0x909   : > { %v2643_v31 = vpop.xlane.xlu0 %2642  ;;  %v2671_v35 = vmul.f32 %v4265_v2, %v5305_v3 }
 0x90a   : > { %v2687_v49 = vmul.f32 %v3195_v23, %v2672_v24  ;;  %4272 = vrsqrt.f32 %v2662_v48  ;;  %v2653_v10 = vmul.f32 0.03125, %v2643_v31 }
 0x90b   : > { %4274 = vrsqrt.f32 %v2659_v46  ;;  %v2686_v36 = vmul.f32 %v3195_v23, %v2671_v35 }
 0x90c   : > { %v4267_v29 = vpop.eup %4266  ;;  %v2661_v40 = vadd.f32 1e-05, %v2653_v10  ;;  %v2702_v30 = vadd.f32 %v3196_v54, %v2687_v49 }
 0x90d   : > { %v2701_v47 = vadd.f32 %v3196_v54, %v2686_v36  ;;  %v2674_v59 = vmul.f32 %v4267_v29, %v5313_v32 }
 0x90e   : > { %4276 = vrsqrt.f32 %v2661_v40 }
 0x90f   : > { %3669 = vmatprep.mubr.msk.f32.mxu0 %vm395_vm0, %v2701_v47  ;;  %v2689_v1 = vmul.f32 %v3195_v23, %v2674_v59 }
 0x910   : > { %v4269_v0 = vpop.eup %4268  ;;  %3670 = vmatmul.mubr.msk.f32.vlgmr.msra.gmra.mrb[48].mxu0 %vm395_vm0, %v2702_v30 }
 0x911   : > { %v4271_v3 = vpop.eup %4270  ;;  %v2676_v63 = vmul.f32 %v4269_v0, %v5319_v26  ;;  %v2704_v39 = vadd.f32 %v3196_v54, %v2689_v1 }
 0x912   : > { %v2673_v19 = vmul.f32 %v4271_v3, %v5322_v15 }
 0x913   : > { %v2691_v5 = vmul.f32 %v3195_v23, %v2676_v63 }
 0x914   : > { %v4273_v60 = vpop.eup %4272  ;;  %v2688_v33 = vmul.f32 %v3195_v23, %v2673_v19 }
 0x915   : > { %v4275_v58 = vpop.eup %4274  ;;  %v2678_v11 = vmul.f32 %v4273_v60, %v5330_v51  ;;  %v2706_v26 = vadd.f32 %v3196_v54, %v2691_v5 }
 0x916   : > { %v2703_v12 = vadd.f32 %v3196_v54, %v2688_v33  ;;  %v2675_v62 = vmul.f32 %v4275_v58, %v5334_v28 }
 0x917   : > { %v2693_v42 = vmul.f32 %v3195_v23, %v2678_v11 }
 0x918   : > { %v4277_v32 = vpop.eup %4276  ;;  %3672 = vmatprep.mubr.msk.f32.mxu0 %vm395_vm0, %v2703_v12  ;;  %v2690_v57 = vmul.f32 %v3195_v23, %v2675_v62 }
 0x919   : > { %3673 = vmatmul.mubr.msk.f32.gmra.mrb[50].mxu0 %vm395_vm0, %v2704_v39  ;;  %v2677_v15 = vmul.f32 %v4277_v32, %v5343_v50  ;;  %v2708_v51 = vadd.f32 %v3196_v54, %v2693_v42  ;;  %v2865_v50 = vld [vmem:[%s5460_s10 + $0x78] sm:$0xff] }
 0x91a   : > { %v2705_v61 = vadd.f32 %v3196_v54, %v2690_v57  ;;  %v3937_v8 = vpack.c.bf16 %v2865_v50, %v2864_v52 }
 0x91b   : > { %v2692_v9 = vmul.f32 %v3195_v23, %v2677_v15 }
 0x91c   : > { %3675 = vmatprep.mubr.msk.f32.mxu0 %vm395_vm0, %v2705_v61  ;;  %3938 = vmatprep.subr.bf16.mxu1 %v3937_v8 }
 0x91d   : > { %3676 = vmatmul.mubr.msk.f32.gmra.mrb[52].mxu0 %vm395_vm0, %v2706_v26  ;;  %v2707_v28 = vadd.f32 %v3196_v54, %v2692_v9  ;;  %3940 = vmatpush3.bf16.msra.mxu1 %v3937_v8 }
 0x91f   : > { %3678 = vmatprep.mubr.msk.f32.mxu0 %vm395_vm0, %v2707_v28 }
 0x921   : > { %3679 = vmatmul.mubr.msk.f32.gmra.mrb[54].mxu0 %vm395_vm0, %v2708_v51 }
 0x9e3   : > { %v3671_v18 = vpop.f32.mrb[48].mxu0 }
 0x9e4   : > { %v2803_v34 = vpop.f32.mrb[49].mxu0  ;;  %v2843_v27 = vmax.f32 %v3671_v18, 0.0 }
 0x9e5   : > { %v2842_v25 = vmax.f32 %v2803_v34, 0.0 }
 0x9e7   : > { %3713 = vmatprep.mubr.f32.mxu1 %v2842_v25 }
 0x9e8   : > { %3714 = vmatmul.mubr.f32.vlgmr.msra.gmra.mrb[32].mxu1 %v2843_v27 }
 0x9ec   : > { %v3674_v4 = vpop.f32.mrb[50].mxu0 }
 0x9ed   : > { %v2813_v41 = vpop.f32.mrb[51].mxu0  ;;  %v2845_v21 = vmax.f32 %v3674_v4, 0.0 }
 0x9ee   : > { %v2844_v37 = vmax.f32 %v2813_v41, 0.0 }
 0x9f0   : > { %v3677_v17 = vpop.f32.mrb[52].mxu0  ;;  %3716 = vmatprep.mubr.f32.mxu1 %v2844_v37 }
 0x9f1   : > { %v2823_v53 = vpop.f32.mrb[53].mxu0  ;;  %3717 = vmatmul.mubr.f32.gmra.mrb[34].mxu1 %v2845_v21  ;;  %v2847_v14 = vmax.f32 %v3677_v17, 0.0 }
 0x9f2   : > { %v2846_v55 = vmax.f32 %v2823_v53, 0.0 }
 0x9f4   : > { %v3680_v38 = vpop.f32.mrb[54].mxu0  ;;  %3719 = vmatprep.mubr.f32.mxu1 %v2846_v55 }
 0x9f5   : > { %v2833_v13 = vpop.f32.mrb[55].mxu0  ;;  %3720 = vmatmul.mubr.f32.gmra.mrb[36].mxu1 %v2847_v14  ;;  %v2849_v23 = vmax.f32 %v3680_v38, 0.0 }
 0x9f6   : > { %v2848_v44 = vmax.f32 %v2833_v13, 0.0 }
 0x9f8   : > { %3722 = vmatprep.mubr.f32.mxu1 %v2848_v44 }
 0x9f9   : > { %3723 = vmatmul.mubr.f32.gmra.mrb[38].mxu1 %v2849_v23 }
 0xabb   : > { %v3715_v2 = vpop.f32.mrb[32].mxu1 }
 0xabc   : > { %v2932_v24 = vpop.f32.mrb[33].mxu1  ;;  %v2972_v46 = vadd.f32 %v3715_v2, %v5262_v7 }
 0xabd   : > { %v2971_v48 = vadd.f32 %v2932_v24, %v5265_v20 }
 0xabf   : > { %2979 = vxpose.xlu0.b32.start [1/8] (short) (narrow) %v2971_v48, 32 }
 0xac3   : > { %2980 = vxpose.xlu0.b32.cont [2/8] (short) (narrow) %v2972_v46, 32 }
 0xac4   : > { %v3718_v31 = vpop.f32.mrb[34].mxu1 }
 0xac5   : > { %v2942_v35 = vpop.f32.mrb[35].mxu1  ;;  %v2974_v36 = vadd.f32 %v3718_v31, %v5272_v45 }
 0xac6   : > { %v2973_v54 = vadd.f32 %v2942_v35, %v5277_v6 }
 0xac8   : > { %2981 = vxpose.xlu0.b32.cont [3/8] (short) (narrow) %v2973_v54, 32  ;;  %v3721_v49 = vpop.f32.mrb[36].mxu1 }
 0xac9   : > { %v2952_v10 = vpop.f32.mrb[37].mxu1  ;;  %v2976_v20 = vadd.f32 %v3721_v49, %v5280_v22 }
 0xaca   : > { %v2975_v47 = vadd.f32 %v2952_v10, %v5285_v16 }
 0xacc   : > { %2982 = vxpose.xlu0.b32.cont [4/8] (short) (narrow) %v2974_v36, 32  ;;  %v3724_v29 = vpop.f32.mrb[38].mxu1 }
 0xacd   : > { %v2962_v40 = vpop.f32.mrb[39].mxu1  ;;  %v2978_v6 = vadd.f32 %v3724_v29, %v5290_v56 }
 0xace   : > { %v2977_v7 = vadd.f32 %v2962_v40, %v5295_v43 }
 0xad0   : > { %2983 = vxpose.xlu0.b32.cont [5/8] (short) (narrow) %v2975_v47, 32 }
 0xad4   : > { %2984 = vxpose.xlu0.b32.cont [6/8] (short) (narrow) %v2976_v20, 32 }
 0xad8   : > { %2985 = vxpose.xlu0.b32.cont [7/8] (short) (narrow) %v2977_v7, 32 }
 0xadc   : > { %2986 = vxpose.xlu0.b32.end [8/8] (short) (narrow) %v2978_v6, 32 }
 0xb40   : > { %v2995_v45 = vpop.trf.xlu0 }
 0xb41   : > { %3011 = vst.msk [vmem:[%s386_s16] sm:$0xff] %vm1340_vm3, %v2995_v45 }
 0xb44   : > { %v2996_v30 = vpop.trf.xlu0 }
 0xb45   : > { %3012 = vst.msk [vmem:[%s386_s16 + $0x8] sm:$0xff] %vm1340_vm3, %v2996_v30 }
 0xb48   : > { %v2997_v16 = vpop.trf.xlu0 }
 0xb49   : > { %3013 = vst.msk [vmem:[%s386_s16 + $0x10] sm:$0xff] %vm1340_vm3, %v2997_v16 }
 0xb4c   : > { %v2998_v22 = vpop.trf.xlu0 }
 0xb4d   : > { %3014 = vst.msk [vmem:[%s386_s16 + $0x18] sm:$0xff] %vm1340_vm3, %v2998_v22 }
 0xb4e PF: > { %s21_s17 = sadd.s32 1, %s4292_s17  }
 0xb4f   : > { %p18_p4 = scmp.ge.s32.totalorder %s21_s17, 4  }
 0xb51   :  { %20 = sbr.rel (!%p18_p4) target bundleno = 1 (0x1), region = 94 }

</bundles_post_ra>
